<compile_context>
chip_gen: v5e
topology: v5e:2x2
jax: 0.10.0
libtpu: 0.0.40
codegen_flags: <defaults>
</compile_context>

<pallas_src>
import functools
import math

import jax
import jax.numpy as jnp
from jax.experimental import pallas as pl
from jax.experimental.pallas import tpu as pltpu  # noqa: F401  (TPU backend)


def _round_up(x, m):
    return (x + m - 1) // m * m


# ----------------------------------------------------------------------------
# Pallas kernels
# ----------------------------------------------------------------------------
def _conv_mm_kernel(wT_ref, colsT_ref, b_ref, o_ref):
    # out^T = relu(W^T @ cols^T + b)   -> lane axis carries B*OH*OW (lane-dense)
    y = jnp.dot(wT_ref[...], colsT_ref[...], preferred_element_type=jnp.float32)
    y = jnp.maximum(y + b_ref[...], 0.0)
    o_ref[...] = y.astype(o_ref.dtype)


def pallas_conv_mm(wT, colsT, b):
    """wT: (Cout, K) bf16, colsT: (K, M) bf16, b: (Cout, 1) f32 -> (Cout, M) bf16."""
    cout = wT.shape[0]
    m = colsT.shape[1]
    return pl.pallas_call(
        _conv_mm_kernel,
        out_shape=jax.ShapeDtypeStruct((cout, m), jnp.bfloat16),
    )(wT, colsT, b)


def _tail_kernel(cols5_ref, w5_ref, b5_ref, w6_ref, b6_ref,
                 wl1_ref, bl1_ref, wm_ref, bm_ref, ws_ref, bs_ref,
                 eps_ref, maxa_ref, scale_ref, shift_ref,
                 a_ref, logpi_ref, *, bp):
    # conv5 (3x3, stride 1, 5x5 -> 3x3) as one im2col matmul; rows are ordered
    # (spatial position p, batch b) with batch padded to bp (sublane multiple).
    y5 = jnp.dot(cols5_ref[...], w5_ref[...], preferred_element_type=jnp.float32)
    y5 = jnp.maximum(y5 + b5_ref[...], 0.0).astype(jnp.bfloat16)      # (9*bp, 128)

    # conv6 (3x3 -> 1x1): full contraction over the 9 spatial taps.
    x6 = jnp.zeros((bp, 256), jnp.float32)
    for p in range(9):
        x6 = x6 + jnp.dot(y5[p * bp:(p + 1) * bp, :], w6_ref[p],
                          preferred_element_type=jnp.float32)
    x6 = jnp.maximum(x6 + b6_ref[...], 0.0)                            # (bp, 256)

    # l1 + ReLU
    h = jnp.dot(x6, wl1_ref[...], preferred_element_type=jnp.float32) + bl1_ref[...]
    h = jnp.maximum(h, 0.0)                                            # (bp, 32)

    # mean / log_std heads
    mean = jnp.dot(h, wm_ref[...], preferred_element_type=jnp.float32) + bm_ref[...]
    log_std = jnp.dot(h, ws_ref[...], preferred_element_type=jnp.float32) + bs_ref[...]
    log_std = jnp.clip(log_std, -20.0, 2.0)
    std = jnp.exp(log_std)

    eps = eps_ref[...]
    a = mean + std * eps                                               # rsample
    # Normal log_prob at a = mean + std*eps  (exact; avoids the divide)
    logp = -0.5 * eps * eps - log_std - 0.5 * math.log(2.0 * math.pi)
    log_pi = jnp.sum(logp, axis=1, keepdims=True)
    # tanh-squash correction: 2 * (log 2 - a - softplus(-2a))
    neg2a = -2.0 * a
    softplus = jnp.maximum(neg2a, 0.0) + jnp.log1p(jnp.exp(-jnp.abs(neg2a)))
    corr = 2.0 * (math.log(2.0) - a - softplus)
    log_pi = log_pi - jnp.sum(corr, axis=1, keepdims=True)

    a_t = maxa_ref[...] * jnp.tanh(a)
    a_ref[...] = a_t * scale_ref[...] + shift_ref[...]
    logpi_ref[...] = log_pi


def pallas_tail(cols5, kp, eps_p, scale, shift, bp):
    adim = kp["wm"].shape[1]
    return pl.pallas_call(
        functools.partial(_tail_kernel, bp=bp),
        out_shape=(jax.ShapeDtypeStruct((bp, adim), jnp.float32),
                   jax.ShapeDtypeStruct((bp, 1), jnp.float32)),
    )(cols5, kp["w5"], kp["b5"], kp["w6"], kp["b6"],
      kp["wl1"], kp["bl1"], kp["wm"], kp["bm"], kp["ws"], kp["bs"],
      eps_p, kp["max_action"], scale, shift)


# ----------------------------------------------------------------------------
# Wrapper-side layout glue (channels-first im2col; pure data movement)
# ----------------------------------------------------------------------------
def _im2col_cf(x_cf, k, stride):
    """x_cf: (C, B, H, W) -> colsT: (k*k*C, B*oh*ow), K ordered (kh, kw, cin)."""
    C, B, H, W = x_cf.shape
    oh = (H - k) // stride + 1
    ow = (W - k) // stride + 1
    taps = []
    for i in range(k):
        for j in range(k):
            taps.append(x_cf[:, :, i:i + stride * oh:stride,
                                   j:j + stride * ow:stride])
    p = jnp.stack(taps, axis=0)                       # (k*k, C, B, oh, ow)
    return p.reshape(k * k * C, B * oh * ow), oh, ow


# ----------------------------------------------------------------------------
# Parameters (deterministic synthetic init mirroring the module's __init__)
# ----------------------------------------------------------------------------
_CONV_SPECS = [  # (cin, cout, kernel, stride)  -- exactly cnn_base
    (4, 8, 4, 2), (8, 16, 3, 2), (16, 32, 3, 2),
    (32, 64, 3, 2), (64, 128, 3, 1), (128, 256, 3, 1),
]


def init_params(key, action_dim=3, hidden_width=32):
    params = {"convs": []}
    gain = math.sqrt(2.0)  # nn.init.calculate_gain('relu')
    for (cin, cout, k, _s) in _CONV_SPECS:
        key, kw = jax.random.split(key)
        fan_in, fan_out = cin * k * k, cout * k * k
        bound = gain * math.sqrt(6.0 / (fan_in + fan_out))  # xavier_uniform_
        w = jax.random.uniform(kw, (k, k, cin, cout), jnp.float32, -bound, bound)
        b = jnp.full((cout,), 0.1, jnp.float32)              # constant_(bias, 0.1)
        params["convs"].append((w, b))

    def linear(k_, fin, fout):
        kw_, kb_ = jax.random.split(k_)
        bound = 1.0 / math.sqrt(fin)                          # default nn.Linear init
        w_ = jax.random.uniform(kw_, (fin, fout), jnp.float32, -bound, bound)
        b_ = jax.random.uniform(kb_, (fout,), jnp.float32, -bound, bound)
        return w_, b_

    key, k1, k2, k3 = jax.random.split(key, 4)
    params["l1"] = linear(k1, 256, hidden_width)
    params["mean"] = linear(k2, hidden_width, action_dim)
    params["log_std"] = linear(k3, hidden_width, action_dim)
    params["max_action"] = jnp.ones((action_dim,), jnp.float32)
    return params


def prepare_params(params):
    """Repack weights into kernel-friendly layouts/dtypes (done once, off-path)."""
    kp = {"convsT": []}
    for (w, b), (cin, cout, k, _s) in zip(params["convs"][:4], _CONV_SPECS[:4]):
        # (KH,KW,Cin,Cout) -> (Cout, KH*KW*Cin)  — matches colsT K ordering
        wT = jnp.transpose(w, (3, 0, 1, 2)).reshape(cout, k * k * cin)
        kp["convsT"].append((wT.astype(jnp.bfloat16),
                             b.reshape(cout, 1).astype(jnp.float32)))
    w5, b5 = params["convs"][4]
    kp["w5"] = w5.reshape(3 * 3 * 64, 128).astype(jnp.bfloat16)
    kp["b5"] = b5.reshape(1, 128).astype(jnp.float32)
    w6, b6 = params["convs"][5]
    kp["w6"] = w6.reshape(9, 128, 256).astype(jnp.bfloat16)
    kp["b6"] = b6.reshape(1, 256).astype(jnp.float32)
    kp["wl1"] = params["l1"][0].astype(jnp.float32)
    kp["bl1"] = params["l1"][1].reshape(1, -1).astype(jnp.float32)
    kp["wm"] = params["mean"][0].astype(jnp.float32)
    kp["bm"] = params["mean"][1].reshape(1, -1).astype(jnp.float32)
    kp["ws"] = params["log_std"][0].astype(jnp.float32)
    kp["bs"] = params["log_std"][1].reshape(1, -1).astype(jnp.float32)
    kp["max_action"] = params["max_action"].reshape(1, -1).astype(jnp.float32)
    return kp


# ----------------------------------------------------------------------------
# Forward pass
# ----------------------------------------------------------------------------
def actor_forward(kp, x_nchw, eps, deterministic=False):
    B = x_nchw.shape[0]
    bp = _round_up(max(B, 1), 8)                       # sublane-aligned batch pad

    # NCHW -> channels-first (C, B, H, W) bf16: spatial*batch stays on the lane
    # axis of every conv output (lane-dense stores).
    x_cf = jnp.transpose(x_nchw, (1, 0, 2, 3)).astype(jnp.bfloat16)

    # Convs 1-4 (stride 2): wrapper im2col + single-block lane-dense matmul.
    for (wT, b), (cin, cout, k, s) in zip(kp["convsT"], _CONV_SPECS[:4]):
        colsT, oh, ow = _im2col_cf(x_cf, k, s)
        outT = pallas_conv_mm(wT, colsT, b)            # (cout, B*oh*ow) bf16
        x_cf = outT.reshape(cout, B, oh, ow)

    # Fused tail: conv5 + conv6 + l1 + mean/log_std + Gaussian head in ONE kernel.
    # Build conv5 im2col with batch padded to bp, rows ordered (position, batch)
    # so the in-kernel conv6 reduction uses sublane-aligned static slices.
    x4 = jnp.pad(x_cf, ((0, 0), (0, bp - B), (0, 0), (0, 0)))     # (64, bp, 5, 5)
    taps = [x4[:, :, i:i + 3, j:j + 3] for i in range(3) for j in range(3)]
    p5 = jnp.stack(taps, axis=0)                                   # (9, 64, bp, 3, 3)
    cols5 = jnp.transpose(p5, (3, 4, 2, 0, 1)).reshape(9 * bp, 9 * 64)

    if deterministic:
        eps = jnp.zeros_like(eps)                      # a = mean
    eps_p = jnp.pad(eps.astype(jnp.float32), ((0, bp - B), (0, 0)))

    scale = jnp.array([[1.0, 0.5, 0.5]], jnp.float32)
    shift = jnp.array([[0.0, 0.5, 0.5]], jnp.float32)
    a, log_pi = pallas_tail(cols5, kp, eps_p, scale, shift, bp)
    return a[:B], log_pi[:B]


if __name__ == "__main__":
    key = jax.random.PRNGKey(0)
    kparam_key, kx, ke = jax.random.split(key, 3)
    raw_params = init_params(kparam_key, action_dim=3, hidden_width=32)
    kparams = prepare_params(raw_params)

    B = 2
    # 96x96 is the spatial size implied by cnn_base + view(-1, 256)
    x = jax.random.uniform(kx, (B, 4, 96, 96), jnp.float32)       # NCHW (PyTorch)
    eps = jax.random.normal(ke, (B, 3), jnp.float32)              # rsample noise

    fwd = jax.jit(actor_forward, static_argnames=("deterministic",))
    a, log_pi = fwd(kparams, x, eps)
    jax.block_until_ready((a, log_pi))

    assert a.shape == (B, 3) and log_pi.shape == (B, 1)
    assert bool(jnp.all(jnp.isfinite(a))) and bool(jnp.all(jnp.isfinite(log_pi)))
    print("KERNEL_OK")
</pallas_src>

<mosaic_0001>
module attributes {stable_mosaic.version = 11 : i64} {
  func.func @_conv_mm_kernel(%arg0: memref<8x64xbf16, #tpu.memory_space<vmem>>, %arg1: memref<64x4418xbf16, #tpu.memory_space<vmem>>, %arg2: memref<8x1xf32, #tpu.memory_space<vmem>>, %arg3: memref<8x4418xbf16, #tpu.memory_space<vmem>>) attributes {dimension_semantics = [], scalar_prefetch = 0 : i64, scratch_operands = 0 : i64, tpu.core_type = #tpu.core_type<tc>} {
    %c0 = arith.constant 0 : index
    %c0_0 = arith.constant 0 : index
    %0 = vector.load %arg0[%c0, %c0_0] : memref<8x64xbf16, #tpu.memory_space<vmem>>, vector<8x64xbf16>
    %c0_1 = arith.constant 0 : index
    %c0_2 = arith.constant 0 : index
    %1 = vector.load %arg1[%c0_1, %c0_2] : memref<64x4418xbf16, #tpu.memory_space<vmem>>, vector<64x4418xbf16>
    %cst = arith.constant dense<0.000000e+00> : vector<8x4418xf32>
    %2 = tpu.matmul %0, %1, %cst {dimension_numbers = #tpu.dot_dimension_numbers<[1], [0], [0], [1], [0, 0, 1, 1], [], []>} : vector<8x64xbf16>, vector<64x4418xbf16>, vector<8x4418xf32> -> vector<8x4418xf32>
    %c0_3 = arith.constant 0 : index
    %c0_4 = arith.constant 0 : index
    %3 = vector.load %arg2[%c0_3, %c0_4] : memref<8x1xf32, #tpu.memory_space<vmem>>, vector<8x1xf32>
    %4 = vector.broadcast %3 : vector<8x1xf32> to vector<8x4418xf32>
    %5 = arith.addf %2, %4 : vector<8x4418xf32>
    %cst_5 = arith.constant 0.000000e+00 : f32
    %6 = vector.broadcast %cst_5 : f32 to vector<8x4418xf32>
    %7 = arith.maximumf %5, %6 : vector<8x4418xf32>
    %8 = arith.truncf %7 : vector<8x4418xf32> to vector<8x4418xbf16>
    %c0_6 = arith.constant 0 : index
    %c0_7 = arith.constant 0 : index
    %9 = vector.load %arg3[%c0_6, %c0_7] : memref<8x4418xbf16, #tpu.memory_space<vmem>>, vector<8x4418xbf16>
    tpu.vector_store %arg3[%c0_6, %c0_7], %8 {strides = array<i32>} : memref<8x4418xbf16, #tpu.memory_space<vmem>>, vector<8x4418xbf16>,
    return
  }
}

module attributes {stable_mosaic.version = 11 : i64} {
  func.func @_conv_mm_kernel(%arg0: memref<16x72xbf16, #tpu.memory_space<vmem>>, %arg1: memref<72x1058xbf16, #tpu.memory_space<vmem>>, %arg2: memref<16x1xf32, #tpu.memory_space<vmem>>, %arg3: memref<16x1058xbf16, #tpu.memory_space<vmem>>) attributes {dimension_semantics = [], scalar_prefetch = 0 : i64, scratch_operands = 0 : i64, tpu.core_type = #tpu.core_type<tc>} {
    %c0 = arith.constant 0 : index
    %c0_0 = arith.constant 0 : index
    %0 = vector.load %arg0[%c0, %c0_0] : memref<16x72xbf16, #tpu.memory_space<vmem>>, vector<16x72xbf16>
    %c0_1 = arith.constant 0 : index
    %c0_2 = arith.constant 0 : index
    %1 = vector.load %arg1[%c0_1, %c0_2] : memref<72x1058xbf16, #tpu.memory_space<vmem>>, vector<72x1058xbf16>
    %cst = arith.constant dense<0.000000e+00> : vector<16x1058xf32>
    %2 = tpu.matmul %0, %1, %cst {dimension_numbers = #tpu.dot_dimension_numbers<[1], [0], [0], [1], [0, 0, 1, 1], [], []>} : vector<16x72xbf16>, vector<72x1058xbf16>, vector<16x1058xf32> -> vector<16x1058xf32>
    %c0_3 = arith.constant 0 : index
    %c0_4 = arith.constant 0 : index
    %3 = vector.load %arg2[%c0_3, %c0_4] : memref<16x1xf32, #tpu.memory_space<vmem>>, vector<16x1xf32>
    %4 = vector.broadcast %3 : vector<16x1xf32> to vector<16x1058xf32>
    %5 = arith.addf %2, %4 : vector<16x1058xf32>
    %cst_5 = arith.constant 0.000000e+00 : f32
    %6 = vector.broadcast %cst_5 : f32 to vector<16x1058xf32>
    %7 = arith.maximumf %5, %6 : vector<16x1058xf32>
    %8 = arith.truncf %7 : vector<16x1058xf32> to vector<16x1058xbf16>
    %c0_6 = arith.constant 0 : index
    %c0_7 = arith.constant 0 : index
    %9 = vector.load %arg3[%c0_6, %c0_7] : memref<16x1058xbf16, #tpu.memory_space<vmem>>, vector<16x1058xbf16>
    tpu.vector_store %arg3[%c0_6, %c0_7], %8 {strides = array<i32>} : memref<16x1058xbf16, #tpu.memory_space<vmem>>, vector<16x1058xbf16>,
    return
  }
}

module attributes {stable_mosaic.version = 11 : i64} {
  func.func @_conv_mm_kernel(%arg0: memref<32x144xbf16, #tpu.memory_space<vmem>>, %arg1: memref<144x242xbf16, #tpu.memory_space<vmem>>, %arg2: memref<32x1xf32, #tpu.memory_space<vmem>>, %arg3: memref<32x242xbf16, #tpu.memory_space<vmem>>) attributes {dimension_semantics = [], scalar_prefetch = 0 : i64, scratch_operands = 0 : i64, tpu.core_type = #tpu.core_type<tc>} {
    %c0 = arith.constant 0 : index
    %c0_0 = arith.constant 0 : index
    %0 = vector.load %arg0[%c0, %c0_0] : memref<32x144xbf16, #tpu.memory_space<vmem>>, vector<32x144xbf16>
    %c0_1 = arith.constant 0 : index
    %c0_2 = arith.constant 0 : index
    %1 = vector.load %arg1[%c0_1, %c0_2] : memref<144x242xbf16, #tpu.memory_space<vmem>>, vector<144x242xbf16>
    %cst = arith.constant dense<0.000000e+00> : vector<32x242xf32>
    %2 = tpu.matmul %0, %1, %cst {dimension_numbers = #tpu.dot_dimension_numbers<[1], [0], [0], [1], [0, 0, 1, 1], [], []>} : vector<32x144xbf16>, vector<144x242xbf16>, vector<32x242xf32> -> vector<32x242xf32>
    %c0_3 = arith.constant 0 : index
    %c0_4 = arith.constant 0 : index
    %3 = vector.load %arg2[%c0_3, %c0_4] : memref<32x1xf32, #tpu.memory_space<vmem>>, vector<32x1xf32>
    %4 = vector.broadcast %3 : vector<32x1xf32> to vector<32x242xf32>
    %5 = arith.addf %2, %4 : vector<32x242xf32>
    %cst_5 = arith.constant 0.000000e+00 : f32
    %6 = vector.broadcast %cst_5 : f32 to vector<32x242xf32>
    %7 = arith.maximumf %5, %6 : vector<32x242xf32>
    %8 = arith.truncf %7 : vector<32x242xf32> to vector<32x242xbf16>
    %c0_6 = arith.constant 0 : index
    %c0_7 = arith.constant 0 : index
    %9 = vector.load %arg3[%c0_6, %c0_7] : memref<32x242xbf16, #tpu.memory_space<vmem>>, vector<32x242xbf16>
    tpu.vector_store %arg3[%c0_6, %c0_7], %8 {strides = array<i32>} : memref<32x242xbf16, #tpu.memory_space<vmem>>, vector<32x242xbf16>,
    return
  }
}

module attributes {stable_mosaic.version = 11 : i64} {
  func.func @_conv_mm_kernel(%arg0: memref<64x288xbf16, #tpu.memory_space<vmem>>, %arg1: memref<288x50xbf16, #tpu.memory_space<vmem>>, %arg2: memref<64x1xf32, #tpu.memory_space<vmem>>, %arg3: memref<64x50xbf16, #tpu.memory_space<vmem>>) attributes {dimension_semantics = [], scalar_prefetch = 0 : i64, scratch_operands = 0 : i64, tpu.core_type = #tpu.core_type<tc>} {
    %c0 = arith.constant 0 : index
    %c0_0 = arith.constant 0 : index
    %0 = vector.load %arg0[%c0, %c0_0] : memref<64x288xbf16, #tpu.memory_space<vmem>>, vector<64x288xbf16>
    %c0_1 = arith.constant 0 : index
    %c0_2 = arith.constant 0 : index
    %1 = vector.load %arg1[%c0_1, %c0_2] : memref<288x50xbf16, #tpu.memory_space<vmem>>, vector<288x50xbf16>
    %cst = arith.constant dense<0.000000e+00> : vector<64x50xf32>
    %2 = tpu.matmul %0, %1, %cst {dimension_numbers = #tpu.dot_dimension_numbers<[1], [0], [0], [1], [0, 0, 1, 1], [], []>} : vector<64x288xbf16>, vector<288x50xbf16>, vector<64x50xf32> -> vector<64x50xf32>
    %c0_3 = arith.constant 0 : index
    %c0_4 = arith.constant 0 : index
    %3 = vector.load %arg2[%c0_3, %c0_4] : memref<64x1xf32, #tpu.memory_space<vmem>>, vector<64x1xf32>
    %4 = vector.broadcast %3 : vector<64x1xf32> to vector<64x50xf32>
    %5 = arith.addf %2, %4 : vector<64x50xf32>
    %cst_5 = arith.constant 0.000000e+00 : f32
    %6 = vector.broadcast %cst_5 : f32 to vector<64x50xf32>
    %7 = arith.maximumf %5, %6 : vector<64x50xf32>
    %8 = arith.truncf %7 : vector<64x50xf32> to vector<64x50xbf16>
    %c0_6 = arith.constant 0 : index
    %c0_7 = arith.constant 0 : index
    %9 = vector.load %arg3[%c0_6, %c0_7] : memref<64x50xbf16, #tpu.memory_space<vmem>>, vector<64x50xbf16>
    tpu.vector_store %arg3[%c0_6, %c0_7], %8 {strides = array<i32>} : memref<64x50xbf16, #tpu.memory_space<vmem>>, vector<64x50xbf16>,
    return
  }
}

module attributes {stable_mosaic.version = 11 : i64} {
  func.func @_tail_kernel(%arg0: memref<72x576xbf16, #tpu.memory_space<vmem>>, %arg1: memref<576x128xbf16, #tpu.memory_space<vmem>>, %arg2: memref<1x128xf32, #tpu.memory_space<vmem>>, %arg3: memref<9x128x256xbf16, #tpu.memory_space<vmem>>, %arg4: memref<1x256xf32, #tpu.memory_space<vmem>>, %arg5: memref<256x32xf32, #tpu.memory_space<vmem>>, %arg6: memref<1x32xf32, #tpu.memory_space<vmem>>, %arg7: memref<32x3xf32, #tpu.memory_space<vmem>>, %arg8: memref<1x3xf32, #tpu.memory_space<vmem>>, %arg9: memref<32x3xf32, #tpu.memory_space<vmem>>, %arg10: memref<1x3xf32, #tpu.memory_space<vmem>>, %arg11: memref<8x3xf32, #tpu.memory_space<vmem>>, %arg12: memref<1x3xf32, #tpu.memory_space<vmem>>, %arg13: memref<1x3xf32, #tpu.memory_space<vmem>>, %arg14: memref<1x3xf32, #tpu.memory_space<vmem>>, %arg15: memref<8x3xf32, #tpu.memory_space<vmem>>, %arg16: memref<8x1xf32, #tpu.memory_space<vmem>>) attributes {dimension_semantics = [], scalar_prefetch = 0 : i64, scratch_operands = 0 : i64, tpu.core_type = #tpu.core_type<tc>} {
    %c0 = arith.constant 0 : index
    %c0_0 = arith.constant 0 : index
    %0 = vector.load %arg0[%c0, %c0_0] : memref<72x576xbf16, #tpu.memory_space<vmem>>, vector<72x576xbf16>
    %c0_1 = arith.constant 0 : index
    %c0_2 = arith.constant 0 : index
    %1 = vector.load %arg1[%c0_1, %c0_2] : memref<576x128xbf16, #tpu.memory_space<vmem>>, vector<576x128xbf16>
    %cst = arith.constant dense<0.000000e+00> : vector<72x128xf32>
    %2 = tpu.matmul %0, %1, %cst {dimension_numbers = #tpu.dot_dimension_numbers<[1], [0], [0], [1], [0, 0, 1, 1], [], []>} : vector<72x576xbf16>, vector<576x128xbf16>, vector<72x128xf32> -> vector<72x128xf32>
    %c0_3 = arith.constant 0 : index
    %c0_4 = arith.constant 0 : index
    %3 = vector.load %arg2[%c0_3, %c0_4] : memref<1x128xf32, #tpu.memory_space<vmem>>, vector<1x128xf32>
    %4 = vector.broadcast %3 : vector<1x128xf32> to vector<72x128xf32>
    %5 = arith.addf %2, %4 : vector<72x128xf32>
    %cst_5 = arith.constant 0.000000e+00 : f32
    %6 = vector.broadcast %cst_5 : f32 to vector<72x128xf32>
    %7 = arith.maximumf %5, %6 : vector<72x128xf32>
    %8 = arith.truncf %7 : vector<72x128xf32> to vector<72x128xbf16>
    %cst_6 = arith.constant 0.000000e+00 : f32
    %9 = vector.broadcast %cst_6 : f32 to vector<8x256xf32>
    %10 = vector.extract_strided_slice %8 {offsets = [0, 0], sizes = [8, 128], strides = [1, 1]} : vector<72x128xbf16> to vector<8x128xbf16>
    %c0_7 = arith.constant 0 : index
    %c0_8 = arith.constant 0 : index
    %c0_9 = arith.constant 0 : index
    %11 = vector.load %arg3[%c0_7, %c0_8, %c0_9] : memref<9x128x256xbf16, #tpu.memory_space<vmem>>, vector<1x128x256xbf16>
    %12 = vector.shape_cast %11 : vector<1x128x256xbf16> to vector<128x256xbf16>
    %cst_10 = arith.constant dense<0.000000e+00> : vector<8x256xf32>
    %13 = tpu.matmul %10, %12, %cst_10 {dimension_numbers = #tpu.dot_dimension_numbers<[1], [0], [0], [1], [0, 0, 1, 1], [], []>} : vector<8x128xbf16>, vector<128x256xbf16>, vector<8x256xf32> -> vector<8x256xf32>
    %14 = arith.addf %9, %13 : vector<8x256xf32>
    %15 = vector.extract_strided_slice %8 {offsets = [8, 0], sizes = [8, 128], strides = [1, 1]} : vector<72x128xbf16> to vector<8x128xbf16>
    %c1 = arith.constant 1 : index
    %c0_11 = arith.constant 0 : index
    %c0_12 = arith.constant 0 : index
    %16 = vector.load %arg3[%c1, %c0_11, %c0_12] : memref<9x128x256xbf16, #tpu.memory_space<vmem>>, vector<1x128x256xbf16>
    %17 = vector.shape_cast %16 : vector<1x128x256xbf16> to vector<128x256xbf16>
    %cst_13 = arith.constant dense<0.000000e+00> : vector<8x256xf32>
    %18 = tpu.matmul %15, %17, %cst_13 {dimension_numbers = #tpu.dot_dimension_numbers<[1], [0], [0], [1], [0, 0, 1, 1], [], []>} : vector<8x128xbf16>, vector<128x256xbf16>, vector<8x256xf32> -> vector<8x256xf32>
    %19 = arith.addf %14, %18 : vector<8x256xf32>
    %20 = vector.extract_strided_slice %8 {offsets = [16, 0], sizes = [8, 128], strides = [1, 1]} : vector<72x128xbf16> to vector<8x128xbf16>
    %c2 = arith.constant 2 : index
    %c0_14 = arith.constant 0 : index
    %c0_15 = arith.constant 0 : index
    %21 = vector.load %arg3[%c2, %c0_14, %c0_15] : memref<9x128x256xbf16, #tpu.memory_space<vmem>>, vector<1x128x256xbf16>
    %22 = vector.shape_cast %21 : vector<1x128x256xbf16> to vector<128x256xbf16>
    %cst_16 = arith.constant dense<0.000000e+00> : vector<8x256xf32>
    %23 = tpu.matmul %20, %22, %cst_16 {dimension_numbers = #tpu.dot_dimension_numbers<[1], [0], [0], [1], [0, 0, 1, 1], [], []>} : vector<8x128xbf16>, vector<128x256xbf16>, vector<8x256xf32> -> vector<8x256xf32>
    %24 = arith.addf %19, %23 : vector<8x256xf32>
    %25 = vector.extract_strided_slice %8 {offsets = [24, 0], sizes = [8, 128], strides = [1, 1]} : vector<72x128xbf16> to vector<8x128xbf16>
    %c3 = arith.constant 3 : index
    %c0_17 = arith.constant 0 : index
    %c0_18 = arith.constant 0 : index
    %26 = vector.load %arg3[%c3, %c0_17, %c0_18] : memref<9x128x256xbf16, #tpu.memory_space<vmem>>, vector<1x128x256xbf16>
    %27 = vector.shape_cast %26 : vector<1x128x256xbf16> to vector<128x256xbf16>
    %cst_19 = arith.constant dense<0.000000e+00> : vector<8x256xf32>
    %28 = tpu.matmul %25, %27, %cst_19 {dimension_numbers = #tpu.dot_dimension_numbers<[1], [0], [0], [1], [0, 0, 1, 1], [], []>} : vector<8x128xbf16>, vector<128x256xbf16>, vector<8x256xf32> -> vector<8x256xf32>
    %29 = arith.addf %24, %28 : vector<8x256xf32>
    %30 = vector.extract_strided_slice %8 {offsets = [32, 0], sizes = [8, 128], strides = [1, 1]} : vector<72x128xbf16> to vector<8x128xbf16>
    %c4 = arith.constant 4 : index
    %c0_20 = arith.constant 0 : index
    %c0_21 = arith.constant 0 : index
    %31 = vector.load %arg3[%c4, %c0_20, %c0_21] : memref<9x128x256xbf16, #tpu.memory_space<vmem>>, vector<1x128x256xbf16>
    %32 = vector.shape_cast %31 : vector<1x128x256xbf16> to vector<128x256xbf16>
    %cst_22 = arith.constant dense<0.000000e+00> : vector<8x256xf32>
    %33 = tpu.matmul %30, %32, %cst_22 {dimension_numbers = #tpu.dot_dimension_numbers<[1], [0], [0], [1], [0, 0, 1, 1], [], []>} : vector<8x128xbf16>, vector<128x256xbf16>, vector<8x256xf32> -> vector<8x256xf32>
    %34 = arith.addf %29, %33 : vector<8x256xf32>
    %35 = vector.extract_strided_slice %8 {offsets = [40, 0], sizes = [8, 128], strides = [1, 1]} : vector<72x128xbf16> to vector<8x128xbf16>
    %c5 = arith.constant 5 : index
    %c0_23 = arith.constant 0 : index
    %c0_24 = arith.constant 0 : index
    %36 = vector.load %arg3[%c5, %c0_23, %c0_24] : memref<9x128x256xbf16, #tpu.memory_space<vmem>>, vector<1x128x256xbf16>
    %37 = vector.shape_cast %36 : vector<1x128x256xbf16> to vector<128x256xbf16>
    %cst_25 = arith.constant dense<0.000000e+00> : vector<8x256xf32>
    %38 = tpu.matmul %35, %37, %cst_25 {dimension_numbers = #tpu.dot_dimension_numbers<[1], [0], [0], [1], [0, 0, 1, 1], [], []>} : vector<8x128xbf16>, vector<128x256xbf16>, vector<8x256xf32> -> vector<8x256xf32>
    %39 = arith.addf %34, %38 : vector<8x256xf32>
    %40 = vector.extract_strided_slice %8 {offsets = [48, 0], sizes = [8, 128], strides = [1, 1]} : vector<72x128xbf16> to vector<8x128xbf16>
    %c6 = arith.constant 6 : index
    %c0_26 = arith.constant 0 : index
    %c0_27 = arith.constant 0 : index
    %41 = vector.load %arg3[%c6, %c0_26, %c0_27] : memref<9x128x256xbf16, #tpu.memory_space<vmem>>, vector<1x128x256xbf16>
    %42 = vector.shape_cast %41 : vector<1x128x256xbf16> to vector<128x256xbf16>
    %cst_28 = arith.constant dense<0.000000e+00> : vector<8x256xf32>
    %43 = tpu.matmul %40, %42, %cst_28 {dimension_numbers = #tpu.dot_dimension_numbers<[1], [0], [0], [1], [0, 0, 1, 1], [], []>} : vector<8x128xbf16>, vector<128x256xbf16>, vector<8x256xf32> -> vector<8x256xf32>
    %44 = arith.addf %39, %43 : vector<8x256xf32>
    %45 = vector.extract_strided_slice %8 {offsets = [56, 0], sizes = [8, 128], strides = [1, 1]} : vector<72x128xbf16> to vector<8x128xbf16>
    %c7 = arith.constant 7 : index
    %c0_29 = arith.constant 0 : index
    %c0_30 = arith.constant 0 : index
    %46 = vector.load %arg3[%c7, %c0_29, %c0_30] : memref<9x128x256xbf16, #tpu.memory_space<vmem>>, vector<1x128x256xbf16>
    %47 = vector.shape_cast %46 : vector<1x128x256xbf16> to vector<128x256xbf16>
    %cst_31 = arith.constant dense<0.000000e+00> : vector<8x256xf32>
    %48 = tpu.matmul %45, %47, %cst_31 {dimension_numbers = #tpu.dot_dimension_numbers<[1], [0], [0], [1], [0, 0, 1, 1], [], []>} : vector<8x128xbf16>, vector<128x256xbf16>, vector<8x256xf32> -> vector<8x256xf32>
    %49 = arith.addf %44, %48 : vector<8x256xf32>
    %50 = vector.extract_strided_slice %8 {offsets = [64, 0], sizes = [8, 128], strides = [1, 1]} : vector<72x128xbf16> to vector<8x128xbf16>
    %c8 = arith.constant 8 : index
    %c0_32 = arith.constant 0 : index
    %c0_33 = arith.constant 0 : index
    %51 = vector.load %arg3[%c8, %c0_32, %c0_33] : memref<9x128x256xbf16, #tpu.memory_space<vmem>>, vector<1x128x256xbf16>
    %52 = vector.shape_cast %51 : vector<1x128x256xbf16> to vector<128x256xbf16>
    %cst_34 = arith.constant dense<0.000000e+00> : vector<8x256xf32>
    %53 = tpu.matmul %50, %52, %cst_34 {dimension_numbers = #tpu.dot_dimension_numbers<[1], [0], [0], [1], [0, 0, 1, 1], [], []>} : vector<8x128xbf16>, vector<128x256xbf16>, vector<8x256xf32> -> vector<8x256xf32>
    %54 = arith.addf %49, %53 : vector<8x256xf32>
    %c0_35 = arith.constant 0 : index
    %c0_36 = arith.constant 0 : index
    %55 = vector.load %arg4[%c0_35, %c0_36] : memref<1x256xf32, #tpu.memory_space<vmem>>, vector<1x256xf32>
    %56 = vector.broadcast %55 : vector<1x256xf32> to vector<8x256xf32>
    %57 = arith.addf %54, %56 : vector<8x256xf32>
    %cst_37 = arith.constant 0.000000e+00 : f32
    %58 = vector.broadcast %cst_37 : f32 to vector<8x256xf32>
    %59 = arith.maximumf %57, %58 : vector<8x256xf32>
    %c0_38 = arith.constant 0 : index
    %c0_39 = arith.constant 0 : index
    %60 = vector.load %arg5[%c0_38, %c0_39] : memref<256x32xf32, #tpu.memory_space<vmem>>, vector<256x32xf32>
    %cst_40 = arith.constant dense<0.000000e+00> : vector<8x32xf32>
    %61 = tpu.matmul %59, %60, %cst_40 {dimension_numbers = #tpu.dot_dimension_numbers<[1], [0], [0], [1], [0, 0, 1, 1], [], []>} : vector<8x256xf32>, vector<256x32xf32>, vector<8x32xf32> -> vector<8x32xf32>
    %c0_41 = arith.constant 0 : index
    %c0_42 = arith.constant 0 : index
    %62 = vector.load %arg6[%c0_41, %c0_42] : memref<1x32xf32, #tpu.memory_space<vmem>>, vector<1x32xf32>
    %63 = vector.broadcast %62 : vector<1x32xf32> to vector<8x32xf32>
    %64 = arith.addf %61, %63 : vector<8x32xf32>
    %cst_43 = arith.constant 0.000000e+00 : f32
    %65 = vector.broadcast %cst_43 : f32 to vector<8x32xf32>
    %66 = arith.maximumf %64, %65 : vector<8x32xf32>
    %c0_44 = arith.constant 0 : index
    %c0_45 = arith.constant 0 : index
    %67 = vector.load %arg7[%c0_44, %c0_45] : memref<32x3xf32, #tpu.memory_space<vmem>>, vector<32x3xf32>
    %cst_46 = arith.constant dense<0.000000e+00> : vector<8x3xf32>
    %68 = tpu.matmul %66, %67, %cst_46 {dimension_numbers = #tpu.dot_dimension_numbers<[1], [0], [0], [1], [0, 0, 1, 1], [], []>} : vector<8x32xf32>, vector<32x3xf32>, vector<8x3xf32> -> vector<8x3xf32>
    %c0_47 = arith.constant 0 : index
    %c0_48 = arith.constant 0 : index
    %69 = vector.load %arg8[%c0_47, %c0_48] : memref<1x3xf32, #tpu.memory_space<vmem>>, vector<1x3xf32>
    %70 = vector.broadcast %69 : vector<1x3xf32> to vector<8x3xf32>
    %71 = arith.addf %68, %70 : vector<8x3xf32>
    %c0_49 = arith.constant 0 : index
    %c0_50 = arith.constant 0 : index
    %72 = vector.load %arg9[%c0_49, %c0_50] : memref<32x3xf32, #tpu.memory_space<vmem>>, vector<32x3xf32>
    %cst_51 = arith.constant dense<0.000000e+00> : vector<8x3xf32>
    %73 = tpu.matmul %66, %72, %cst_51 {dimension_numbers = #tpu.dot_dimension_numbers<[1], [0], [0], [1], [0, 0, 1, 1], [], []>} : vector<8x32xf32>, vector<32x3xf32>, vector<8x3xf32> -> vector<8x3xf32>
    %c0_52 = arith.constant 0 : index
    %c0_53 = arith.constant 0 : index
    %74 = vector.load %arg10[%c0_52, %c0_53] : memref<1x3xf32, #tpu.memory_space<vmem>>, vector<1x3xf32>
    %75 = vector.broadcast %74 : vector<1x3xf32> to vector<8x3xf32>
    %76 = arith.addf %73, %75 : vector<8x3xf32>
    %cst_54 = arith.constant -2.000000e+01 : f32
    %cst_55 = arith.constant 2.000000e+00 : f32
    %77 = vector.broadcast %cst_54 : f32 to vector<8x3xf32>
    %78 = arith.maximumf %77, %76 : vector<8x3xf32>
    %79 = vector.broadcast %cst_55 : f32 to vector<8x3xf32>
    %80 = arith.minimumf %79, %78 : vector<8x3xf32>
    %81 = math.exp %80 : vector<8x3xf32>
    %c0_56 = arith.constant 0 : index
    %c0_57 = arith.constant 0 : index
    %82 = vector.load %arg11[%c0_56, %c0_57] : memref<8x3xf32, #tpu.memory_space<vmem>>, vector<8x3xf32>
    %83 = arith.mulf %81, %82 : vector<8x3xf32>
    %84 = arith.addf %71, %83 : vector<8x3xf32>
    %cst_58 = arith.constant -5.000000e-01 : f32
    %85 = vector.broadcast %cst_58 : f32 to vector<8x3xf32>
    %86 = arith.mulf %85, %82 : vector<8x3xf32>
    %87 = arith.mulf %86, %82 : vector<8x3xf32>
    %88 = arith.subf %87, %80 : vector<8x3xf32>
    %cst_59 = arith.constant 0.918938517 : f32
    %89 = vector.broadcast %cst_59 : f32 to vector<8x3xf32>
    %90 = arith.subf %88, %89 : vector<8x3xf32>
    %cst_60 = arith.constant dense<0.000000e+00> : vector<8xf32>
    %91 = vector.multi_reduction <add>, %90, %cst_60 [1] : vector<8x3xf32> to vector<8xf32>
    %92 = vector.shape_cast %91 : vector<8xf32> to vector<8x1xf32>
    %cst_61 = arith.constant -2.000000e+00 : f32
    %93 = vector.broadcast %cst_61 : f32 to vector<8x3xf32>
    %94 = arith.mulf %93, %84 : vector<8x3xf32>
    %cst_62 = arith.constant 0.000000e+00 : f32
    %95 = vector.broadcast %cst_62 : f32 to vector<8x3xf32>
    %96 = arith.maximumf %94, %95 : vector<8x3xf32>
    %97 = math.absf %94 : vector<8x3xf32>
    %cst_63 = arith.constant 0.000000e+00 : f32
    %98 = vector.broadcast %cst_63 : f32 to vector<8x3xf32>
    %99 = arith.subf %98, %97 : vector<8x3xf32>
    %100 = math.exp %99 : vector<8x3xf32>
    %101 = math.log1p %100 : vector<8x3xf32>
    %102 = arith.addf %96, %101 : vector<8x3xf32>
    %cst_64 = arith.constant 0.693147182 : f32
    %103 = vector.broadcast %cst_64 : f32 to vector<8x3xf32>
    %104 = arith.subf %103, %84 : vector<8x3xf32>
    %105 = arith.subf %104, %102 : vector<8x3xf32>
    %cst_65 = arith.constant 2.000000e+00 : f32
    %106 = vector.broadcast %cst_65 : f32 to vector<8x3xf32>
    %107 = arith.mulf %106, %105 : vector<8x3xf32>
    %cst_66 = arith.constant dense<0.000000e+00> : vector<8xf32>
    %108 = vector.multi_reduction <add>, %107, %cst_66 [1] : vector<8x3xf32> to vector<8xf32>
    %109 = vector.shape_cast %108 : vector<8xf32> to vector<8x1xf32>
    %110 = arith.subf %92, %109 : vector<8x1xf32>
    %c0_67 = arith.constant 0 : index
    %c0_68 = arith.constant 0 : index
    %111 = vector.load %arg12[%c0_67, %c0_68] : memref<1x3xf32, #tpu.memory_space<vmem>>, vector<1x3xf32>
    %112 = math.tanh %84 : vector<8x3xf32>
    %113 = vector.broadcast %111 : vector<1x3xf32> to vector<8x3xf32>
    %114 = arith.mulf %113, %112 : vector<8x3xf32>
    %c0_69 = arith.constant 0 : index
    %c0_70 = arith.constant 0 : index
    %115 = vector.load %arg13[%c0_69, %c0_70] : memref<1x3xf32, #tpu.memory_space<vmem>>, vector<1x3xf32>
    %116 = vector.broadcast %115 : vector<1x3xf32> to vector<8x3xf32>
    %117 = arith.mulf %114, %116 : vector<8x3xf32>
    %c0_71 = arith.constant 0 : index
    %c0_72 = arith.constant 0 : index
    %118 = vector.load %arg14[%c0_71, %c0_72] : memref<1x3xf32, #tpu.memory_space<vmem>>, vector<1x3xf32>
    %119 = vector.broadcast %118 : vector<1x3xf32> to vector<8x3xf32>
    %120 = arith.addf %117, %119 : vector<8x3xf32>
    %c0_73 = arith.constant 0 : index
    %c0_74 = arith.constant 0 : index
    %121 = vector.load %arg15[%c0_73, %c0_74] : memref<8x3xf32, #tpu.memory_space<vmem>>, vector<8x3xf32>
    tpu.vector_store %arg15[%c0_73, %c0_74], %120 {strides = array<i32>} : memref<8x3xf32, #tpu.memory_space<vmem>>, vector<8x3xf32>,
    %c0_75 = arith.constant 0 : index
    %c0_76 = arith.constant 0 : index
    %122 = vector.load %arg16[%c0_75, %c0_76] : memref<8x1xf32, #tpu.memory_space<vmem>>, vector<8x1xf32>
    tpu.vector_store %arg16[%c0_75, %c0_76], %110 {strides = array<i32>} : memref<8x1xf32, #tpu.memory_space<vmem>>, vector<8x1xf32>,
    return
  }
}

</mosaic_0001>

<bundles_post_ra>
// kernel: actor_forward.5
= control target key start
LH: loop header
LB: loop body
LE: loop exit
PB: predicated region body
PF: predicated region fallthrough
CT: control target
= control target key end

     0   :  { %vm870_vm0 = vcmask 523264   ;;  %vm1399_vm1 = vcmask 535552   ;;  %s3171_s1 = inlined_call_operand.vmem [shape: bf16[64,4418], index: 1, kind: input, shape index: {}]   ;;  %s3172_s0 = inlined_call_operand.vmem [shape: bf16[8,64], index: 0, kind: input, shape index: {}]   ;;  %s3173_s2 = inlined_call_operand.vmem [shape: f32[8,1], index: 2, kind: input, shape index: {}]   ;;  %s3174_s3 = inlined_call_operand.vmem [shape: bf16[8,4418], index: 3, kind: output, shape index: {}]  }
   0x1   :  { %v1827_v0 = vld [vmem:[%s3171_s1 + $0x348] sm:$0xf]  ;;  %v2122_v1 = vld [vmem:[%s3171_s1 + $0x3d0] sm:$0xf0]  ;;  %v2105_v2 = vld [vmem:[%s3171_s1 + $0x34c] sm:$0xf] }
   0x2   :  { %v1828_v3 = vor.u32 %v2122_v1, %v1827_v0  ;;  %v1829_v4 = vld [vmem:[%s3171_s1 + $0x3d4] sm:$0xf0]  ;;  %v1835_v5 = vld [vmem:[%s3171_s1 + $0x350] sm:$0xf]  ;;  %v2123_v6 = vld [vmem:[%s3171_s1 + $0x3d8] sm:$0xf0] }
   0x3   :  { %v1832_v7 = vor.u32 %v2105_v2, %v1829_v4  ;;  %v1836_v8 = vor.u32 %v2123_v6, %v1835_v5  ;;  %v2106_v9 = vld [vmem:[%s3171_s1 + $0x354] sm:$0xf]  ;;  %v1837_v10 = vld [vmem:[%s3171_s1 + $0x3dc] sm:$0xf0]  ;;  %v1687_v11 = vld [vmem:[%s3171_s1 + $0x230] sm:$0xf] }
   0x4   :  { %878 = vmatpush.bf16.msra.mxu0 %v1828_v3  ;;  %v1840_v12 = vor.u32 %v2106_v9, %v1837_v10  ;;  %v2087_v13 = vld [vmem:[%s3171_s1 + $0x2b8] sm:$0xf0]  ;;  %v2070_v14 = vld [vmem:[%s3171_s1 + $0x234] sm:$0xf]  ;;  %v1689_v15 = vld [vmem:[%s3171_s1 + $0x2bc] sm:$0xf0] }
   0x5   :  { %891 = vmatpush.bf16.msra.mxu1 %v1832_v7  ;;  %904 = vmatpush.bf16.msra.mxu2 %v1836_v8  ;;  %v1688_v16 = vor.u32 %v2087_v13, %v1687_v11  ;;  %v1692_v17 = vor.u32 %v2070_v14, %v1689_v15  ;;  %v1695_v18 = vld [vmem:[%s3171_s1 + $0x238] sm:$0xf]  ;;  %v2088_v19 = vld [vmem:[%s3171_s1 + $0x2c0] sm:$0xf0]  ;;  %v2071_v20 = vld [vmem:[%s3171_s1 + $0x23c] sm:$0xf] }
   0x6   :  { %917 = vmatpush.bf16.msra.mxu3 %v1840_v12  ;;  %v1696_v21 = vor.u32 %v2088_v19, %v1695_v18  ;;  %v1697_v22 = vld [vmem:[%s3171_s1 + $0x2c4] sm:$0xf0]  ;;  %v1547_v23 = vld [vmem:[%s3171_s1 + $0x118] sm:$0xf]  ;;  %v2052_v24 = vld [vmem:[%s3171_s1 + $0x1a0] sm:$0xf0] }
   0x7   :  { %v1700_v25 = vor.u32 %v2071_v20, %v1697_v22  ;;  %v2035_v26 = vld [vmem:[%s3171_s1 + $0x11c] sm:$0xf]  ;;  %v1549_v27 = vld [vmem:[%s3171_s1 + $0x1a4] sm:$0xf0]  ;;  %v1555_v28 = vld [vmem:[%s3171_s1 + $0x120] sm:$0xf]  ;;  %v1548_v29 = vor.u32 %v2052_v24, %v1547_v23 }
   0x8   :  { %879 = vmatpush.bf16.msra.mxu0 %v1688_v16  ;;  %v2053_v30 = vld [vmem:[%s3171_s1 + $0x1a8] sm:$0xf0]  ;;  %v2036_v31 = vld [vmem:[%s3171_s1 + $0x124] sm:$0xf]  ;;  %v1557_v32 = vld [vmem:[%s3171_s1 + $0x1ac] sm:$0xf0]  ;;  %v1552_v33 = vor.u32 %v2035_v26, %v1549_v27 }
   0x9   :  { %892 = vmatpush.bf16.msra.mxu1 %v1692_v17  ;;  %905 = vmatpush.bf16.msra.mxu2 %v1696_v21  ;;  %v1556_v34 = vor.u32 %v2053_v30, %v1555_v28  ;;  %v1407_v35 = vld [vmem:[%s3171_s1] sm:$0xf]  ;;  %v2017_v36 = vld [vmem:[%s3171_s1 + $0x88] sm:$0xf0]  ;;  %v2000_v37 = vld [vmem:[%s3171_s1 + $0x4] sm:$0xf]  ;;  %v1560_v38 = vor.u32 %v2036_v31, %v1557_v32 }
   0xa   :  { %918 = vmatpush.bf16.msra.mxu3 %v1700_v25  ;;  %v1409_v39 = vld [vmem:[%s3171_s1 + $0x8c] sm:$0xf0]  ;;  %v1415_v40 = vld [vmem:[%s3171_s1 + $0x8] sm:$0xf]  ;;  %v2018_v41 = vld [vmem:[%s3171_s1 + $0x90] sm:$0xf0]  ;;  %v1408_v44 = vor.u32 %v2017_v36, %v1407_v35 }
   0xb   :  { %v2001_v42 = vld [vmem:[%s3171_s1 + $0xc] sm:$0xf]  ;;  %v1417_v43 = vld [vmem:[%s3171_s1 + $0x94] sm:$0xf0]  ;;  %v1851_v45 = vld [vmem:[%s3171_s1 + $0x360] sm:$0xf]  ;;  %v1412_v47 = vor.u32 %v2000_v37, %v1409_v39  ;;  %v1416_v48 = vor.u32 %v2018_v41, %v1415_v40 }
   0xc   :  { %880 = vmatpush.bf16.msra.mxu0 %v1548_v29  ;;  %v2125_v46 = vld [vmem:[%s3171_s1 + $0x3e8] sm:$0xf0]  ;;  %v2107_v49 = vld [vmem:[%s3171_s1 + $0x35c] sm:$0xf]  ;;  %v1845_v50 = vld [vmem:[%s3171_s1 + $0x3e4] sm:$0xf0]  ;;  %v1420_v51 = vor.u32 %v2001_v42, %v1417_v43 }
   0xd   :  { %893 = vmatpush.bf16.msra.mxu1 %v1552_v33  ;;  %906 = vmatpush.bf16.msra.mxu2 %v1556_v34  ;;  %v1852_v52 = vor.u32 %v2125_v46, %v1851_v45  ;;  %v1843_v53 = vld [vmem:[%s3171_s1 + $0x358] sm:$0xf]  ;;  %v2124_v54 = vld [vmem:[%s3171_s1 + $0x3e0] sm:$0xf0]  ;;  %v1848_v56 = vor.u32 %v2107_v49, %v1845_v50  ;;  %v1853_v57 = vld [vmem:[%s3171_s1 + $0x3ec] sm:$0xf0] }
   0xe   :  { %919 = vmatpush.bf16.msra.mxu3 %v1560_v38  ;;  %v2108_v55 = vld [vmem:[%s3171_s1 + $0x364] sm:$0xf]  ;;  %v1711_v58 = vld [vmem:[%s3171_s1 + $0x248] sm:$0xf]  ;;  %v2090_v59 = vld [vmem:[%s3171_s1 + $0x2d0] sm:$0xf0]  ;;  %v1844_v63 = vor.u32 %v2124_v54, %v1843_v53 }
   0xf   :  { %v2293_v60 = vld [vmem:[%s3172_s0] sm:$0xf]  ;;  %v2072_v61 = vld [vmem:[%s3171_s1 + $0x244] sm:$0xf]  ;;  %v1705_v62 = vld [vmem:[%s3171_s1 + $0x2cc] sm:$0xf0]  ;;  %v1856_v0 = vor.u32 %v2108_v55, %v1853_v57  ;;  %v1712_v1 = vor.u32 %v2090_v59, %v1711_v58 }
  0x10   :  { %881 = vmatpush.bf16.msra.mxu0 %v1408_v44  ;;  %v1703_v2 = vld [vmem:[%s3171_s1 + $0x240] sm:$0xf]  ;;  %v2089_v3 = vld [vmem:[%s3171_s1 + $0x2c8] sm:$0xf0]  ;;  %v1708_v5 = vor.u32 %v2072_v61, %v1705_v62  ;;  %v1713_v6 = vld [vmem:[%s3171_s1 + $0x2d4] sm:$0xf0] }
  0x11   :  { %894 = vmatpush.bf16.msra.mxu1 %v1412_v47  ;;  %907 = vmatpush.bf16.msra.mxu2 %v1416_v48  ;;  %v2073_v4 = vld [vmem:[%s3171_s1 + $0x24c] sm:$0xf]  ;;  %v1571_v7 = vld [vmem:[%s3171_s1 + $0x130] sm:$0xf]  ;;  %v2055_v8 = vld [vmem:[%s3171_s1 + $0x1b8] sm:$0xf0]  ;;  %v1704_v11 = vor.u32 %v2089_v3, %v1703_v2 }
  0x12   :  { %920 = vmatpush.bf16.msra.mxu3 %v1420_v51  ;;  %v2037_v9 = vld [vmem:[%s3171_s1 + $0x12c] sm:$0xf]  ;;  %v1565_v10 = vld [vmem:[%s3171_s1 + $0x1b4] sm:$0xf0]  ;;  %v1563_v12 = vld [vmem:[%s3171_s1 + $0x128] sm:$0xf]  ;;  %v1716_v14 = vor.u32 %v2073_v4, %v1713_v6  ;;  %v1572_v15 = vor.u32 %v2055_v8, %v1571_v7 }
  0x13   :  { %1965 = vmatmul.msk.bf16.vlgmr.msra.gmra.mxu0 %vm870_vm0, %v2293_v60  ;;  %v2054_v13 = vld [vmem:[%s3171_s1 + $0x1b0] sm:$0xf0]  ;;  %v1573_v17 = vld [vmem:[%s3171_s1 + $0x1bc] sm:$0xf0]  ;;  %v1568_v19 = vor.u32 %v2037_v9, %v1565_v10  ;;  %v1431_v20 = vld [vmem:[%s3171_s1 + $0x18] sm:$0xf] }
  0x14   :  { %1966 = vmatmul.msk.bf16.vlgmr.msra.gmra.mxu1 %vm870_vm0, %v2293_v60  ;;  %1967 = vmatmul.msk.bf16.vlgmr.msra.gmra.mxu2 %vm870_vm0, %v2293_v60  ;;  %v2038_v16 = vld [vmem:[%s3171_s1 + $0x134] sm:$0xf]  ;;  %v160_v18 = vld [vmem:[%s3173_s2] sm:$0xff]  ;;  %v2143_v23 = vmov 0   ;;  %v1867_v25 = vld [vmem:[%s3171_s1 + $0x370] sm:$0xf]  ;;  %v1564_v27 = vor.u32 %v2054_v13, %v1563_v12 }
  0x15   :  { %956 = vmatpush.bf16.msrb.mxu2 %v1852_v52  ;;  %943 = vmatpush.bf16.msrb.mxu1 %v1848_v56  ;;  %v2020_v21 = vld [vmem:[%s3171_s1 + $0xa0] sm:$0xf0]  ;;  %v2002_v22 = vld [vmem:[%s3171_s1 + $0x14] sm:$0xf]  ;;  %v1425_v24 = vld [vmem:[%s3171_s1 + $0x9c] sm:$0xf0]  ;;  %v1576_v31 = vor.u32 %v2038_v16, %v1573_v17 }
  0x16   :  { %1968 = vmatmul.msk.bf16.vlgmr.msra.gmra.mxu3 %vm870_vm0, %v2293_v60  ;;  %930 = vmatpush.bf16.msrb.mxu0 %v1844_v63  ;;  %v2127_v26 = vld [vmem:[%s3171_s1 + $0x3f8] sm:$0xf0]  ;;  %v1423_v28 = vld [vmem:[%s3171_s1 + $0x10] sm:$0xf]  ;;  %v2109_v29 = vld [vmem:[%s3171_s1 + $0x36c] sm:$0xf]  ;;  %v1432_v32 = vor.u32 %v2020_v21, %v1431_v20  ;;  %v1428_v36 = vor.u32 %v2002_v22, %v1425_v24 }
  0x17   :  { %969 = vmatpush.bf16.msrb.mxu3 %v1856_v0  ;;  %2141 = vset.pattern.permute.xlu0 %v2143_v23  ;;  %v1861_v30 = vld [vmem:[%s3171_s1 + $0x3f4] sm:$0xf0]  ;;  %v2019_v33 = vld [vmem:[%s3171_s1 + $0x98] sm:$0xf0]  ;;  %v1433_v35 = vld [vmem:[%s3171_s1 + $0xa4] sm:$0xf0]  ;;  %v1868_v37 = vor.u32 %v2127_v26, %v1867_v25 }
  0x18   :  { %163 = vperm.xlu0 %2141, %v160_v18   ;;  %v2003_v34 = vld [vmem:[%s3171_s1 + $0x1c] sm:$0xf]  ;;  %v1859_v38 = vld [vmem:[%s3171_s1 + $0x368] sm:$0xf]  ;;  %v2126_v39 = vld [vmem:[%s3171_s1 + $0x3f0] sm:$0xf0]  ;;  %v1864_v41 = vor.u32 %v2109_v29, %v1861_v30  ;;  %v1424_v45 = vor.u32 %v2019_v33, %v1423_v28 }
  0x19   :  { %957 = vmatpush.bf16.msrb.mxu2 %v1712_v1  ;;  %944 = vmatpush.bf16.msrb.mxu1 %v1708_v5  ;;  %v2110_v40 = vld [vmem:[%s3171_s1 + $0x374] sm:$0xf]  ;;  %v1869_v42 = vld [vmem:[%s3171_s1 + $0x3fc] sm:$0xf0]  ;;  %v1727_v43 = vld [vmem:[%s3171_s1 + $0x258] sm:$0xf]  ;;  %v1436_v46 = vor.u32 %v2003_v34, %v1433_v35  ;;  %v1860_v47 = vor.u32 %v2126_v39, %v1859_v38 }
  0x1a   :  { %931 = vmatpush.bf16.msrb.mxu0 %v1704_v11  ;;  %v2092_v44 = vld [vmem:[%s3171_s1 + $0x2e0] sm:$0xf0]  ;;  %v1719_v48 = vld [vmem:[%s3171_s1 + $0x250] sm:$0xf]  ;;  %v2091_v49 = vld [vmem:[%s3171_s1 + $0x2d8] sm:$0xf0]  ;;  %v1872_v50 = vor.u32 %v2110_v40, %v1869_v42 }
  0x1b   :  { %970 = vmatpush.bf16.msrb.mxu3 %v1716_v14  ;;  %v1728_v51 = vor.u32 %v2092_v44, %v1727_v43  ;;  %v2074_v52 = vld [vmem:[%s3171_s1 + $0x254] sm:$0xf]  ;;  %v1721_v53 = vld [vmem:[%s3171_s1 + $0x2dc] sm:$0xf0]  ;;  %v2075_v54 = vld [vmem:[%s3171_s1 + $0x25c] sm:$0xf]  ;;  %v1720_v58 = vor.u32 %v2091_v49, %v1719_v48 }
  0x1c   :  { %v1729_v55 = vld [vmem:[%s3171_s1 + $0x2e4] sm:$0xf0]  ;;  %v1587_v56 = vld [vmem:[%s3171_s1 + $0x140] sm:$0xf]  ;;  %v2057_v57 = vld [vmem:[%s3171_s1 + $0x1c8] sm:$0xf0]  ;;  %v1724_v59 = vor.u32 %v2074_v52, %v1721_v53 }
  0x1d   :  { %958 = vmatpush.bf16.msrb.mxu2 %v1572_v15  ;;  %945 = vmatpush.bf16.msrb.mxu1 %v1568_v19  ;;  %v1579_v61 = vld [vmem:[%s3171_s1 + $0x138] sm:$0xf]  ;;  %v2056_v62 = vld [vmem:[%s3171_s1 + $0x1c0] sm:$0xf0]  ;;  %v1732_v63 = vor.u32 %v2075_v54, %v1729_v55  ;;  %v1588_v0 = vor.u32 %v2057_v57, %v1587_v56  ;;  %v2039_v1 = vld [vmem:[%s3171_s1 + $0x13c] sm:$0xf] }
  0x1e   :  { %932 = vmatpush.bf16.msrb.mxu0 %v1564_v27  ;;  %v1581_v2 = vld [vmem:[%s3171_s1 + $0x1c4] sm:$0xf0]  ;;  %v2040_v3 = vld [vmem:[%s3171_s1 + $0x144] sm:$0xf]  ;;  %v1589_v4 = vld [vmem:[%s3171_s1 + $0x1cc] sm:$0xf0]  ;;  %v1580_v9 = vor.u32 %v2056_v62, %v1579_v61 }
  0x1f   :  { %971 = vmatpush.bf16.msrb.mxu3 %v1576_v31  ;;  %v1447_v5 = vld [vmem:[%s3171_s1 + $0x28] sm:$0xf]  ;;  %v2022_v6 = vld [vmem:[%s3171_s1 + $0xb0] sm:$0xf0]  ;;  %v1883_v7 = vld [vmem:[%s3171_s1 + $0x380] sm:$0xf]  ;;  %v1584_v10 = vor.u32 %v2039_v1, %v1581_v2  ;;  %v1592_v14 = vor.u32 %v2040_v3, %v1589_v4 }
  0x20   :  { %v2129_v8 = vld [vmem:[%s3171_s1 + $0x408] sm:$0xf0]  ;;  %v1439_v11 = vld [vmem:[%s3171_s1 + $0x20] sm:$0xf]  ;;  %v2004_v13 = vld [vmem:[%s3171_s1 + $0x24] sm:$0xf]  ;;  %v1448_v15 = vor.u32 %v2022_v6, %v1447_v5 }
  0x21   :  { %959 = vmatpush.bf16.msrb.mxu2 %v1432_v32  ;;  %946 = vmatpush.bf16.msrb.mxu1 %v1428_v36  ;;  %v2021_v12 = vld [vmem:[%s3171_s1 + $0xa8] sm:$0xf0]  ;;  %v1441_v16 = vld [vmem:[%s3171_s1 + $0xac] sm:$0xf0]  ;;  %v1449_v18 = vld [vmem:[%s3171_s1 + $0xb4] sm:$0xf0]  ;;  %v1884_v19 = vor.u32 %v2129_v8, %v1883_v7 }
  0x22   :  { %933 = vmatpush.bf16.msrb.mxu0 %v1424_v45  ;;  %v2005_v17 = vld [vmem:[%s3171_s1 + $0x2c] sm:$0xf]  ;;  %v1875_v20 = vld [vmem:[%s3171_s1 + $0x378] sm:$0xf]  ;;  %v2128_v21 = vld [vmem:[%s3171_s1 + $0x400] sm:$0xf0]  ;;  %v1440_v26 = vor.u32 %v2021_v12, %v1439_v11  ;;  %v1444_v27 = vor.u32 %v2004_v13, %v1441_v16 }
  0x23   :  { %972 = vmatpush.bf16.msrb.mxu3 %v1436_v46  ;;  %v2111_v22 = vld [vmem:[%s3171_s1 + $0x37c] sm:$0xf]  ;;  %v1877_v23 = vld [vmem:[%s3171_s1 + $0x404] sm:$0xf0]  ;;  %v2112_v24 = vld [vmem:[%s3171_s1 + $0x384] sm:$0xf]  ;;  %v1452_v30 = vor.u32 %v2005_v17, %v1449_v18  ;;  %v1876_v31 = vor.u32 %v2128_v21, %v1875_v20 }
  0x24   :  { %1970 = vmatmul.msk.bf16.vlgmr.msrb.gmra.mxu1 %vm870_vm0, %v2293_v60  ;;  %1971 = vmatmul.msk.bf16.vlgmr.msrb.gmra.mxu2 %vm870_vm0, %v2293_v60  ;;  %v1885_v25 = vld [vmem:[%s3171_s1 + $0x40c] sm:$0xf0]  ;;  %v1743_v28 = vld [vmem:[%s3171_s1 + $0x268] sm:$0xf]  ;;  %v2094_v29 = vld [vmem:[%s3171_s1 + $0x2f0] sm:$0xf0]  ;;  %v1880_v32 = vor.u32 %v2111_v22, %v1877_v23 }
  0x25   :  { %1008 = vmatpush.bf16.msra.mxu2 %v1868_v37  ;;  %995 = vmatpush.bf16.msra.mxu1 %v1864_v41  ;;  %v1888_v33 = vor.u32 %v2112_v24, %v1885_v25  ;;  %v1735_v34 = vld [vmem:[%s3171_s1 + $0x260] sm:$0xf]  ;;  %v2093_v35 = vld [vmem:[%s3171_s1 + $0x2e8] sm:$0xf0]  ;;  %v1744_v36 = vor.u32 %v2094_v29, %v1743_v28  ;;  %v2076_v37 = vld [vmem:[%s3171_s1 + $0x264] sm:$0xf] }
  0x26   :  { %982 = vmatpush.bf16.msra.mxu0 %v1860_v47  ;;  %1972 = vmatmul.msk.bf16.vlgmr.msrb.gmra.mxu3 %vm870_vm0, %v2293_v60  ;;  %v1737_v38 = vld [vmem:[%s3171_s1 + $0x2ec] sm:$0xf0]  ;;  %v1736_v39 = vor.u32 %v2093_v35, %v1735_v34  ;;  %v2077_v40 = vld [vmem:[%s3171_s1 + $0x26c] sm:$0xf]  ;;  %v1745_v41 = vld [vmem:[%s3171_s1 + $0x2f4] sm:$0xf0] }
  0x27   :  { %1021 = vmatpush.bf16.msra.mxu3 %v1872_v50  ;;  %1969 = vmatmul.msk.bf16.vlgmr.msrb.gmra.mxu0 %vm870_vm0, %v2293_v60  ;;  %v1603_v42 = vld [vmem:[%s3171_s1 + $0x150] sm:$0xf]  ;;  %v2059_v43 = vld [vmem:[%s3171_s1 + $0x1d8] sm:$0xf0]  ;;  %v1595_v44 = vld [vmem:[%s3171_s1 + $0x148] sm:$0xf]  ;;  %v1740_v46 = vor.u32 %v2076_v37, %v1737_v38  ;;  %v1748_v47 = vor.u32 %v2077_v40, %v1745_v41 }
  0x28   :  { %v2058_v45 = vld [vmem:[%s3171_s1 + $0x1d0] sm:$0xf0]  ;;  %v2041_v48 = vld [vmem:[%s3171_s1 + $0x14c] sm:$0xf]  ;;  %v1597_v49 = vld [vmem:[%s3171_s1 + $0x1d4] sm:$0xf0] }
  0x29   :  { %1009 = vmatpush.bf16.msra.mxu2 %v1728_v51  ;;  %996 = vmatpush.bf16.msra.mxu1 %v1724_v59  ;;  %v2042_v50 = vld [vmem:[%s3171_s1 + $0x154] sm:$0xf]  ;;  %v1604_v51 = vor.u32 %v2059_v43, %v1603_v42  ;;  %v1596_v52 = vor.u32 %v2058_v45, %v1595_v44  ;;  %v1605_v53 = vld [vmem:[%s3171_s1 + $0x1dc] sm:$0xf0]  ;;  %v1463_v54 = vld [vmem:[%s3171_s1 + $0x38] sm:$0xf] }
  0x2a   :  { %983 = vmatpush.bf16.msra.mxu0 %v1720_v58  ;;  %v2024_v55 = vld [vmem:[%s3171_s1 + $0xc0] sm:$0xf0]  ;;  %v1455_v56 = vld [vmem:[%s3171_s1 + $0x30] sm:$0xf]  ;;  %v2023_v57 = vld [vmem:[%s3171_s1 + $0xb8] sm:$0xf0] }
  0x2b   :  { %1022 = vmatpush.bf16.msra.mxu3 %v1732_v63  ;;  %v1899_v58 = vld [vmem:[%s3171_s1 + $0x390] sm:$0xf]  ;;  %v2131_v59 = vld [vmem:[%s3171_s1 + $0x418] sm:$0xf0]  ;;  %v1891_v61 = vld [vmem:[%s3171_s1 + $0x388] sm:$0xf]  ;;  %v1600_v63 = vor.u32 %v2041_v48, %v1597_v49  ;;  %v1464_v4 = vor.u32 %v2024_v55, %v1463_v54  ;;  %v1456_v5 = vor.u32 %v2023_v57, %v1455_v56 }
  0x2c   :  { %v2130_v62 = vld [vmem:[%s3171_s1 + $0x410] sm:$0xf0]  ;;  %v1457_v2 = vld [vmem:[%s3171_s1 + $0xbc] sm:$0xf0]  ;;  %v2007_v3 = vld [vmem:[%s3171_s1 + $0x3c] sm:$0xf] }
  0x2d   :  { %1010 = vmatpush.bf16.msra.mxu2 %v1588_v0  ;;  %997 = vmatpush.bf16.msra.mxu1 %v1584_v10  ;;  %v1608_v0 = vor.u32 %v2042_v50, %v1605_v53  ;;  %v2006_v1 = vld [vmem:[%s3171_s1 + $0x34] sm:$0xf]  ;;  %v1465_v6 = vld [vmem:[%s3171_s1 + $0xc4] sm:$0xf0]  ;;  %v2113_v7 = vld [vmem:[%s3171_s1 + $0x38c] sm:$0xf]  ;;  %v1892_v10 = vor.u32 %v2130_v62, %v1891_v61 }
  0x2e   :  { %984 = vmatpush.bf16.msra.mxu0 %v1580_v9  ;;  %v1893_v8 = vld [vmem:[%s3171_s1 + $0x414] sm:$0xf0]  ;;  %v1900_v9 = vor.u32 %v2131_v59, %v1899_v58  ;;  %v2114_v11 = vld [vmem:[%s3171_s1 + $0x394] sm:$0xf]  ;;  %v1901_v12 = vld [vmem:[%s3171_s1 + $0x41c] sm:$0xf0]  ;;  %v1460_v17 = vor.u32 %v2006_v1, %v1457_v2  ;;  %v1468_v18 = vor.u32 %v2007_v3, %v1465_v6 }
  0x2f   :  { %1023 = vmatpush.bf16.msra.mxu3 %v1592_v14  ;;  %v1759_v13 = vld [vmem:[%s3171_s1 + $0x278] sm:$0xf]  ;;  %v2096_v14 = vld [vmem:[%s3171_s1 + $0x300] sm:$0xf0]  ;;  %v2095_v16 = vld [vmem:[%s3171_s1 + $0x2f8] sm:$0xf0]  ;;  %v1904_v20 = vor.u32 %v2114_v11, %v1901_v12 }
  0x30   :  { %v2078_v21 = vld [vmem:[%s3171_s1 + $0x274] sm:$0xf]  ;;  %v1760_v22 = vor.u32 %v2096_v14, %v1759_v13  ;;  %v1753_v24 = vld [vmem:[%s3171_s1 + $0x2fc] sm:$0xf0]  ;;  %v2079_v25 = vld [vmem:[%s3171_s1 + $0x27c] sm:$0xf] }
  0x31   :  { %1011 = vmatpush.bf16.msra.mxu2 %v1448_v15  ;;  %998 = vmatpush.bf16.msra.mxu1 %v1444_v27  ;;  %v1751_v15 = vld [vmem:[%s3171_s1 + $0x270] sm:$0xf]  ;;  %v1619_v27 = vld [vmem:[%s3171_s1 + $0x160] sm:$0xf]  ;;  %v2061_v28 = vld [vmem:[%s3171_s1 + $0x1e8] sm:$0xf0]  ;;  %v1756_v29 = vor.u32 %v2078_v21, %v1753_v24 }
  0x32   :  { %985 = vmatpush.bf16.msra.mxu0 %v1440_v26  ;;  %v1752_v23 = vor.u32 %v2095_v16, %v1751_v15  ;;  %v1761_v26 = vld [vmem:[%s3171_s1 + $0x304] sm:$0xf0]  ;;  %v2044_v35 = vld [vmem:[%s3171_s1 + $0x164] sm:$0xf]  ;;  %v1620_v38 = vor.u32 %v2061_v28, %v1619_v27  ;;  %v2026_v40 = vld [vmem:[%s3171_s1 + $0xd0] sm:$0xf0] }
  0x33   :  { %1024 = vmatpush.bf16.msra.mxu3 %v1452_v30  ;;  %v1764_v30 = vor.u32 %v2079_v25, %v1761_v26  ;;  %v1613_v34 = vld [vmem:[%s3171_s1 + $0x1e4] sm:$0xf0]  ;;  %v1471_v41 = vld [vmem:[%s3171_s1 + $0x40] sm:$0xf]  ;;  %v2025_v42 = vld [vmem:[%s3171_s1 + $0xc8] sm:$0xf0] }
  0x34   :  { %1974 = vmatmul.msk.bf16.vlgmr.msra.gmra.mxu1 %vm870_vm0, %v2293_v60  ;;  %1975 = vmatmul.msk.bf16.vlgmr.msra.gmra.mxu2 %vm870_vm0, %v2293_v60  ;;  %v1479_v37 = vld [vmem:[%s3171_s1 + $0x48] sm:$0xf]  ;;  %v2008_v45 = vld [vmem:[%s3171_s1 + $0x44] sm:$0xf]  ;;  %v1481_v48 = vld [vmem:[%s3171_s1 + $0xd4] sm:$0xf0]  ;;  %v1472_v55 = vor.u32 %v2025_v42, %v1471_v41 }
  0x35   :  { %1060 = vmatpush.bf16.msrb.mxu2 %v1884_v19  ;;  %1047 = vmatpush.bf16.msrb.mxu1 %v1880_v32  ;;  %v1896_v19 = vor.u32 %v2113_v7, %v1893_v8  ;;  %v2060_v32 = vld [vmem:[%s3171_s1 + $0x1e0] sm:$0xf0]  ;;  %v1915_v49 = vld [vmem:[%s3171_s1 + $0x3a0] sm:$0xf]  ;;  %v2133_v50 = vld [vmem:[%s3171_s1 + $0x428] sm:$0xf0]  ;;  %v1480_v54 = vor.u32 %v2026_v40, %v1479_v37 }
  0x36   :  { %1034 = vmatpush.bf16.msrb.mxu0 %v1876_v31  ;;  %1976 = vmatmul.msk.bf16.vlgmr.msra.gmra.mxu3 %vm870_vm0, %v2293_v60  ;;  %v1611_v31 = vld [vmem:[%s3171_s1 + $0x158] sm:$0xf]  ;;  %v2115_v53 = vld [vmem:[%s3171_s1 + $0x39c] sm:$0xf]  ;;  %v1909_v56 = vld [vmem:[%s3171_s1 + $0x424] sm:$0xf0]  ;;  %v1916_v62 = vor.u32 %v2133_v50, %v1915_v49 }
  0x37   :  { %1073 = vmatpush.bf16.msrb.mxu3 %v1888_v33  ;;  %1973 = vmatmul.msk.bf16.vlgmr.msra.gmra.mxu0 %vm870_vm0, %v2293_v60  ;;  %v2043_v33 = vld [vmem:[%s3171_s1 + $0x15c] sm:$0xf]  ;;  %v2116_v57 = vld [vmem:[%s3171_s1 + $0x3a4] sm:$0xf]  ;;  %v1917_v58 = vld [vmem:[%s3171_s1 + $0x42c] sm:$0xf0]  ;;  %v1912_v2 = vor.u32 %v2115_v53, %v1909_v56 }
  0x38   :  { %v1616_v43 = vor.u32 %v2043_v33, %v1613_v34  ;;  %v2098_v1 = vld [vmem:[%s3171_s1 + $0x310] sm:$0xf0]  ;;  %v1920_v3 = vor.u32 %v2116_v57, %v1917_v58  ;;  %v2080_v6 = vld [vmem:[%s3171_s1 + $0x284] sm:$0xf]  ;;  %v1769_v7 = vld [vmem:[%s3171_s1 + $0x30c] sm:$0xf0] }
  0x39   :  { %1061 = vmatpush.bf16.msrb.mxu2 %v1744_v36  ;;  %1048 = vmatpush.bf16.msrb.mxu1 %v1740_v46  ;;  %v1621_v36 = vld [vmem:[%s3171_s1 + $0x1ec] sm:$0xf0]  ;;  %v2081_v8 = vld [vmem:[%s3171_s1 + $0x28c] sm:$0xf]  ;;  %v1772_v12 = vor.u32 %v2080_v6, %v1769_v7  ;;  %v2063_v15 = vld [vmem:[%s3171_s1 + $0x1f8] sm:$0xf0] }
  0x3a   :  { %1035 = vmatpush.bf16.msrb.mxu0 %v1736_v39  ;;  %v1612_v39 = vor.u32 %v2060_v32, %v1611_v31  ;;  %v1624_v44 = vor.u32 %v2044_v35, %v1621_v36  ;;  %v1473_v46 = vld [vmem:[%s3171_s1 + $0xcc] sm:$0xf0]  ;;  %v1627_v16 = vld [vmem:[%s3171_s1 + $0x168] sm:$0xf]  ;;  %v1637_v21 = vld [vmem:[%s3171_s1 + $0x1fc] sm:$0xf0] }
  0x3b   :  { %1074 = vmatpush.bf16.msrb.mxu3 %v1748_v47  ;;  %v2009_v47 = vld [vmem:[%s3171_s1 + $0x4c] sm:$0xf]  ;;  %v1476_v59 = vor.u32 %v2008_v45, %v1473_v46  ;;  %v1635_v14 = vld [vmem:[%s3171_s1 + $0x170] sm:$0xf]  ;;  %v2028_v25 = vld [vmem:[%s3171_s1 + $0xe0] sm:$0xf0] }
  0x3c   :  { %v1484_v61 = vor.u32 %v2009_v47, %v1481_v48  ;;  %v1487_v26 = vld [vmem:[%s3171_s1 + $0x50] sm:$0xf]  ;;  %v2027_v27 = vld [vmem:[%s3171_s1 + $0xd8] sm:$0xf0]  ;;  %v1489_v31 = vld [vmem:[%s3171_s1 + $0xdc] sm:$0xf0] }
  0x3d   :  { %1062 = vmatpush.bf16.msrb.mxu2 %v1604_v51  ;;  %1049 = vmatpush.bf16.msrb.mxu1 %v1600_v63  ;;  %v1907_v51 = vld [vmem:[%s3171_s1 + $0x398] sm:$0xf]  ;;  %v2011_v32 = vld [vmem:[%s3171_s1 + $0x5c] sm:$0xf]  ;;  %v1497_v33 = vld [vmem:[%s3171_s1 + $0xe4] sm:$0xf0]  ;;  %v1488_v40 = vor.u32 %v2027_v27, %v1487_v26 }
  0x3e   :  { %1036 = vmatpush.bf16.msrb.mxu0 %v1596_v52  ;;  %v2132_v52 = vld [vmem:[%s3171_s1 + $0x420] sm:$0xf0]  ;;  %v1931_v34 = vld [vmem:[%s3171_s1 + $0x3b0] sm:$0xf]  ;;  %v2135_v35 = vld [vmem:[%s3171_s1 + $0x438] sm:$0xf0]  ;;  %v1500_v45 = vor.u32 %v2011_v32, %v1497_v33 }
  0x3f   :  { %1075 = vmatpush.bf16.msrb.mxu3 %v1608_v0  ;;  %v1908_v63 = vor.u32 %v2132_v52, %v1907_v51  ;;  %v1775_v0 = vld [vmem:[%s3171_s1 + $0x288] sm:$0xf]  ;;  %v2134_v37 = vld [vmem:[%s3171_s1 + $0x430] sm:$0xf0]  ;;  %v1925_v41 = vld [vmem:[%s3171_s1 + $0x434] sm:$0xf0]  ;;  %v1932_v46 = vor.u32 %v2135_v35, %v1931_v34 }
  0x40   :  { %v1923_v36 = vld [vmem:[%s3171_s1 + $0x3a8] sm:$0xf]  ;;  %v2118_v42 = vld [vmem:[%s3171_s1 + $0x3b4] sm:$0xf]  ;;  %v1791_v48 = vld [vmem:[%s3171_s1 + $0x298] sm:$0xf] }
  0x41   :  { %1063 = vmatpush.bf16.msrb.mxu2 %v1464_v4  ;;  %1050 = vmatpush.bf16.msrb.mxu1 %v1460_v17  ;;  %v1767_v4 = vld [vmem:[%s3171_s1 + $0x280] sm:$0xf]  ;;  %v2062_v17 = vld [vmem:[%s3171_s1 + $0x1f0] sm:$0xf0]  ;;  %v1924_v47 = vor.u32 %v2134_v37, %v1923_v36  ;;  %v2100_v49 = vld [vmem:[%s3171_s1 + $0x320] sm:$0xf0] }
  0x42   :  { %1037 = vmatpush.bf16.msrb.mxu0 %v1456_v5  ;;  %v2097_v5 = vld [vmem:[%s3171_s1 + $0x308] sm:$0xf0]  ;;  %v1628_v24 = vor.u32 %v2062_v17, %v1627_v16  ;;  %v1783_v52 = vld [vmem:[%s3171_s1 + $0x290] sm:$0xf]  ;;  %v2099_v53 = vld [vmem:[%s3171_s1 + $0x318] sm:$0xf0]  ;;  %v1792_v58 = vor.u32 %v2100_v49, %v1791_v48 }
  0x43   :  { %1076 = vmatpush.bf16.msrb.mxu3 %v1468_v18  ;;  %v1768_v11 = vor.u32 %v2097_v5, %v1767_v4  ;;  %v2045_v18 = vld [vmem:[%s3171_s1 + $0x16c] sm:$0xf]  ;;  %v2083_v56 = vld [vmem:[%s3171_s1 + $0x29c] sm:$0xf]  ;;  %v1793_v57 = vld [vmem:[%s3171_s1 + $0x324] sm:$0xf0] }
  0x44   :  { %1978 = vmatmul.msk.bf16.vlgmr.msrb.gmra.mxu1 %vm870_vm0, %v2293_v60  ;;  %1979 = vmatmul.msk.bf16.vlgmr.msrb.gmra.mxu2 %vm870_vm0, %v2293_v60  ;;  %v1645_v4 = vld [vmem:[%s3171_s1 + $0x204] sm:$0xf0]  ;;  %v2048_v5 = vld [vmem:[%s3171_s1 + $0x184] sm:$0xf]  ;;  %v1653_v6 = vld [vmem:[%s3171_s1 + $0x20c] sm:$0xf0] }
  0x45   :  { %1112 = vmatpush.bf16.msra.mxu2 %v1900_v9  ;;  %1099 = vmatpush.bf16.msra.mxu1 %v1896_v19  ;;  %v1777_v9 = vld [vmem:[%s3171_s1 + $0x314] sm:$0xf0]  ;;  %v1511_v7 = vld [vmem:[%s3171_s1 + $0x68] sm:$0xf]  ;;  %v1505_v16 = vld [vmem:[%s3171_s1 + $0xec] sm:$0xf0] }
  0x46   :  { %1086 = vmatpush.bf16.msra.mxu0 %v1892_v10  ;;  %1980 = vmatmul.msk.bf16.vlgmr.msrb.gmra.mxu3 %vm870_vm0, %v2293_v60  ;;  %v1776_v10 = vor.u32 %v2098_v1, %v1775_v0  ;;  %v1780_v13 = vor.u32 %v2081_v8, %v1777_v9  ;;  %v1629_v19 = vld [vmem:[%s3171_s1 + $0x1f4] sm:$0xf0]  ;;  %v2065_v0 = vld [vmem:[%s3171_s1 + $0x208] sm:$0xf0]  ;;  %v1941_v26 = vld [vmem:[%s3171_s1 + $0x444] sm:$0xf0] }
  0x47   :  { %1125 = vmatpush.bf16.msra.mxu3 %v1904_v20  ;;  %1977 = vmatmul.msk.bf16.vlgmr.msrb.gmra.mxu0 %vm870_vm0, %v2293_v60  ;;  %v2046_v20 = vld [vmem:[%s3171_s1 + $0x174] sm:$0xf]  ;;  %v1632_v28 = vor.u32 %v2045_v18, %v1629_v19  ;;  %v1643_v1 = vld [vmem:[%s3171_s1 + $0x178] sm:$0xf]  ;;  %v2013_v17 = vld [vmem:[%s3171_s1 + $0x6c] sm:$0xf] }
  0x48   :  { %v1513_v18 = vld [vmem:[%s3171_s1 + $0xf4] sm:$0xf0]  ;;  %v1947_v19 = vld [vmem:[%s3171_s1 + $0x3c0] sm:$0xf]  ;;  %v2120_v27 = vld [vmem:[%s3171_s1 + $0x3c4] sm:$0xf] }
  0x49   :  { %1113 = vmatpush.bf16.msra.mxu2 %v1760_v22  ;;  %1100 = vmatpush.bf16.msra.mxu1 %v1756_v29  ;;  %v1495_v22 = vld [vmem:[%s3171_s1 + $0x58] sm:$0xf]  ;;  %v1640_v29 = vor.u32 %v2046_v20, %v1637_v21  ;;  %v2137_v20 = vld [vmem:[%s3171_s1 + $0x448] sm:$0xf0]  ;;  %v1807_v33 = vld [vmem:[%s3171_s1 + $0x2a8] sm:$0xf] }
  0x4a   :  { %1087 = vmatpush.bf16.msra.mxu0 %v1752_v23  ;;  %v1636_v23 = vor.u32 %v2063_v15, %v1635_v14  ;;  %v1656_v14 = vor.u32 %v2048_v5, %v1653_v6  ;;  %v2012_v15 = vld [vmem:[%s3171_s1 + $0x64] sm:$0xf]  ;;  %v1939_v21 = vld [vmem:[%s3171_s1 + $0x3b8] sm:$0xf]  ;;  %v2102_v34 = vld [vmem:[%s3171_s1 + $0x330] sm:$0xf0] }
  0x4b   :  { %1126 = vmatpush.bf16.msra.mxu3 %v1764_v30  ;;  %v2010_v30 = vld [vmem:[%s3171_s1 + $0x54] sm:$0xf]  ;;  %v1799_v37 = vld [vmem:[%s3171_s1 + $0x2a0] sm:$0xf]  ;;  %v2067_v48 = vld [vmem:[%s3171_s1 + $0x218] sm:$0xf0] }
  0x4c   :  { %v1659_v49 = vld [vmem:[%s3171_s1 + $0x188] sm:$0xf]  ;;  %v2139_v5 = vld [vmem:[%s3171_s1 + $0x458] sm:$0xf0] }
  0x4d   :  { %1114 = vmatpush.bf16.msra.mxu2 %v1620_v38  ;;  %1101 = vmatpush.bf16.msra.mxu1 %v1616_v43  ;;  %v2117_v38 = vld [vmem:[%s3171_s1 + $0x3ac] sm:$0xf]  ;;  %v1933_v43 = vld [vmem:[%s3171_s1 + $0x43c] sm:$0xf0]  ;;  %v1955_v6 = vld [vmem:[%s3171_s1 + $0x3c8] sm:$0xf] }
  0x4e   :  { %1088 = vmatpush.bf16.msra.mxu0 %v1612_v39  ;;  %v1496_v39 = vor.u32 %v2028_v25, %v1495_v22  ;;  %v1928_v50 = vor.u32 %v2117_v38, %v1925_v41  ;;  %v1936_v51 = vor.u32 %v2118_v42, %v1933_v43  ;;  %v2136_v22 = vld [vmem:[%s3171_s1 + $0x440] sm:$0xf0]  ;;  %v2101_v38 = vld [vmem:[%s3171_s1 + $0x328] sm:$0xf0]  ;;  %v1809_v42 = vld [vmem:[%s3171_s1 + $0x334] sm:$0xf0]  ;;  %v1808_v43 = vor.u32 %v2102_v34, %v1807_v33 }
  0x4f   :  { %1127 = vmatpush.bf16.msra.mxu3 %v1624_v44  ;;  %v1492_v44 = vor.u32 %v2010_v30, %v1489_v31  ;;  %v1516_v30 = vor.u32 %v2013_v17, %v1513_v18  ;;  %v1948_v31 = vor.u32 %v2137_v20, %v1947_v19  ;;  %v1940_v32 = vor.u32 %v2136_v22, %v1939_v21  ;;  %v2085_v41 = vld [vmem:[%s3171_s1 + $0x2ac] sm:$0xf]  ;;  %v2104_v18 = vld [vmem:[%s3171_s1 + $0x340] sm:$0xf0]  ;;  %v1815_v19 = vld [vmem:[%s3171_s1 + $0x2b0] sm:$0xf] }
  0x50   :  { %v2103_v20 = vld [vmem:[%s3171_s1 + $0x338] sm:$0xf0]  ;;  %v2086_v21 = vld [vmem:[%s3171_s1 + $0x2b4] sm:$0xf]  ;;  %v1817_v22 = vld [vmem:[%s3171_s1 + $0x33c] sm:$0xf0] }
  0x51   :  { %1115 = vmatpush.bf16.msra.mxu2 %v1480_v54  ;;  %1102 = vmatpush.bf16.msra.mxu1 %v1476_v59  ;;  %v2082_v54 = vld [vmem:[%s3171_s1 + $0x294] sm:$0xf]  ;;  %v1784_v59 = vor.u32 %v2099_v53, %v1783_v52  ;;  %v1661_v52 = vld [vmem:[%s3171_s1 + $0x214] sm:$0xf0]  ;;  %v1543_v34 = vld [vmem:[%s3171_s1 + $0x88] sm:$0xf] }
  0x52   :  { %1089 = vmatpush.bf16.msra.mxu0 %v1472_v55  ;;  %v1785_v55 = vld [vmem:[%s3171_s1 + $0x31c] sm:$0xf0]  ;;  %v2050_v53 = vld [vmem:[%s3171_s1 + $0x194] sm:$0xf] }
  0x53   :  { %1128 = vmatpush.bf16.msra.mxu3 %v1484_v61  ;;  %v1788_v61 = vor.u32 %v2082_v54, %v1785_v55  ;;  %v1669_v54 = vld [vmem:[%s3171_s1 + $0x21c] sm:$0xf0] }
  0x54   :  { %1982 = vmatmul.msk.bf16.vlgmr.msra.gmra.mxu1 %vm870_vm0, %v2293_v60  ;;  %1983 = vmatmul.msk.bf16.vlgmr.msra.gmra.mxu2 %vm870_vm0, %v2293_v60 }
  0x55   :  { %1164 = vmatpush.bf16.msrb.mxu2 %v1916_v62  ;;  %1151 = vmatpush.bf16.msrb.mxu1 %v1912_v2  ;;  %v1796_v62 = vor.u32 %v2083_v56, %v1793_v57  ;;  %v2064_v2 = vld [vmem:[%s3171_s1 + $0x200] sm:$0xf0]  ;;  %v1527_v57 = vld [vmem:[%s3171_s1 + $0x78] sm:$0xf] }
  0x56   :  { %1138 = vmatpush.bf16.msrb.mxu0 %v1908_v63  ;;  %1984 = vmatmul.msk.bf16.vlgmr.msra.gmra.mxu3 %vm870_vm0, %v2293_v60  ;;  %v1651_v63 = vld [vmem:[%s3171_s1 + $0x180] sm:$0xf]  ;;  %v1644_v9 = vor.u32 %v2064_v2, %v1643_v1  ;;  %v2015_v2 = vld [vmem:[%s3171_s1 + $0x7c] sm:$0xf] }
  0x57   :  { %1177 = vmatpush.bf16.msrb.mxu3 %v1920_v3  ;;  %1981 = vmatmul.msk.bf16.vlgmr.msra.gmra.mxu0 %vm870_vm0, %v2293_v60  ;;  %v2047_v3 = vld [vmem:[%s3171_s1 + $0x17c] sm:$0xf]  ;;  %v1652_v8 = vor.u32 %v2065_v0, %v1651_v63  ;;  %v2014_v0 = vld [vmem:[%s3171_s1 + $0x74] sm:$0xf]  ;;  %v1521_v1 = vld [vmem:[%s3171_s1 + $0xfc] sm:$0xf0] }
  0x58   :  { %v2031_v63 = vld [vmem:[%s3171_s1 + $0xf8] sm:$0xf0] }
  0x59   :  { %1165 = vmatpush.bf16.msrb.mxu2 %v1776_v10  ;;  %1152 = vmatpush.bf16.msrb.mxu1 %v1772_v12  ;;  %v2030_v10 = vld [vmem:[%s3171_s1 + $0xf0] sm:$0xf0]  ;;  %v2029_v12 = vld [vmem:[%s3171_s1 + $0xe8] sm:$0xf0] }
  0x5a   :  { %1139 = vmatpush.bf16.msrb.mxu0 %v1768_v11  ;;  %v1503_v11 = vld [vmem:[%s3171_s1 + $0x60] sm:$0xf] }
  0x5b   :  { %1178 = vmatpush.bf16.msrb.mxu3 %v1780_v13  ;;  %v1648_v13 = vor.u32 %v2047_v3, %v1645_v4  ;;  %v1504_v25 = vor.u32 %v2029_v12, %v1503_v11  ;;  %v1529_v3 = vld [vmem:[%s3171_s1 + $0x104] sm:$0xf0]  ;;  %v1963_v4 = vld [vmem:[%s3171_s1 + $0x3d0] sm:$0xf]  ;;  %v1957_v11 = vld [vmem:[%s3171_s1 + $0x454] sm:$0xf0]  ;;  %v1524_v12 = vor.u32 %v2014_v0, %v1521_v1 }
  0x5d   :  { %1166 = vmatpush.bf16.msrb.mxu2 %v1636_v23  ;;  %1153 = vmatpush.bf16.msrb.mxu1 %v1632_v28  ;;  %v2119_v23 = vld [vmem:[%s3171_s1 + $0x3bc] sm:$0xf]  ;;  %v1949_v28 = vld [vmem:[%s3171_s1 + $0x44c] sm:$0xf0] }
  0x5e   :  { %1140 = vmatpush.bf16.msrb.mxu0 %v1628_v24  ;;  %v1512_v24 = vor.u32 %v2030_v10, %v1511_v7  ;;  %v1944_v35 = vor.u32 %v2119_v23, %v1941_v26  ;;  %v1952_v36 = vor.u32 %v2120_v27, %v1949_v28  ;;  %v2138_v7 = vld [vmem:[%s3171_s1 + $0x450] sm:$0xf0]  ;;  %v2121_v10 = vld [vmem:[%s3171_s1 + $0x3cc] sm:$0xf]  ;;  %v1683_v26 = vld [vmem:[%s3171_s1 + $0x1a0] sm:$0xf] }
  0x5f   :  { %1179 = vmatpush.bf16.msrb.mxu3 %v1640_v29  ;;  %v1508_v29 = vor.u32 %v2012_v15, %v1505_v16  ;;  %v1956_v15 = vor.u32 %v2138_v7, %v1955_v6  ;;  %v1823_v16 = vld [vmem:[%s3171_s1 + $0x2b8] sm:$0xf]  ;;  %v1960_v17 = vor.u32 %v2121_v10, %v1957_v11  ;;  %v2069_v27 = vld [vmem:[%s3171_s1 + $0x228] sm:$0xf0] }
  0x60   :  { %v1824_v23 = vor.u32 %v2104_v18, %v1823_v16  ;;  %v1675_v28 = vld [vmem:[%s3171_s1 + $0x198] sm:$0xf] }
  0x61   :  { %1167 = vmatpush.bf16.msrb.mxu2 %v1496_v39  ;;  %1154 = vmatpush.bf16.msrb.mxu1 %v1492_v44  ;;  %v2084_v39 = vld [vmem:[%s3171_s1 + $0x2a4] sm:$0xf]  ;;  %v1800_v44 = vor.u32 %v2101_v38, %v1799_v37  ;;  %v1535_v37 = vld [vmem:[%s3171_s1 + $0x80] sm:$0xf]  ;;  %v2033_v38 = vld [vmem:[%s3171_s1 + $0x108] sm:$0xf0] }
  0x62   :  { %1141 = vmatpush.bf16.msrb.mxu0 %v1488_v40  ;;  %v1801_v40 = vld [vmem:[%s3171_s1 + $0x32c] sm:$0xf0] }
  0x63   :  { %1180 = vmatpush.bf16.msrb.mxu3 %v1500_v45  ;;  %v1804_v45 = vor.u32 %v2084_v39, %v1801_v40  ;;  %v2016_v39 = vld [vmem:[%s3171_s1 + $0x84] sm:$0xf]  ;;  %v1537_v40 = vld [vmem:[%s3171_s1 + $0x10c] sm:$0xf0] }
  0x64   :  { %1986 = vmatmul.msk.bf16.vlgmr.msrb.gmra.mxu1 %vm870_vm0, %v2293_v60  ;;  %1987 = vmatmul.msk.bf16.vlgmr.msrb.gmra.mxu2 %vm870_vm0, %v2293_v60 }
  0x65   :  { %1216 = vmatpush.bf16.msra.mxu2 %v1932_v46  ;;  %1203 = vmatpush.bf16.msra.mxu1 %v1928_v50  ;;  %v1812_v46 = vor.u32 %v2085_v41, %v1809_v42  ;;  %v2066_v50 = vld [vmem:[%s3171_s1 + $0x210] sm:$0xf0]  ;;  %v2142_v41 = vld [vmem:[%s3172_s0] sm:$0xf] }
  0x66   :  { %1190 = vmatpush.bf16.msra.mxu0 %v1924_v47  ;;  %1988 = vmatmul.msk.bf16.vlgmr.msrb.gmra.mxu3 %vm870_vm0, %v2293_v60  ;;  %v1667_v47 = vld [vmem:[%s3171_s1 + $0x190] sm:$0xf]  ;;  %v1660_v56 = vor.u32 %v2066_v50, %v1659_v49 }
  0x67   :  { %1229 = vmatpush.bf16.msra.mxu3 %v1936_v51  ;;  %1985 = vmatmul.msk.bf16.vlgmr.msrb.gmra.mxu0 %vm870_vm0, %v2293_v60  ;;  %v2049_v51 = vld [vmem:[%s3171_s1 + $0x18c] sm:$0xf]  ;;  %v1668_v55 = vor.u32 %v2067_v48, %v1667_v47 }
  0x69   :  { %1217 = vmatpush.bf16.msra.mxu2 %v1792_v58  ;;  %1204 = vmatpush.bf16.msra.mxu1 %v1788_v61  ;;  %v2032_v58 = vld [vmem:[%s3171_s1 + $0x100] sm:$0xf0]  ;;  %v1664_v61 = vor.u32 %v2049_v51, %v1661_v52 }
  0x6a   :  { %1191 = vmatpush.bf16.msra.mxu0 %v1784_v59  ;;  %v1519_v59 = vld [vmem:[%s3171_s1 + $0x70] sm:$0xf] }
  0x6b   :  { %1230 = vmatpush.bf16.msra.mxu3 %v1796_v62  ;;  %v1672_v62 = vor.u32 %v2050_v53, %v1669_v54 }
  0x6d   :  { %1218 = vmatpush.bf16.msra.mxu2 %v1652_v8  ;;  %1205 = vmatpush.bf16.msra.mxu1 %v1648_v13  ;;  %v1528_v8 = vor.u32 %v2032_v58, %v1527_v57  ;;  %v1532_v13 = vor.u32 %v2015_v2, %v1529_v3 }
  0x6e   :  { %1192 = vmatpush.bf16.msra.mxu0 %v1644_v9  ;;  %v1520_v9 = vor.u32 %v2031_v63, %v1519_v59 }
  0x6f   :  { %1231 = vmatpush.bf16.msra.mxu3 %v1656_v14  ;;  %v1964_v14 = vor.u32 %v2139_v5, %v1963_v4 }
  0x71   :  { %1219 = vmatpush.bf16.msra.mxu2 %v1512_v24  ;;  %1206 = vmatpush.bf16.msra.mxu1 %v1508_v29  ;;  %v1816_v24 = vor.u32 %v2103_v20, %v1815_v19  ;;  %v2068_v29 = vld [vmem:[%s3171_s1 + $0x220] sm:$0xf0] }
  0x72   :  { %1193 = vmatpush.bf16.msra.mxu0 %v1504_v25  ;;  %v1820_v25 = vor.u32 %v2086_v21, %v1817_v22  ;;  %v1676_v33 = vor.u32 %v2068_v29, %v1675_v28 }
  0x73   :  { %1232 = vmatpush.bf16.msra.mxu3 %v1516_v30  ;;  %v2051_v30 = vld [vmem:[%s3171_s1 + $0x19c] sm:$0xf] }
  0x74   :  { %1990 = vmatmul.msk.bf16.vlgmr.msra.gmra.mxu1 %vm870_vm0, %v2293_v60  ;;  %1991 = vmatmul.msk.bf16.vlgmr.msra.gmra.mxu2 %vm870_vm0, %v2293_v60 }
  0x75   :  { %1268 = vmatpush.bf16.msrb.mxu2 %v1948_v31  ;;  %1255 = vmatpush.bf16.msrb.mxu1 %v1944_v35  ;;  %v1677_v31 = vld [vmem:[%s3171_s1 + $0x224] sm:$0xf0] }
  0x76   :  { %1242 = vmatpush.bf16.msrb.mxu0 %v1940_v32  ;;  %1992 = vmatmul.msk.bf16.vlgmr.msra.gmra.mxu3 %vm870_vm0, %v2293_v60  ;;  %v1684_v32 = vor.u32 %v2069_v27, %v1683_v26  ;;  %v1680_v35 = vor.u32 %v2051_v30, %v1677_v31 }
  0x77   :  { %1281 = vmatpush.bf16.msrb.mxu3 %v1952_v36  ;;  %1989 = vmatmul.msk.bf16.vlgmr.msra.gmra.mxu0 %vm870_vm0, %v2293_v60  ;;  %v2034_v36 = vld [vmem:[%s3171_s1 + $0x110] sm:$0xf0] }
  0x78   :  { %v1544_v42 = vor.u32 %v2034_v36, %v1543_v34 }
  0x79   :  { %1269 = vmatpush.bf16.msrb.mxu2 %v1808_v43  ;;  %1256 = vmatpush.bf16.msrb.mxu1 %v1804_v45  ;;  %v1540_v43 = vor.u32 %v2016_v39, %v1537_v40 }
  0x7a   :  { %1243 = vmatpush.bf16.msrb.mxu0 %v1800_v44 }
  0x7b   :  { %1282 = vmatpush.bf16.msrb.mxu3 %v1812_v46 }
  0x7d   :  { %1270 = vmatpush.bf16.msrb.mxu2 %v1668_v55  ;;  %1257 = vmatpush.bf16.msrb.mxu1 %v1664_v61 }
  0x7e   :  { %1244 = vmatpush.bf16.msrb.mxu0 %v1660_v56 }
  0x7f   :  { %1283 = vmatpush.bf16.msrb.mxu3 %v1672_v62 }
  0x81   :  { %1271 = vmatpush.bf16.msrb.mxu2 %v1528_v8  ;;  %1258 = vmatpush.bf16.msrb.mxu1 %v1524_v12 }
  0x82   :  { %1245 = vmatpush.bf16.msrb.mxu0 %v1520_v9 }
  0x83   :  { %1284 = vmatpush.bf16.msrb.mxu3 %v1532_v13 }
  0x84   :  { %1994 = vmatmul.msk.bf16.vlgmr.msrb.gmra.mxu1 %vm870_vm0, %v2293_v60  ;;  %1995 = vmatmul.msk.bf16.vlgmr.msrb.gmra.mxu2 %vm870_vm0, %v2142_v41 }
  0x85   :  { %1320 = vmatpush.bf16.msra.mxu2 %v1964_v14  ;;  %1307 = vmatpush.bf16.msra.mxu1 %v1960_v17 }
  0x86   :  { %1294 = vmatpush.bf16.msra.mxu0 %v1956_v15  ;;  %1996 = vmatmul.msk.bf16.vlgmr.msrb.gmra.mxu3 %vm870_vm0, %v2142_v41 }
  0x87   :  { %1993 = vmatmul.msk.bf16.vlgmr.msrb.gmra.mxu0 %vm870_vm0, %v2293_v60  ;;  %v1536_v60 = vor.u32 %v2033_v38, %v1535_v37 }
  0x89   :  { %1321 = vmatpush.bf16.msra.mxu2 %v1824_v23  ;;  %1308 = vmatpush.bf16.msra.mxu1 %v1820_v25 }
  0x8a   :  { %1295 = vmatpush.bf16.msra.mxu0 %v1816_v24  ;;  %v3077_v44 = vpop.permute.xlu0 %163 }
  0x8d   :  { %1322 = vmatpush.bf16.msra.mxu2 %v1684_v32  ;;  %1309 = vmatpush.bf16.msra.mxu1 %v1680_v35 }
  0x8e   :  { %1296 = vmatpush.bf16.msra.mxu0 %v1676_v33 }
  0x90   :  { %v883_v45 = vpop.f32.mrf.mxu0 }
  0x91   :  { %1323 = vmatpush.bf16.msra.mxu2 %v1544_v42  ;;  %1310 = vmatpush.bf16.msra.mxu1 %v1540_v43  ;;  %v896_v46 = vpop.f32.mrf.mxu1  ;;  %v884_v47 = vadd.f32 %v883_v45, %v3077_v44 }
  0x92   :  { %1297 = vmatpush.bf16.msra.mxu0 %v1536_v60  ;;  %v897_v48 = vadd.f32 %v896_v46, %v3077_v44 }
  0x93   :  { %v1329_v49 = vmax.f32 %v884_v47, 0.0 }
  0x94   :  { %1998 = vmatmul.msk.bf16.vlgmr.msra.gmra.mxu1 %vm870_vm0, %v2142_v41  ;;  %v1330_v50 = vmax.f32 %v897_v48, 0.0  ;;  %1999 = vmatmul.msk.bf16.vlgmr.msra.gmra.mxu2 %vm870_vm0, %v2142_v41 }
  0x96   :  { %v1364_v51 = vpack.c.bf16 %v1330_v50, %v1329_v49 }
  0x97   :  { %1997 = vmatmul.msk.bf16.vlgmr.msra.gmra.mxu0 %vm870_vm0, %v2142_v41  ;;  %v909_v52 = vpop.f32.mrf.mxu2 }
  0x98   :  { %v910_v53 = vadd.f32 %v909_v52, %v3077_v44  ;;  %1382 = vst [vmem:[%s3174_s3] sm:$0xff] %v1364_v51  ;;  %v885_v55 = vpop.f32.mrf.mxu0 }
  0x99   :  { %v922_v54 = vpop.f32.mrf.mxu3  ;;  %v898_v57 = vpop.f32.mrf.mxu1 }
  0x9a   :  { %v923_v56 = vadd.f32 %v922_v54, %v3077_v44  ;;  %v1331_v58 = vmax.f32 %v910_v53, 0.0 }
  0x9c   :  { %v1332_v59 = vmax.f32 %v923_v56, 0.0 }
  0x9e   :  { %v1365_v61 = vpack.c.bf16 %v1332_v59, %v1331_v58 }
  0x9f   :  { %v911_v62 = vpop.f32.mrf.mxu2 }
  0xa0   :  { %1383 = vst [vmem:[%s3174_s3 + $0x8] sm:$0xff] %v1365_v61 }
  0xa1   :  { %v924_v63 = vpop.f32.mrf.mxu3  ;;  %v948_v1 = vpop.f32.mrf.mxu1 }
  0xa2   :  { %v949_v3 = vadd.f32 %v948_v1, %v3077_v44 }
  0xa4   :  { %v935_v0 = vpop.f32.mrf.mxu0  ;;  %v1334_v5 = vmax.f32 %v949_v3, 0.0 }
  0xa5   :  { %v936_v2 = vadd.f32 %v935_v0, %v3077_v44 }
  0xa7   :  { %v1333_v4 = vmax.f32 %v936_v2, 0.0  ;;  %v961_v7 = vpop.f32.mrf.mxu2 }
  0xa8   :  { %v962_v9 = vadd.f32 %v961_v7, %v3077_v44 }
  0xa9   :  { %v1366_v6 = vpack.c.bf16 %v1334_v5, %v1333_v4  ;;  %v974_v8 = vpop.f32.mrf.mxu3  ;;  %v950_v12 = vpop.f32.mrf.mxu1 }
  0xaa   :  { %v975_v10 = vadd.f32 %v974_v8, %v3077_v44  ;;  %v1335_v13 = vmax.f32 %v962_v9, 0.0 }
  0xab   :  { %1384 = vst [vmem:[%s3174_s3 + $0x10] sm:$0xff] %v1366_v6 }
  0xac   :  { %v937_v11 = vpop.f32.mrf.mxu0  ;;  %v1336_v14 = vmax.f32 %v975_v10, 0.0 }
  0xae   :  { %v1367_v15 = vpack.c.bf16 %v1336_v14, %v1335_v13 }
  0xaf   :  { %v963_v16 = vpop.f32.mrf.mxu2 }
  0xb0   :  { %1385 = vst [vmem:[%s3174_s3 + $0x18] sm:$0xff] %v1367_v15 }
  0xb1   :  { %v976_v17 = vpop.f32.mrf.mxu3  ;;  %v1000_v19 = vpop.f32.mrf.mxu1 }
  0xb2   :  { %v1001_v21 = vadd.f32 %v1000_v19, %v3077_v44 }
  0xb4   :  { %v987_v18 = vpop.f32.mrf.mxu0  ;;  %v1338_v23 = vmax.f32 %v1001_v21, 0.0 }
  0xb5   :  { %v988_v20 = vadd.f32 %v987_v18, %v3077_v44 }
  0xb7   :  { %v1337_v22 = vmax.f32 %v988_v20, 0.0  ;;  %v1013_v25 = vpop.f32.mrf.mxu2 }
  0xb8   :  { %v1014_v27 = vadd.f32 %v1013_v25, %v3077_v44 }
  0xb9   :  { %v1368_v24 = vpack.c.bf16 %v1338_v23, %v1337_v22  ;;  %v1026_v26 = vpop.f32.mrf.mxu3  ;;  %v1002_v30 = vpop.f32.mrf.mxu1 }
  0xba   :  { %v1027_v28 = vadd.f32 %v1026_v26, %v3077_v44  ;;  %v1339_v31 = vmax.f32 %v1014_v27, 0.0 }
  0xbb   :  { %1386 = vst [vmem:[%s3174_s3 + $0x20] sm:$0xff] %v1368_v24 }
  0xbc   :  { %v989_v29 = vpop.f32.mrf.mxu0  ;;  %v1340_v32 = vmax.f32 %v1027_v28, 0.0 }
  0xbe   :  { %v1369_v33 = vpack.c.bf16 %v1340_v32, %v1339_v31 }
  0xbf   :  { %v1015_v34 = vpop.f32.mrf.mxu2 }
  0xc0   :  { %1387 = vst [vmem:[%s3174_s3 + $0x28] sm:$0xff] %v1369_v33 }
  0xc1   :  { %v1028_v35 = vpop.f32.mrf.mxu3  ;;  %v1052_v37 = vpop.f32.mrf.mxu1 }
  0xc2   :  { %v1053_v39 = vadd.f32 %v1052_v37, %v3077_v44 }
  0xc4   :  { %v1039_v36 = vpop.f32.mrf.mxu0  ;;  %v1342_v41 = vmax.f32 %v1053_v39, 0.0 }
  0xc5   :  { %v1040_v38 = vadd.f32 %v1039_v36, %v3077_v44 }
  0xc7   :  { %v1341_v40 = vmax.f32 %v1040_v38, 0.0  ;;  %v1065_v60 = vpop.f32.mrf.mxu2 }
  0xc8   :  { %v1066_v45 = vadd.f32 %v1065_v60, %v3077_v44 }
  0xc9   :  { %v1370_v42 = vpack.c.bf16 %v1342_v41, %v1341_v40  ;;  %v1078_v43 = vpop.f32.mrf.mxu3  ;;  %v1054_v48 = vpop.f32.mrf.mxu1 }
  0xca   :  { %v1079_v46 = vadd.f32 %v1078_v43, %v3077_v44  ;;  %v1343_v49 = vmax.f32 %v1066_v45, 0.0 }
  0xcb   :  { %1388 = vst [vmem:[%s3174_s3 + $0x30] sm:$0xff] %v1370_v42 }
  0xcc   :  { %v1041_v47 = vpop.f32.mrf.mxu0  ;;  %v1344_v50 = vmax.f32 %v1079_v46, 0.0 }
  0xce   :  { %v1371_v51 = vpack.c.bf16 %v1344_v50, %v1343_v49 }
  0xcf   :  { %v1067_v52 = vpop.f32.mrf.mxu2 }
  0xd0   :  { %1389 = vst [vmem:[%s3174_s3 + $0x38] sm:$0xff] %v1371_v51 }
  0xd1   :  { %v1080_v53 = vpop.f32.mrf.mxu3  ;;  %v1104_v55 = vpop.f32.mrf.mxu1 }
  0xd2   :  { %v1105_v57 = vadd.f32 %v1104_v55, %v3077_v44 }
  0xd4   :  { %v1091_v54 = vpop.f32.mrf.mxu0  ;;  %v1346_v59 = vmax.f32 %v1105_v57, 0.0 }
  0xd5   :  { %v1092_v56 = vadd.f32 %v1091_v54, %v3077_v44 }
  0xd7   :  { %v1345_v58 = vmax.f32 %v1092_v56, 0.0  ;;  %v1117_v62 = vpop.f32.mrf.mxu2 }
  0xd8   :  { %v1118_v0 = vadd.f32 %v1117_v62, %v3077_v44 }
  0xd9   :  { %v1372_v61 = vpack.c.bf16 %v1346_v59, %v1345_v58  ;;  %v1130_v63 = vpop.f32.mrf.mxu3  ;;  %v1106_v3 = vpop.f32.mrf.mxu1 }
  0xda   :  { %v1131_v1 = vadd.f32 %v1130_v63, %v3077_v44  ;;  %v1347_v4 = vmax.f32 %v1118_v0, 0.0 }
  0xdb   :  { %1390 = vst [vmem:[%s3174_s3 + $0x40] sm:$0xff] %v1372_v61 }
  0xdc   :  { %v1093_v2 = vpop.f32.mrf.mxu0  ;;  %v1348_v5 = vmax.f32 %v1131_v1, 0.0 }
  0xde   :  { %v1373_v6 = vpack.c.bf16 %v1348_v5, %v1347_v4 }
  0xdf   :  { %v1119_v7 = vpop.f32.mrf.mxu2 }
  0xe0   :  { %1391 = vst [vmem:[%s3174_s3 + $0x48] sm:$0xff] %v1373_v6 }
  0xe1   :  { %v1132_v8 = vpop.f32.mrf.mxu3  ;;  %v1156_v10 = vpop.f32.mrf.mxu1 }
  0xe2   :  { %v1157_v12 = vadd.f32 %v1156_v10, %v3077_v44 }
  0xe4   :  { %v1143_v9 = vpop.f32.mrf.mxu0  ;;  %v1350_v14 = vmax.f32 %v1157_v12, 0.0 }
  0xe5   :  { %v1144_v11 = vadd.f32 %v1143_v9, %v3077_v44 }
  0xe7   :  { %v1349_v13 = vmax.f32 %v1144_v11, 0.0  ;;  %v1169_v16 = vpop.f32.mrf.mxu2 }
  0xe8   :  { %v1170_v18 = vadd.f32 %v1169_v16, %v3077_v44 }
  0xe9   :  { %v1374_v15 = vpack.c.bf16 %v1350_v14, %v1349_v13  ;;  %v1182_v17 = vpop.f32.mrf.mxu3  ;;  %v1158_v21 = vpop.f32.mrf.mxu1 }
  0xea   :  { %v1183_v19 = vadd.f32 %v1182_v17, %v3077_v44  ;;  %v1351_v22 = vmax.f32 %v1170_v18, 0.0 }
  0xeb   :  { %1392 = vst [vmem:[%s3174_s3 + $0x50] sm:$0xff] %v1374_v15 }
  0xec   :  { %v1145_v20 = vpop.f32.mrf.mxu0  ;;  %v1352_v23 = vmax.f32 %v1183_v19, 0.0 }
  0xee   :  { %v1375_v24 = vpack.c.bf16 %v1352_v23, %v1351_v22 }
  0xef   :  { %v1171_v25 = vpop.f32.mrf.mxu2 }
  0xf0   :  { %1393 = vst [vmem:[%s3174_s3 + $0x58] sm:$0xff] %v1375_v24 }
  0xf1   :  { %v1184_v26 = vpop.f32.mrf.mxu3  ;;  %v1208_v28 = vpop.f32.mrf.mxu1 }
  0xf2   :  { %v1209_v30 = vadd.f32 %v1208_v28, %v3077_v44 }
  0xf4   :  { %v1195_v27 = vpop.f32.mrf.mxu0  ;;  %v1354_v32 = vmax.f32 %v1209_v30, 0.0 }
  0xf5   :  { %v1196_v29 = vadd.f32 %v1195_v27, %v3077_v44 }
  0xf7   :  { %v1353_v31 = vmax.f32 %v1196_v29, 0.0  ;;  %v1221_v34 = vpop.f32.mrf.mxu2 }
  0xf8   :  { %v1222_v36 = vadd.f32 %v1221_v34, %v3077_v44 }
  0xf9   :  { %v1376_v33 = vpack.c.bf16 %v1354_v32, %v1353_v31  ;;  %v1234_v35 = vpop.f32.mrf.mxu3  ;;  %v1210_v39 = vpop.f32.mrf.mxu1 }
  0xfa   :  { %v1235_v37 = vadd.f32 %v1234_v35, %v3077_v44  ;;  %v1355_v40 = vmax.f32 %v1222_v36, 0.0 }
  0xfb   :  { %1394 = vst [vmem:[%s3174_s3 + $0x60] sm:$0xff] %v1376_v33 }
  0xfc   :  { %v1197_v38 = vpop.f32.mrf.mxu0  ;;  %v1356_v41 = vmax.f32 %v1235_v37, 0.0 }
  0xfe   :  { %v1377_v42 = vpack.c.bf16 %v1356_v41, %v1355_v40 }
  0xff   :  { %v1223_v60 = vpop.f32.mrf.mxu2 }
 0x100   :  { %1395 = vst [vmem:[%s3174_s3 + $0x68] sm:$0xff] %v1377_v42 }
 0x101   :  { %v1236_v43 = vpop.f32.mrf.mxu3  ;;  %v1260_v46 = vpop.f32.mrf.mxu1 }
 0x102   :  { %v1261_v48 = vadd.f32 %v1260_v46, %v3077_v44 }
 0x104   :  { %v1247_v45 = vpop.f32.mrf.mxu0  ;;  %v1358_v50 = vmax.f32 %v1261_v48, 0.0 }
 0x105   :  { %v1248_v47 = vadd.f32 %v1247_v45, %v3077_v44 }
 0x107   :  { %v1357_v49 = vmax.f32 %v1248_v47, 0.0  ;;  %v1273_v52 = vpop.f32.mrf.mxu2 }
 0x108   :  { %v1274_v54 = vadd.f32 %v1273_v52, %v3077_v44 }
 0x109   :  { %v1378_v51 = vpack.c.bf16 %v1358_v50, %v1357_v49  ;;  %v1286_v53 = vpop.f32.mrf.mxu3  ;;  %v1262_v57 = vpop.f32.mrf.mxu1 }
 0x10a   :  { %v1287_v55 = vadd.f32 %v1286_v53, %v3077_v44  ;;  %v1359_v58 = vmax.f32 %v1274_v54, 0.0 }
 0x10b   :  { %1396 = vst [vmem:[%s3174_s3 + $0x70] sm:$0xff] %v1378_v51 }
 0x10c   :  { %v1249_v56 = vpop.f32.mrf.mxu0  ;;  %v1360_v59 = vmax.f32 %v1287_v55, 0.0 }
 0x10e   :  { %v1379_v61 = vpack.c.bf16 %v1360_v59, %v1359_v58 }
 0x10f   :  { %v1275_v62 = vpop.f32.mrf.mxu2 }
 0x110   :  { %1397 = vst [vmem:[%s3174_s3 + $0x78] sm:$0xff] %v1379_v61 }
 0x111   :  { %v1288_v63 = vpop.f32.mrf.mxu3  ;;  %v1312_v1 = vpop.f32.mrf.mxu1 }
 0x112   :  { %v1313_v3 = vadd.f32 %v1312_v1, %v3077_v44 }
 0x114   :  { %v1299_v0 = vpop.f32.mrf.mxu0  ;;  %v1362_v5 = vmax.f32 %v1313_v3, 0.0 }
 0x115   :  { %v1300_v2 = vadd.f32 %v1299_v0, %v3077_v44 }
 0x117   :  { %v1361_v4 = vmax.f32 %v1300_v2, 0.0  ;;  %v1325_v7 = vpop.f32.mrf.mxu2 }
 0x118   :  { %v1326_v8 = vadd.f32 %v1325_v7, %v3077_v44 }
 0x119   :  { %v1380_v6 = vpack.c.bf16 %v1362_v5, %v1361_v4  ;;  %v1314_v10 = vpop.f32.mrf.mxu1 }
 0x11a   :  { %v1363_v11 = vmax.f32 %v1326_v8, 0.0 }
 0x11b   :  { %1398 = vst [vmem:[%s3174_s3 + $0x80] sm:$0xff] %v1380_v6 }
 0x11c   :  { %v1301_v9 = vpop.f32.mrf.mxu0  ;;  %v1381_v12 = vpack.c.bf16 %v1363_v11, %v1363_v11 }
 0x11e   :  { %1400 = vst.msk [vmem:[%s3174_s3 + $0x88] sm:$0xf] %vm1399_vm1, %v1381_v12 }
 0x11f   :  { %v1327_v13 = vpop.f32.mrf.mxu2 }

// kernel: actor_forward.6
= control target key start
LH: loop header
LB: loop body
LE: loop exit
PB: predicated region body
PF: predicated region fallthrough
CT: control target
= control target key end

     0   :  { %vm290_vm0 = vcmask 1043456   ;;  %v683_v50 = vmov 0   ;;  %vm286_vm1 = vcmask 588800   ;;  %vm476_vm2 = vcmask 273408   ;;  %s1014_s1 = inlined_call_operand.vmem [shape: bf16[72,1058], index: 1, kind: input, shape index: {}]   ;;  %s1015_s2 = inlined_call_operand.vmem [shape: f32[16,1], index: 2, kind: input, shape index: {}]   ;;  %s1016_s0 = inlined_call_operand.vmem [shape: bf16[16,72], index: 0, kind: input, shape index: {}]   ;;  %s1017_s3 = inlined_call_operand.vmem [shape: bf16[16,1058], index: 3, kind: output, shape index: {}]  }
   0x1   :  { %v57_v0 = vld [vmem:[%s1014_s1 + $0x120] sm:$0xff]  ;;  %v58_v1 = vld [vmem:[%s1014_s1 + $0x128] sm:$0xff]  ;;  %v601_v6 = vld [vmem:[%s1014_s1 + $0xd8] sm:$0xf]  ;;  %682 = vset.pattern.permute.xlu0 %v683_v50 }
   0x2   :  { %v196_v2 = vunpack.c.l.b16 %v57_v0  ;;  %v197_v3 = vunpack.c.h.b16 %v57_v0  ;;  %v198_v4 = vunpack.c.l.b16 %v58_v1  ;;  %v199_v5 = vunpack.c.h.b16 %v58_v1  ;;  %v676_v7 = vld [vmem:[%s1014_s1 + $0xf8] sm:$0xf0]  ;;  %v603_v13 = vld [vmem:[%s1014_s1 + $0xfc] sm:$0xf0]  ;;  %v677_v15 = vld [vmem:[%s1014_s1 + $0x100] sm:$0xf0] }
   0x3   :  { %v672_v12 = vld [vmem:[%s1014_s1 + $0xdc] sm:$0xf]  ;;  %v609_v14 = vld [vmem:[%s1014_s1 + $0xe0] sm:$0xf]  ;;  %v673_v16 = vld [vmem:[%s1014_s1 + $0xe4] sm:$0xf]  ;;  %v602_v22 = vor.u32 %v676_v7, %v601_v6 }
   0x4   :  { %v241_v8 = vpack.c.b16 %v196_v2, %v196_v2  ;;  %v242_v9 = vpack.c.b16 %v197_v3, %v197_v3  ;;  %v243_v10 = vpack.c.b16 %v198_v4, %v198_v4  ;;  %v244_v11 = vpack.c.b16 %v199_v5, %v199_v5  ;;  %v611_v17 = vld [vmem:[%s1014_s1 + $0x104] sm:$0xf0]  ;;  %v565_v24 = vld [vmem:[%s1014_s1 + $0x90] sm:$0xf]  ;;  %v667_v25 = vld [vmem:[%s1014_s1 + $0xb0] sm:$0xf0] }
   0x5   :  { %v606_v23 = vor.u32 %v672_v12, %v603_v13  ;;  %v610_v26 = vor.u32 %v677_v15, %v609_v14  ;;  %v614_v27 = vor.u32 %v673_v16, %v611_v17  ;;  %v663_v28 = vld [vmem:[%s1014_s1 + $0x94] sm:$0xf]  ;;  %v567_v29 = vld [vmem:[%s1014_s1 + $0xb4] sm:$0xf0]  ;;  %v668_v31 = vld [vmem:[%s1014_s1 + $0xb8] sm:$0xf0]  ;;  %v566_v35 = vor.u32 %v667_v25, %v565_v24 }
   0x6   :  { %v292_v18 = vsel %vm290_vm0, %v241_v8, 0  ;;  %v295_v19 = vsel %vm290_vm0, %v242_v9, 0  ;;  %v298_v20 = vsel %vm290_vm0, %v243_v10, 0  ;;  %v301_v21 = vsel %vm290_vm0, %v244_v11, 0  ;;  %v573_v30 = vld [vmem:[%s1014_s1 + $0x98] sm:$0xf] }
   0x7   :  { %321 = vmatpush.bf16.msra.mxu0 %v292_v18  ;;  %335 = vmatpush.bf16.msra.mxu1 %v295_v19  ;;  %v664_v32 = vld [vmem:[%s1014_s1 + $0x9c] sm:$0xf]  ;;  %v575_v33 = vld [vmem:[%s1014_s1 + $0xbc] sm:$0xf0]  ;;  %v529_v34 = vld [vmem:[%s1014_s1 + $0x48] sm:$0xf]  ;;  %v570_v36 = vor.u32 %v663_v28, %v567_v29  ;;  %v574_v40 = vor.u32 %v668_v31, %v573_v30 }
   0x8   :  { %349 = vmatpush.bf16.msra.mxu2 %v298_v20  ;;  %363 = vmatpush.bf16.msra.mxu3 %v301_v21  ;;  %v658_v37 = vld [vmem:[%s1014_s1 + $0x68] sm:$0xf0]  ;;  %v59_v39 = vld [vmem:[%s1014_s1 + $0x130] sm:$0xff]  ;;  %v578_v41 = vor.u32 %v664_v32, %v575_v33  ;;  %v539_v46 = vld [vmem:[%s1014_s1 + $0x74] sm:$0xf0] }
   0x9   :  { %v654_v38 = vld [vmem:[%s1014_s1 + $0x4c] sm:$0xf]  ;;  %v531_v42 = vld [vmem:[%s1014_s1 + $0x6c] sm:$0xf0]  ;;  %v659_v44 = vld [vmem:[%s1014_s1 + $0x70] sm:$0xf0]  ;;  %v200_v47 = vunpack.c.l.b16 %v59_v39  ;;  %v201_v48 = vunpack.c.h.b16 %v59_v39  ;;  %v530_v51 = vor.u32 %v658_v37, %v529_v34 }
   0xa   :  { %v537_v43 = vld [vmem:[%s1014_s1 + $0x50] sm:$0xf]  ;;  %v655_v45 = vld [vmem:[%s1014_s1 + $0x54] sm:$0xf]  ;;  %v60_v49 = vld [vmem:[%s1014_s1 + $0x138] sm:$0xff]  ;;  %v534_v52 = vor.u32 %v654_v38, %v531_v42 }
   0xb   :  { %322 = vmatpush.bf16.msra.mxu0 %v602_v22  ;;  %336 = vmatpush.bf16.msra.mxu1 %v606_v23  ;;  %v493_v53 = vld [vmem:[%s1014_s1] sm:$0xf]  ;;  %v538_v54 = vor.u32 %v659_v44, %v537_v43  ;;  %v542_v55 = vor.u32 %v655_v45, %v539_v46  ;;  %v649_v56 = vld [vmem:[%s1014_s1 + $0x20] sm:$0xf0]  ;;  %v495_v58 = vld [vmem:[%s1014_s1 + $0x24] sm:$0xf0]  ;;  %v202_v59 = vunpack.c.l.b16 %v60_v49  ;;  %v203_v60 = vunpack.c.h.b16 %v60_v49 }
   0xc   :  { %350 = vmatpush.bf16.msra.mxu2 %v610_v26  ;;  %364 = vmatpush.bf16.msra.mxu3 %v614_v27  ;;  %v645_v57 = vld [vmem:[%s1014_s1 + $0x4] sm:$0xf]  ;;  %v245_v61 = vpack.c.b16 %v200_v47, %v200_v47  ;;  %v246_v62 = vpack.c.b16 %v201_v48, %v201_v48  ;;  %v501_v63 = vld [vmem:[%s1014_s1 + $0x8] sm:$0xf]  ;;  %v650_v0 = vld [vmem:[%s1014_s1 + $0x28] sm:$0xf0]  ;;  %v494_v4 = vor.u32 %v649_v56, %v493_v53 }
   0xd   :  { %v646_v1 = vld [vmem:[%s1014_s1 + $0xc] sm:$0xf]  ;;  %v503_v2 = vld [vmem:[%s1014_s1 + $0x2c] sm:$0xf0]  ;;  %v62_v3 = vld [vmem:[%s1015_s2] sm:$0xff]  ;;  %v498_v5 = vor.u32 %v645_v57, %v495_v58  ;;  %v247_v6 = vpack.c.b16 %v202_v59, %v202_v59  ;;  %v248_v7 = vpack.c.b16 %v203_v60, %v203_v60  ;;  %v502_v12 = vor.u32 %v650_v0, %v501_v63 }
   0xe   :  { %v617_v8 = vld [vmem:[%s1014_s1 + $0xe8] sm:$0xf]  ;;  %v678_v9 = vld [vmem:[%s1014_s1 + $0x108] sm:$0xf0]  ;;  %v304_v10 = vsel %vm290_vm0, %v245_v61, 0  ;;  %v307_v11 = vsel %vm290_vm0, %v246_v62, 0  ;;  %v506_v13 = vor.u32 %v646_v1, %v503_v2  ;;  %66 = vperm.xlu0 %682, %v62_v3  }
   0xf   :  { %323 = vmatpush.bf16.msra.mxu0 %v566_v35  ;;  %337 = vmatpush.bf16.msra.mxu1 %v570_v36  ;;  %v674_v14 = vld [vmem:[%s1014_s1 + $0xec] sm:$0xf]  ;;  %v619_v15 = vld [vmem:[%s1014_s1 + $0x10c] sm:$0xf0]  ;;  %v836_v16 = vld [vmem:[%s1016_s0] sm:$0xff]  ;;  %v310_v20 = vsel %vm290_vm0, %v247_v6, 0  ;;  %v618_v22 = vor.u32 %v678_v9, %v617_v8 }
  0x10   :  { %351 = vmatpush.bf16.msra.mxu2 %v574_v40  ;;  %365 = vmatpush.bf16.msra.mxu3 %v578_v41  ;;  %v625_v17 = vld [vmem:[%s1014_s1 + $0xf0] sm:$0xf]  ;;  %v679_v18 = vld [vmem:[%s1014_s1 + $0x110] sm:$0xf0]  ;;  %v313_v21 = vsel %vm290_vm0, %v248_v7, 0  ;;  %v622_v23 = vor.u32 %v674_v14, %v619_v15  ;;  %v63_v34 = vld [vmem:[%s1015_s2 + $0x8] sm:$0xff] }
  0x11   :  { %v675_v19 = vld [vmem:[%s1014_s1 + $0xf4] sm:$0xf]  ;;  %v627_v24 = vld [vmem:[%s1014_s1 + $0x114] sm:$0xf0]  ;;  %v581_v25 = vld [vmem:[%s1014_s1 + $0xa0] sm:$0xf]  ;;  %v626_v30 = vor.u32 %v679_v18, %v625_v17 }
  0x12   :  { %v669_v26 = vld [vmem:[%s1014_s1 + $0xc0] sm:$0xf0]  ;;  %v583_v28 = vld [vmem:[%s1014_s1 + $0xc4] sm:$0xf0]  ;;  %v630_v31 = vor.u32 %v675_v19, %v627_v24  ;;  %v670_v32 = vld [vmem:[%s1014_s1 + $0xc8] sm:$0xf0] }
  0x13   :  { %324 = vmatpush.bf16.msra.mxu0 %v530_v51  ;;  %338 = vmatpush.bf16.msra.mxu1 %v534_v52  ;;  %v665_v27 = vld [vmem:[%s1014_s1 + $0xa4] sm:$0xf]  ;;  %v589_v29 = vld [vmem:[%s1014_s1 + $0xa8] sm:$0xf]  ;;  %v61_v33 = vld [vmem:[%s1014_s1 + $0x140] sm:$0xf]  ;;  %v582_v35 = vor.u32 %v669_v26, %v581_v25 }
  0x14   :  { %352 = vmatpush.bf16.msra.mxu2 %v538_v54  ;;  %366 = vmatpush.bf16.msra.mxu3 %v542_v55  ;;  %v586_v36 = vor.u32 %v665_v27, %v583_v28  ;;  %v666_v37 = vld [vmem:[%s1014_s1 + $0xac] sm:$0xf]  ;;  %v591_v38 = vld [vmem:[%s1014_s1 + $0xcc] sm:$0xf0]  ;;  %v545_v39 = vld [vmem:[%s1014_s1 + $0x58] sm:$0xf]  ;;  %v204_v43 = vunpack.c.l.b16 %v61_v33  ;;  %v590_v44 = vor.u32 %v670_v32, %v589_v29 }
  0x15   :  { %v660_v40 = vld [vmem:[%s1014_s1 + $0x78] sm:$0xf0]  ;;  %v547_v42 = vld [vmem:[%s1014_s1 + $0x7c] sm:$0xf0]  ;;  %v594_v45 = vor.u32 %v666_v37, %v591_v38  ;;  %v661_v47 = vld [vmem:[%s1014_s1 + $0x80] sm:$0xf0] }
  0x16   :  { %v656_v41 = vld [vmem:[%s1014_s1 + $0x5c] sm:$0xf]  ;;  %71 = vperm.xlu0 %682, %v63_v34   ;;  %v553_v46 = vld [vmem:[%s1014_s1 + $0x60] sm:$0xf]  ;;  %v546_v48 = vor.u32 %v660_v40, %v545_v39  ;;  %v657_v50 = vld [vmem:[%s1014_s1 + $0x64] sm:$0xf]  ;;  %v249_v56 = vpack.c.b16 %v204_v43, %v204_v43 }
  0x17   :  { %325 = vmatpush.bf16.msra.mxu0 %v494_v4  ;;  %339 = vmatpush.bf16.msra.mxu1 %v498_v5  ;;  %v550_v49 = vor.u32 %v656_v41, %v547_v42  ;;  %v555_v51 = vld [vmem:[%s1014_s1 + $0x84] sm:$0xf0]  ;;  %v509_v52 = vld [vmem:[%s1014_s1 + $0x10] sm:$0xf]  ;;  %v651_v53 = vld [vmem:[%s1014_s1 + $0x30] sm:$0xf0]  ;;  %v554_v57 = vor.u32 %v661_v47, %v553_v46 }
  0x18   :  { %353 = vmatpush.bf16.msra.mxu2 %v502_v12  ;;  %367 = vmatpush.bf16.msra.mxu3 %v506_v13  ;;  %v647_v54 = vld [vmem:[%s1014_s1 + $0x14] sm:$0xf]  ;;  %v511_v55 = vld [vmem:[%s1014_s1 + $0x34] sm:$0xf0]  ;;  %v558_v58 = vor.u32 %v657_v50, %v555_v51  ;;  %v510_v59 = vor.u32 %v651_v53, %v509_v52  ;;  %v652_v62 = vld [vmem:[%s1014_s1 + $0x38] sm:$0xf0] }
  0x19   :  { %v514_v60 = vor.u32 %v647_v54, %v511_v55  ;;  %v517_v61 = vld [vmem:[%s1014_s1 + $0x18] sm:$0xf]  ;;  %v648_v63 = vld [vmem:[%s1014_s1 + $0x1c] sm:$0xf]  ;;  %v519_v0 = vld [vmem:[%s1014_s1 + $0x3c] sm:$0xf0] }
  0x1a   :  { %635 = vmatmul.msk.bf16.vlgmr.msra.gmra.mxu0 %vm286_vm1, %v836_v16  ;;  %636 = vmatmul.msk.bf16.vlgmr.msra.gmra.mxu1 %vm286_vm1, %v836_v16  ;;  %v316_v1 = vsel %vm290_vm0, %v249_v56, 0  ;;  %v633_v2 = vld [vmem:[%s1014_s1 + $0xf8] sm:$0xf]  ;;  %v680_v3 = vld [vmem:[%s1014_s1 + $0x118] sm:$0xf0]  ;;  %v518_v4 = vor.u32 %v652_v62, %v517_v61  ;;  %v522_v5 = vor.u32 %v648_v63, %v519_v0 }
  0x1b   :  { %377 = vmatpush.bf16.msrb.mxu0 %v304_v10  ;;  %391 = vmatpush.bf16.msrb.mxu1 %v307_v11  ;;  %v634_v6 = vor.u32 %v680_v3, %v633_v2  ;;  %v597_v7 = vld [vmem:[%s1014_s1 + $0xb0] sm:$0xf]  ;;  %v671_v8 = vld [vmem:[%s1014_s1 + $0xd0] sm:$0xf0]  ;;  %v561_v10 = vld [vmem:[%s1014_s1 + $0x68] sm:$0xf] }
  0x1c   :  { %405 = vmatpush.bf16.msrb.mxu2 %v310_v20  ;;  %419 = vmatpush.bf16.msrb.mxu3 %v313_v21  ;;  %v598_v9 = vor.u32 %v671_v8, %v597_v7  ;;  %v662_v11 = vld [vmem:[%s1014_s1 + $0x88] sm:$0xf0]  ;;  %v525_v13 = vld [vmem:[%s1014_s1 + $0x20] sm:$0xf]  ;;  %v653_v14 = vld [vmem:[%s1014_s1 + $0x40] sm:$0xf0] }
  0x1d   :  { %637 = vmatmul.msk.bf16.vlgmr.msra.gmra.mxu2 %vm286_vm1, %v836_v16  ;;  %638 = vmatmul.msk.bf16.vlgmr.msra.gmra.mxu3 %vm286_vm1, %v836_v16  ;;  %v562_v12 = vor.u32 %v662_v11, %v561_v10  ;;  %v526_v15 = vor.u32 %v653_v14, %v525_v13 }
  0x1f   :  { %378 = vmatpush.bf16.msrb.mxu0 %v618_v22  ;;  %392 = vmatpush.bf16.msrb.mxu1 %v622_v23 }
  0x20   :  { %406 = vmatpush.bf16.msrb.mxu2 %v626_v30  ;;  %420 = vmatpush.bf16.msrb.mxu3 %v630_v31 }
  0x23   :  { %379 = vmatpush.bf16.msrb.mxu0 %v582_v35  ;;  %393 = vmatpush.bf16.msrb.mxu1 %v586_v36 }
  0x24   :  { %407 = vmatpush.bf16.msrb.mxu2 %v590_v44  ;;  %421 = vmatpush.bf16.msrb.mxu3 %v594_v45 }
  0x27   :  { %380 = vmatpush.bf16.msrb.mxu0 %v546_v48  ;;  %394 = vmatpush.bf16.msrb.mxu1 %v550_v49 }
  0x28   :  { %408 = vmatpush.bf16.msrb.mxu2 %v554_v57  ;;  %422 = vmatpush.bf16.msrb.mxu3 %v558_v58 }
  0x2b   :  { %381 = vmatpush.bf16.msrb.mxu0 %v510_v59  ;;  %395 = vmatpush.bf16.msrb.mxu1 %v514_v60 }
  0x2c   :  { %409 = vmatpush.bf16.msrb.mxu2 %v518_v4  ;;  %423 = vmatpush.bf16.msrb.mxu3 %v522_v5 }
  0x2e   :  { %639 = vmatmul.msk.bf16.vlgmr.msrb.gmra.mxu0 %vm286_vm1, %v836_v16  ;;  %640 = vmatmul.msk.bf16.vlgmr.msrb.gmra.mxu1 %vm286_vm1, %v836_v16 }
  0x2f   :  { %433 = vmatpush.bf16.msra.mxu0 %v316_v1  ;;  %641 = vmatmul.msk.bf16.vlgmr.msrb.gmra.mxu2 %vm286_vm1, %v836_v16 }
  0x30   :  { %642 = vmatmul.msk.bf16.vlgmr.msrb.gmra.mxu3 %vm286_vm1, %v836_v16 }
  0x33   :  { %434 = vmatpush.bf16.msra.mxu0 %v634_v6 }
  0x37   :  { %435 = vmatpush.bf16.msra.mxu0 %v598_v9 }
  0x3b   :  { %436 = vmatpush.bf16.msra.mxu0 %v562_v12 }
  0x3f   :  { %437 = vmatpush.bf16.msra.mxu0 %v526_v15 }
  0x42   :  { %643 = vmatmul.msk.bf16.vlgmr.msra.gmra.mxu0 %vm286_vm1, %v836_v16 }
  0x80   :  { %v67_v17 = vpop.permute.xlu0 %66 }
  0x88   :  { %v973_v25 = vpop.permute.xlu0 %71 }
  0x97   :  { %v327_v18 = vpop.f32.mrf.mxu0  ;;  %v341_v19 = vpop.f32.mrf.mxu1 }
  0x98   :  { %v328_v20 = vadd.f32 %v327_v18, %v67_v17  ;;  %v342_v21 = vadd.f32 %v341_v19, %v67_v17 }
  0x9a   :  { %v444_v22 = vmax.f32 %v328_v20, 0.0  ;;  %v445_v23 = vmax.f32 %v342_v21, 0.0 }
  0x9c   :  { %v462_v24 = vpack.c.bf16 %v445_v23, %v444_v22 }
  0x9e   :  { %472 = vst [vmem:[%s1017_s3] sm:$0xff] %v462_v24 }
  0x9f   :  { %v329_v26 = vpop.f32.mrf.mxu0  ;;  %v343_v27 = vpop.f32.mrf.mxu1 }
  0xa0   :  { %v330_v28 = vadd.f32 %v329_v26, %v973_v25  ;;  %v344_v16 = vadd.f32 %v343_v27, %v973_v25  ;;  %v355_v29 = vpop.f32.mrf.mxu2  ;;  %v369_v30 = vpop.f32.mrf.mxu3 }
  0xa1   :  { %v356_v31 = vadd.f32 %v355_v29, %v67_v17  ;;  %v370_v32 = vadd.f32 %v369_v30, %v67_v17 }
  0xa2   :  { %v453_v33 = vmax.f32 %v330_v28, 0.0  ;;  %v454_v34 = vmax.f32 %v344_v16, 0.0 }
  0xa3   :  { %v446_v35 = vmax.f32 %v356_v31, 0.0  ;;  %v447_v36 = vmax.f32 %v370_v32, 0.0 }
  0xa4   :  { %v467_v37 = vpack.c.bf16 %v454_v34, %v453_v33 }
  0xa5   :  { %v463_v38 = vpack.c.bf16 %v447_v36, %v446_v35 }
  0xa6   :  { %478 = vst [vmem:[%s1017_s3 + $0x24] sm:$0xff] %v467_v37 }
  0xa7   :  { %473 = vst [vmem:[%s1017_s3 + $0x8] sm:$0xff] %v463_v38 }
  0xa8   :  { %v357_v43 = vpop.f32.mrf.mxu2  ;;  %v371_v44 = vpop.f32.mrf.mxu3 }
  0xa9   :  { %v358_v45 = vadd.f32 %v357_v43, %v973_v25  ;;  %v372_v46 = vadd.f32 %v371_v44, %v973_v25 }
  0xab   :  { %v383_v39 = vpop.f32.mrf.mxu0  ;;  %v397_v40 = vpop.f32.mrf.mxu1  ;;  %v455_v49 = vmax.f32 %v358_v45, 0.0  ;;  %v456_v50 = vmax.f32 %v372_v46, 0.0 }
  0xac   :  { %v384_v41 = vadd.f32 %v383_v39, %v67_v17  ;;  %v398_v42 = vadd.f32 %v397_v40, %v67_v17 }
  0xad   :  { %v468_v52 = vpack.c.bf16 %v456_v50, %v455_v49 }
  0xae   :  { %v448_v47 = vmax.f32 %v384_v41, 0.0  ;;  %v449_v48 = vmax.f32 %v398_v42, 0.0 }
  0xaf   :  { %479 = vst [vmem:[%s1017_s3 + $0x2c] sm:$0xff] %v468_v52 }
  0xb0   :  { %v464_v51 = vpack.c.bf16 %v449_v48, %v448_v47 }
  0xb2   :  { %474 = vst [vmem:[%s1017_s3 + $0x10] sm:$0xff] %v464_v51  ;;  %v411_v57 = vpop.f32.mrf.mxu2 }
  0xb3   :  { %v385_v53 = vpop.f32.mrf.mxu0  ;;  %v399_v54 = vpop.f32.mrf.mxu1  ;;  %v412_v61 = vadd.f32 %v411_v57, %v67_v17 }
  0xb4   :  { %v386_v55 = vadd.f32 %v385_v53, %v973_v25  ;;  %v400_v56 = vadd.f32 %v399_v54, %v973_v25  ;;  %v425_v58 = vpop.f32.mrf.mxu3 }
  0xb5   :  { %v426_v62 = vadd.f32 %v425_v58, %v67_v17  ;;  %v450_v0 = vmax.f32 %v412_v61, 0.0 }
  0xb6   :  { %v457_v59 = vmax.f32 %v386_v55, 0.0  ;;  %v458_v60 = vmax.f32 %v400_v56, 0.0 }
  0xb7   :  { %v451_v1 = vmax.f32 %v426_v62, 0.0 }
  0xb8   :  { %v469_v63 = vpack.c.bf16 %v458_v60, %v457_v59 }
  0xb9   :  { %v465_v2 = vpack.c.bf16 %v451_v1, %v450_v0 }
  0xba   :  { %480 = vst [vmem:[%s1017_s3 + $0x34] sm:$0xff] %v469_v63  ;;  %v413_v4 = vpop.f32.mrf.mxu2 }
  0xbb   :  { %475 = vst [vmem:[%s1017_s3 + $0x18] sm:$0xff] %v465_v2  ;;  %v414_v7 = vadd.f32 %v413_v4, %v973_v25 }
  0xbc   :  { %v427_v5 = vpop.f32.mrf.mxu3 }
  0xbd   :  { %v428_v8 = vadd.f32 %v427_v5, %v973_v25  ;;  %v459_v10 = vmax.f32 %v414_v7, 0.0 }
  0xbf   :  { %v439_v3 = vpop.f32.mrf.mxu0  ;;  %v460_v11 = vmax.f32 %v428_v8, 0.0 }
  0xc0   :  { %v440_v6 = vadd.f32 %v439_v3, %v67_v17 }
  0xc1   :  { %v470_v13 = vpack.c.bf16 %v460_v11, %v459_v10 }
  0xc2   :  { %v452_v9 = vmax.f32 %v440_v6, 0.0 }
  0xc3   :  { %481 = vst [vmem:[%s1017_s3 + $0x3c] sm:$0xff] %v470_v13 }
  0xc4   :  { %v466_v12 = vpack.c.bf16 %v452_v9, %v452_v9 }
  0xc6   :  { %477 = vst.msk [vmem:[%s1017_s3 + $0x20] sm:$0xf] %vm476_vm2, %v466_v12 }
  0xc7   :  { %v441_v14 = vpop.f32.mrf.mxu0 }
  0xc8   :  { %v442_v15 = vadd.f32 %v441_v14, %v973_v25 }
  0xca   :  { %v461_v17 = vmax.f32 %v442_v15, 0.0 }
  0xcc   :  { %v471_v18 = vpack.c.bf16 %v461_v17, %v461_v17 }
  0xce   :  { %482 = vst.msk [vmem:[%s1017_s3 + $0x44] sm:$0xf] %vm476_vm2, %v471_v18 }

// kernel: actor_forward.7
= control target key start
LH: loop header
LB: loop body
LE: loop exit
PB: predicated region body
PF: predicated region fallthrough
CT: control target
= control target key end

     0   :  { %vm169_vm0 = vcmask 130048   ;;  %v392_v39 = vmov 0   ;;  %vm264_vm1 = vcmask 1043456   ;;  %vm265_vm2 = vcmask 932868   ;;  %s585_s1 = inlined_call_operand.vmem [shape: bf16[144,242], index: 1, kind: input, shape index: {}]   ;;  %s586_s0 = inlined_call_operand.vmem [shape: bf16[32,144], index: 0, kind: input, shape index: {}]   ;;  %s587_s2 = inlined_call_operand.vmem [shape: f32[32,1], index: 2, kind: input, shape index: {}]   ;;  %s588_s3 = inlined_call_operand.vmem [shape: bf16[32,242], index: 3, kind: output, shape index: {}]  }
   0x1   :  { %v349_v0 = vld [vmem:[%s585_s1 + $0x70] sm:$0xf]  ;;  %v386_v1 = vld [vmem:[%s585_s1 + $0x74] sm:$0xf0]  ;;  %v385_v2 = vld [vmem:[%s585_s1 + $0x74] sm:$0xf]  ;;  %390 = vset.pattern.permute.xlu0 %v392_v39  ;;  %391 = vset.pattern.permute.xlu1 %v392_v39 }
   0x2   :  { %v350_v3 = vor.u32 %v386_v1, %v349_v0  ;;  %v351_v4 = vld [vmem:[%s585_s1 + $0x78] sm:$0xf0]  ;;  %v341_v5 = vld [vmem:[%s585_s1 + $0x60] sm:$0xf]  ;;  %v384_v6 = vld [vmem:[%s585_s1 + $0x64] sm:$0xf0] }
   0x3   :  { %v354_v7 = vor.u32 %v385_v2, %v351_v4  ;;  %v383_v8 = vld [vmem:[%s585_s1 + $0x64] sm:$0xf]  ;;  %v343_v9 = vld [vmem:[%s585_s1 + $0x68] sm:$0xf0]  ;;  %v342_v10 = vor.u32 %v384_v6, %v341_v5  ;;  %v333_v12 = vld [vmem:[%s585_s1 + $0x50] sm:$0xf] }
   0x4   :  { %176 = vmatpush.bf16.msra.mxu0 %v350_v3  ;;  %v346_v11 = vor.u32 %v383_v8, %v343_v9  ;;  %v382_v13 = vld [vmem:[%s585_s1 + $0x54] sm:$0xf0]  ;;  %v381_v14 = vld [vmem:[%s585_s1 + $0x54] sm:$0xf]  ;;  %v335_v15 = vld [vmem:[%s585_s1 + $0x58] sm:$0xf0] }
   0x5   :  { %214 = vmatpush.bf16.msra.mxu2 %v354_v7  ;;  %v334_v16 = vor.u32 %v382_v13, %v333_v12  ;;  %v325_v17 = vld [vmem:[%s585_s1 + $0x40] sm:$0xf]  ;;  %v338_v18 = vor.u32 %v381_v14, %v335_v15  ;;  %v380_v19 = vld [vmem:[%s585_s1 + $0x44] sm:$0xf0]  ;;  %v387_v20 = vld [vmem:[%s585_s1 + $0x84] sm:$0xf] }
   0x6   :  { %v359_v21 = vld [vmem:[%s585_s1 + $0x88] sm:$0xf0]  ;;  %v379_v22 = vld [vmem:[%s585_s1 + $0x44] sm:$0xf]  ;;  %v326_v27 = vor.u32 %v380_v19, %v325_v17  ;;  %v357_v29 = vld [vmem:[%s585_s1 + $0x80] sm:$0xf] }
   0x7   :  { %v327_v23 = vld [vmem:[%s585_s1 + $0x48] sm:$0xf0]  ;;  %v362_v24 = vor.u32 %v387_v20, %v359_v21  ;;  %v367_v25 = vld [vmem:[%s586_s0 + $0x4] sm:$0xf]  ;;  %v388_v30 = vld [vmem:[%s585_s1 + $0x84] sm:$0xf0] }
   0x8   :  { %177 = vmatpush.bf16.msra.mxu0 %v342_v10  ;;  %v279_v26 = vld [vmem:[%s586_s0 + $0x8] sm:$0xf0]  ;;  %v330_v31 = vor.u32 %v379_v22, %v327_v23  ;;  %v317_v32 = vld [vmem:[%s585_s1 + $0x30] sm:$0xf]  ;;  %v378_v33 = vld [vmem:[%s585_s1 + $0x34] sm:$0xf0]  ;;  %v358_v34 = vor.u32 %v388_v30, %v357_v29 }
   0x9   :  { %215 = vmatpush.bf16.msra.mxu2 %v346_v11  ;;  %240 = vmatpush.bf16.msra.mxu3 %v362_v24  ;;  %v282_v28 = vor.u32 %v367_v25, %v279_v26  ;;  %v377_v35 = vld [vmem:[%s585_s1 + $0x34] sm:$0xf]  ;;  %v319_v36 = vld [vmem:[%s585_s1 + $0x38] sm:$0xf0]  ;;  %v37_v37 = vld [vmem:[%s587_s2] sm:$0xff]  ;;  %v318_v38 = vor.u32 %v378_v33, %v317_v32 }
   0xa   :  { %202 = vmatpush.bf16.msra.mxu1 %v358_v34  ;;  %v322_v40 = vor.u32 %v377_v35, %v319_v36  ;;  %v309_v41 = vld [vmem:[%s585_s1 + $0x20] sm:$0xf]  ;;  %v376_v42 = vld [vmem:[%s585_s1 + $0x24] sm:$0xf0]  ;;  %43 = vperm.xlu0 %390, %v37_v37   ;;  %v375_v43 = vld [vmem:[%s585_s1 + $0x24] sm:$0xf] }
   0xb   :  { %v311_v44 = vld [vmem:[%s585_s1 + $0x28] sm:$0xf0]  ;;  %v310_v45 = vor.u32 %v376_v42, %v309_v41  ;;  %v39_v46 = vld [vmem:[%s587_s2 + $0x10] sm:$0xff]  ;;  %v374_v49 = vld [vmem:[%s585_s1 + $0x14] sm:$0xf0] }
   0xc   :  { %178 = vmatpush.bf16.msra.mxu0 %v334_v16  ;;  %365 = vmatmul.msk.bf16.vlgmr.msra.gmra.mxu3 %vm169_vm0, %v282_v28  ;;  %v314_v47 = vor.u32 %v375_v43, %v311_v44  ;;  %v301_v48 = vld [vmem:[%s585_s1 + $0x10] sm:$0xf]  ;;  %v373_v50 = vld [vmem:[%s585_s1 + $0x14] sm:$0xf]  ;;  %v303_v51 = vld [vmem:[%s585_s1 + $0x18] sm:$0xf0] }
   0xd   :  { %216 = vmatpush.bf16.msra.mxu2 %v338_v18  ;;  %363 = vmatmul.msk.bf16.vlgmr.msra.gmra.mxu1 %vm169_vm0, %v282_v28  ;;  %v38_v52 = vld [vmem:[%s587_s2 + $0x8] sm:$0xff]  ;;  %v302_v53 = vor.u32 %v374_v49, %v301_v48  ;;  %v369_v54 = vld [vmem:[%s586_s0 + $0x14] sm:$0xf]  ;;  %v287_v55 = vld [vmem:[%s586_s0 + $0x18] sm:$0xf0]  ;;  %v306_v56 = vor.u32 %v373_v50, %v303_v51 }
   0xe   :  { %53 = vperm.xlu1 %391, %v39_v46   ;;  %v293_v57 = vld [vmem:[%s585_s1] sm:$0xf]  ;;  %v372_v58 = vld [vmem:[%s585_s1 + $0x4] sm:$0xf0]  ;;  %v371_v59 = vld [vmem:[%s585_s1 + $0x4] sm:$0xf]  ;;  %v290_v62 = vor.u32 %v369_v54, %v287_v55 }
   0xf   :  { %v295_v60 = vld [vmem:[%s585_s1 + $0x8] sm:$0xf0]  ;;  %v40_v61 = vld [vmem:[%s587_s2 + $0x18] sm:$0xff]  ;;  %v294_v63 = vor.u32 %v372_v58, %v293_v57  ;;  %v277_v0 = vld [vmem:[%s586_s0] sm:$0xf] }
  0x10   :  { %179 = vmatpush.bf16.msra.mxu0 %v326_v27  ;;  %v368_v1 = vld [vmem:[%s586_s0 + $0x4] sm:$0xf0]  ;;  %v298_v2 = vor.u32 %v371_v59, %v295_v60  ;;  %v285_v4 = vld [vmem:[%s586_s0 + $0x10] sm:$0xf]  ;;  %v370_v5 = vld [vmem:[%s586_s0 + $0x14] sm:$0xf0] }
  0x11   :  { %217 = vmatpush.bf16.msra.mxu2 %v330_v31  ;;  %v278_v3 = vor.u32 %v368_v1, %v277_v0  ;;  %v286_v6 = vor.u32 %v370_v5, %v285_v4  ;;  %vm561_vm3 = vmor %vm265_vm2, %vm264_vm1 }
  0x12   :  { %48 = vperm.xlu0 %390, %v38_v52  }
  0x14   :  { %180 = vmatpush.bf16.msra.mxu0 %v318_v38 }
  0x15   :  { %218 = vmatpush.bf16.msra.mxu2 %v322_v40 }
  0x16   :  { %58 = vperm.xlu1 %391, %v40_v61  }
  0x18   :  { %181 = vmatpush.bf16.msra.mxu0 %v310_v45 }
  0x19   :  { %219 = vmatpush.bf16.msra.mxu2 %v314_v47 }
  0x1c   :  { %182 = vmatpush.bf16.msra.mxu0 %v302_v53  ;;  %366 = vmatmul.msk.bf16.gmra.mxu3 %vm169_vm0, %v290_v62 }
  0x1d   :  { %220 = vmatpush.bf16.msra.mxu2 %v306_v56  ;;  %364 = vmatmul.msk.bf16.gmra.mxu1 %vm169_vm0, %v290_v62 }
  0x20   :  { %183 = vmatpush.bf16.msra.mxu0 %v294_v63 }
  0x21   :  { %221 = vmatpush.bf16.msra.mxu2 %v298_v2 }
  0x23   :  { %184 = vmatmul.bf16.vlgmr.msra.gmra.mxu0 %v278_v3 }
  0x24   :  { %222 = vmatmul.bf16.vlgmr.msra.gmra.mxu2 %v278_v3 }
  0x33   :  { %189 = vmatmul.bf16.gmra.mxu0 %v286_v6 }
  0x34   :  { %227 = vmatmul.bf16.gmra.mxu2 %v286_v6 }
  0x7c   :  { %v44_v7 = vpop.permute.xlu0 %43 }
  0x80   :  { %v54_v29 = vpop.permute.xlu1 %53 }
  0x84   :  { %v49_v16 = vpop.permute.xlu0 %48 }
  0x88   :  { %v59_v43 = vpop.permute.xlu1 %58 }
  0x8a   :  { %v204_v9 = vpop.f32.mrf.mxu1 }
  0x8f   :  { %v242_v11 = vpop.f32.mrf.mxu3 }
  0x92   :  { %v206_v19 = vpop.f32.mrf.mxu1 }
  0x97   :  { %v244_v23 = vpop.f32.mrf.mxu3 }
  0x9a   :  { %v209_v34 = vpop.f32.mrf.mxu1 }
  0x9f   :  { %v247_v37 = vpop.f32.mrf.mxu3 }
  0xa0   :  { %v185_v8 = vpop.f32.mrf.mxu0 }
  0xa1   :  { %v186_v10 = vadd.f32 %v185_v8, %v44_v7 }
  0xa2   :  { %v211_v47 = vpop.f32.mrf.mxu1 }
  0xa3   :  { %v205_v12 = vadd.f32 %v204_v9, %v186_v10 }
  0xa5   :  { %v252_v17 = vmax.f32 %v205_v12, 0.0 }
  0xa7   :  { %v223_v13 = vpop.f32.mrf.mxu2  ;;  %v249_v51 = vpop.f32.mrf.mxu3 }
  0xa8   :  { %v224_v14 = vadd.f32 %v223_v13, %v44_v7  ;;  %v187_v15 = vpop.f32.mrf.mxu0 }
  0xa9   :  { %v188_v21 = vadd.f32 %v187_v15, %v49_v16 }
  0xaa   :  { %v243_v18 = vadd.f32 %v242_v11, %v224_v14 }
  0xab   :  { %v207_v26 = vadd.f32 %v206_v19, %v188_v21 }
  0xac   :  { %v253_v20 = vmax.f32 %v243_v18, 0.0 }
  0xad   :  { %v254_v32 = vmax.f32 %v207_v26, 0.0 }
  0xae   :  { %v260_v24 = vpack.c.bf16 %v253_v20, %v252_v17 }
  0xaf   :  { %v225_v25 = vpop.f32.mrf.mxu2 }
  0xb0   :  { %267 = vst.msk [vmem:[%s588_s3] sm:$0xff] %vm561_vm3, %v260_v24  ;;  %v226_v27 = vadd.f32 %v225_v25, %v49_v16  ;;  %v190_v28 = vpop.f32.mrf.mxu0 }
  0xb1   :  { %v191_v31 = vadd.f32 %v190_v28, %v54_v29 }
  0xb2   :  { %v245_v30 = vadd.f32 %v244_v23, %v226_v27 }
  0xb3   :  { %v210_v36 = vadd.f32 %v209_v34, %v191_v31 }
  0xb4   :  { %v255_v33 = vmax.f32 %v245_v30, 0.0 }
  0xb5   :  { %v256_v41 = vmax.f32 %v210_v36, 0.0 }
  0xb6   :  { %v261_v35 = vpack.c.bf16 %v255_v33, %v254_v32 }
  0xb7   :  { %v228_v38 = vpop.f32.mrf.mxu2 }
  0xb8   :  { %268 = vst.msk [vmem:[%s588_s3 + $0x8] sm:$0xff] %vm561_vm3, %v261_v35  ;;  %v229_v39 = vadd.f32 %v228_v38, %v54_v29  ;;  %v192_v40 = vpop.f32.mrf.mxu0 }
  0xb9   :  { %v193_v45 = vadd.f32 %v192_v40, %v59_v43 }
  0xba   :  { %v248_v42 = vadd.f32 %v247_v37, %v229_v39 }
  0xbb   :  { %v212_v49 = vadd.f32 %v211_v47, %v193_v45 }
  0xbc   :  { %v257_v44 = vmax.f32 %v248_v42, 0.0 }
  0xbd   :  { %v258_v53 = vmax.f32 %v212_v49, 0.0 }
  0xbe   :  { %v262_v46 = vpack.c.bf16 %v257_v44, %v256_v41 }
  0xbf   :  { %v230_v48 = vpop.f32.mrf.mxu2 }
  0xc0   :  { %269 = vst.msk [vmem:[%s588_s3 + $0x10] sm:$0xff] %vm561_vm3, %v262_v46  ;;  %v231_v50 = vadd.f32 %v230_v48, %v59_v43 }
  0xc2   :  { %v250_v52 = vadd.f32 %v249_v51, %v231_v50 }
  0xc4   :  { %v259_v54 = vmax.f32 %v250_v52, 0.0 }
  0xc6   :  { %v263_v55 = vpack.c.bf16 %v259_v54, %v258_v53 }
  0xc8   :  { %270 = vst.msk [vmem:[%s588_s3 + $0x18] sm:$0xff] %vm561_vm3, %v263_v55 }

// kernel: actor_forward.8
= control target key start
LH: loop header
LB: loop body
LE: loop exit
PB: predicated region body
PF: predicated region fallthrough
CT: control target
= control target key end

     0   :  { %vm283_vm0 = vcmask 261120   ;;  %v586_v15 = vmov 0   ;;  %vm399_vm1 = vcmask 404480   ;;  %s813_s1 = inlined_call_operand.vmem [shape: bf16[288,50], index: 1, kind: input, shape index: {}]   ;;  %s814_s0 = inlined_call_operand.vmem [shape: bf16[64,288], index: 0, kind: input, shape index: {}]   ;;  %s815_s2 = inlined_call_operand.vmem [shape: f32[64,1], index: 2, kind: input, shape index: {}]   ;;  %s816_s3 = inlined_call_operand.vmem [shape: bf16[64,50], index: 3, kind: output, shape index: {}]  }
   0x1   :  { %v555_v0 = vld [vmem:[%s813_s1 + $0x38] sm:$0xff]  ;;  %v565_v2 = vld [vmem:[%s813_s1 + $0x88] sm:$0xff]  ;;  %v554_v3 = vld [vmem:[%s813_s1 + $0x30] sm:$0xff]  ;;  %584 = vset.pattern.permute.xlu1 %v586_v15  ;;  %583 = vset.pattern.permute.xlu0 %v586_v15 }
   0x2   :  { %v613_v1 = vld [vmem:[%s813_s1 + $0x78] sm:$0xff]  ;;  %296 = vmatpush.bf16.msra.mxu0 %v555_v0  ;;  %566 = vmatpush.bf16.msra.mxu3 %v555_v0  ;;  %v625_v4 = vld [vmem:[%s813_s1 + $0x70] sm:$0xff]  ;;  %v564_v5 = vld [vmem:[%s813_s1 + $0x80] sm:$0xff] }
   0x3   :  { %574 = vmatpush.bf16.msra.mxu1 %v613_v1  ;;  %360 = vmatpush.bf16.msra.mxu2 %v565_v2  ;;  %v422_v6 = vld [vmem:[%s814_s0 + $0x8] sm:$0xf]  ;;  %v538_v7 = vld [vmem:[%s814_s0 + $0x10] sm:$0xf0]  ;;  %v552_v11 = vld [vmem:[%s813_s1 + $0x20] sm:$0xff] }
   0x4   :  { %v553_v8 = vld [vmem:[%s813_s1 + $0x28] sm:$0xff]  ;;  %v423_v10 = vor.u32 %v538_v7, %v422_v6  ;;  %v653_v12 = vld [vmem:[%s813_s1 + $0x60] sm:$0xff]  ;;  %v551_v13 = vld [vmem:[%s813_s1 + $0x18] sm:$0xff]  ;;  %585 = vset.pattern.permute.xlu2 %v586_v15 }
   0x5   :  { %v643_v9 = vld [vmem:[%s813_s1 + $0x68] sm:$0xff]  ;;  %v662_v14 = vld [vmem:[%s813_s1 + $0x58] sm:$0xff]  ;;  %v550_v16 = vld [vmem:[%s813_s1 + $0x10] sm:$0xff] }
   0x6   :  { %297 = vmatpush.bf16.msra.mxu0 %v554_v3  ;;  %567 = vmatpush.bf16.msra.mxu3 %v554_v3  ;;  %v69_v17 = vld [vmem:[%s815_s2 + $0x10] sm:$0xff]  ;;  %v434_v19 = vld [vmem:[%s814_s0 + $0x20] sm:$0xf]  ;;  %v541_v20 = vld [vmem:[%s814_s0 + $0x28] sm:$0xf0] }
   0x7   :  { %575 = vmatpush.bf16.msra.mxu1 %v625_v4  ;;  %361 = vmatpush.bf16.msra.mxu2 %v564_v5  ;;  %v558_v18 = vld [vmem:[%s813_s1 + $0x50] sm:$0xff]  ;;  %v549_v21 = vld [vmem:[%s813_s1 + $0x8] sm:$0xff]  ;;  %v435_v23 = vor.u32 %v541_v20, %v434_v19  ;;  %v67_v24 = vld [vmem:[%s815_s2] sm:$0xff] }
   0x8   :  { %87 = vperm.xlu1 %584, %v69_v17   ;;  %v557_v22 = vld [vmem:[%s813_s1 + $0x48] sm:$0xff]  ;;  %77 = vperm.xlu0 %583, %v67_v24   ;;  %v548_v25 = vld [vmem:[%s813_s1] sm:$0xff]  ;;  %v426_v26 = vld [vmem:[%s814_s0 + $0x18] sm:$0xf] }
   0x9   :  { %v70_v27 = vld [vmem:[%s815_s2 + $0x18] sm:$0xff]  ;;  %v540_v28 = vld [vmem:[%s814_s0 + $0x20] sm:$0xf0]  ;;  %v414_v29 = vld [vmem:[%s814_s0] sm:$0xf] }
   0xa   :  { %298 = vmatpush.bf16.msra.mxu0 %v553_v8  ;;  %568 = vmatpush.bf16.msra.mxu3 %v553_v8  ;;  %v537_v30 = vld [vmem:[%s814_s0 + $0x8] sm:$0xf0]  ;;  %v556_v31 = vld [vmem:[%s813_s1 + $0x40] sm:$0xff]  ;;  %v539_v32 = vld [vmem:[%s814_s0 + $0x1c] sm:$0xf]  ;;  %v427_v34 = vor.u32 %v540_v28, %v426_v26 }
   0xb   :  { %576 = vmatpush.bf16.msra.mxu1 %v643_v9  ;;  %532 = vmatmul.msk.bf16.vlgmr.msra.gmra.mxu2 %vm283_vm0, %v423_v10  ;;  %v428_v33 = vld [vmem:[%s814_s0 + $0x24] sm:$0xf0]  ;;  %v415_v35 = vor.u32 %v537_v30, %v414_v29  ;;  %v74_v38 = vld [vmem:[%s815_s2 + $0x38] sm:$0xff]  ;;  %v71_v39 = vld [vmem:[%s815_s2 + $0x20] sm:$0xff] }
   0xc   :  { %v431_v36 = vor.u32 %v539_v32, %v428_v33  ;;  %v68_v37 = vld [vmem:[%s815_s2 + $0x8] sm:$0xff]  ;;  %v446_v40 = vld [vmem:[%s814_s0 + $0x38] sm:$0xf]  ;;  %v544_v41 = vld [vmem:[%s814_s0 + $0x40] sm:$0xf0]  ;;  %97 = vperm.xlu2 %585, %v71_v39  }
   0xd   :  { %v447_v42 = vor.u32 %v544_v41, %v446_v40  ;;  %v73_v43 = vld [vmem:[%s815_s2 + $0x30] sm:$0xff]  ;;  %v72_v44 = vld [vmem:[%s815_s2 + $0x28] sm:$0xff]  ;;  %v543_v46 = vld [vmem:[%s814_s0 + $0x38] sm:$0xf0] }
   0xe   :  { %299 = vmatpush.bf16.msra.mxu0 %v552_v11  ;;  %569 = vmatpush.bf16.msra.mxu3 %v552_v11  ;;  %v438_v45 = vld [vmem:[%s814_s0 + $0x30] sm:$0xf]  ;;  %v542_v47 = vld [vmem:[%s814_s0 + $0x34] sm:$0xf]  ;;  %v440_v48 = vld [vmem:[%s814_s0 + $0x3c] sm:$0xf0] }
   0xf   :  { %577 = vmatpush.bf16.msra.mxu1 %v653_v12  ;;  %v439_v49 = vor.u32 %v543_v46, %v438_v45  ;;  %v443_v50 = vor.u32 %v542_v47, %v440_v48  ;;  %v458_v51 = vld [vmem:[%s814_s0 + $0x50] sm:$0xf]  ;;  %v547_v52 = vld [vmem:[%s814_s0 + $0x58] sm:$0xf0]  ;;  %v536_v54 = vld [vmem:[%s814_s0 + $0x4] sm:$0xf] }
  0x10   :  { %92 = vperm.xlu1 %584, %v70_v27   ;;  %82 = vperm.xlu0 %583, %v68_v37   ;;  %v459_v53 = vor.u32 %v547_v52, %v458_v51  ;;  %v416_v55 = vld [vmem:[%s814_s0 + $0xc] sm:$0xf0]  ;;  %v450_v57 = vld [vmem:[%s814_s0 + $0x48] sm:$0xf]  ;;  %v546_v58 = vld [vmem:[%s814_s0 + $0x50] sm:$0xf0] }
  0x11   :  { %v419_v56 = vor.u32 %v536_v54, %v416_v55  ;;  %v545_v59 = vld [vmem:[%s814_s0 + $0x4c] sm:$0xf]  ;;  %v452_v60 = vld [vmem:[%s814_s0 + $0x54] sm:$0xf0]  ;;  %v451_v61 = vor.u32 %v546_v58, %v450_v57 }
  0x12   :  { %300 = vmatpush.bf16.msra.mxu0 %v551_v13  ;;  %570 = vmatpush.bf16.msra.mxu3 %v551_v13  ;;  %v455_v62 = vor.u32 %v545_v59, %v452_v60 }
  0x13   :  { %578 = vmatpush.bf16.msra.mxu1 %v662_v14 }
  0x14   :  { %102 = vperm.xlu2 %585, %v72_v44  }
  0x16   :  { %301 = vmatpush.bf16.msra.mxu0 %v550_v16  ;;  %571 = vmatpush.bf16.msra.mxu3 %v550_v16 }
  0x17   :  { %579 = vmatpush.bf16.msra.mxu1 %v558_v18 }
  0x18   :  { %112 = vperm.xlu1 %584, %v74_v38   ;;  %107 = vperm.xlu0 %583, %v73_v43  }
  0x1a   :  { %302 = vmatpush.bf16.msra.mxu0 %v549_v21  ;;  %572 = vmatpush.bf16.msra.mxu3 %v549_v21 }
  0x1b   :  { %580 = vmatpush.bf16.msra.mxu1 %v557_v22  ;;  %533 = vmatmul.msk.bf16.gmra.mxu2 %vm283_vm0, %v435_v23 }
  0x1e   :  { %303 = vmatpush.bf16.msra.mxu0 %v548_v25  ;;  %573 = vmatpush.bf16.msra.mxu3 %v548_v25 }
  0x1f   :  { %581 = vmatpush.bf16.msra.mxu1 %v556_v31 }
  0x21   :  { %309 = vmatmul.bf16.vlgmr.msra.gmra.mxu3 %v427_v34  ;;  %304 = vmatmul.bf16.vlgmr.msra.gmra.mxu0 %v415_v35 }
  0x22   :  { %325 = vmatpush.bf16.msrb.mxu0 %v613_v1  ;;  %338 = vmatmul.bf16.vlgmr.msra.gmra.mxu1 %v431_v36 }
  0x26   :  { %326 = vmatpush.bf16.msrb.mxu0 %v625_v4 }
  0x2a   :  { %327 = vmatpush.bf16.msrb.mxu0 %v643_v9 }
  0x2b   :  { %534 = vmatmul.msk.bf16.gmra.mxu2 %vm283_vm0, %v447_v42 }
  0x2e   :  { %328 = vmatpush.bf16.msrb.mxu0 %v653_v12 }
  0x31   :  { %314 = vmatmul.bf16.gmra.mxu3 %v439_v49 }
  0x32   :  { %329 = vmatpush.bf16.msrb.mxu0 %v662_v14  ;;  %343 = vmatmul.bf16.gmra.mxu1 %v443_v50 }
  0x36   :  { %330 = vmatpush.bf16.msrb.mxu0 %v558_v18 }
  0x3a   :  { %331 = vmatpush.bf16.msrb.mxu0 %v557_v22 }
  0x3b   :  { %535 = vmatmul.msk.bf16.gmra.mxu2 %vm283_vm0, %v459_v53 }
  0x3e   :  { %332 = vmatpush.bf16.msrb.mxu0 %v556_v31 }
  0x41   :  { %333 = vmatmul.bf16.vlgmr.msrb.gmra.mxu0 %v419_v56  ;;  %319 = vmatmul.bf16.gmra.mxu3 %v451_v61 }
  0x42   :  { %348 = vmatmul.bf16.gmra.mxu1 %v455_v62 }
  0x66   :  { %v98_v19 = vpop.permute.xlu2 %97 }
  0x6e   :  { %v103_v32 = vpop.permute.xlu2 %102 }
  0x7a   :  { %v88_v3 = vpop.permute.xlu1 %87  ;;  %v78_v16 = vpop.permute.xlu0 %77 }
  0x82   :  { %v93_v11 = vpop.permute.xlu1 %92  ;;  %v83_v28 = vpop.permute.xlu0 %82 }
  0x8a   :  { %v108_v46 = vpop.permute.xlu0 %107  ;;  %v113_v61 = vpop.permute.xlu1 %112 }
  0x8e   :  { %v363_v63 = vpop.f32.mrf.mxu2 }
  0x96   :  { %v365_v0 = vpop.f32.mrf.mxu2 }
  0x9e   :  { %v368_v1 = vpop.f32.mrf.mxu2  ;;  %v305_v8 = vpop.f32.mrf.mxu0 }
  0x9f   :  { %v339_v2 = vpop.f32.mrf.mxu1  ;;  %v306_v30 = vadd.f32 %v305_v8, %v78_v16 }
  0xa4   :  { %v310_v4 = vpop.f32.mrf.mxu3 }
  0xa5   :  { %v311_v5 = vadd.f32 %v310_v4, %v88_v3 }
  0xa6   :  { %v370_v9 = vpop.f32.mrf.mxu2  ;;  %v307_v21 = vpop.f32.mrf.mxu0 }
  0xa7   :  { %v340_v6 = vadd.f32 %v339_v2, %v311_v5  ;;  %v341_v7 = vpop.f32.mrf.mxu1  ;;  %v308_v44 = vadd.f32 %v307_v21, %v83_v28 }
  0xa9   :  { %v369_v10 = vadd.f32 %v368_v1, %v340_v6 }
  0xab   :  { %v385_v12 = vmax.f32 %v369_v10, 0.0 }
  0xac   :  { %v312_v13 = vpop.f32.mrf.mxu3 }
  0xad   :  { %v393_v14 = vpack.c.bf16 %v385_v12, %v385_v12  ;;  %v313_v15 = vadd.f32 %v312_v13, %v93_v11 }
  0xae   :  { %v373_v22 = vpop.f32.mrf.mxu2 }
  0xaf   :  { %402 = vst.msk [vmem:[%s816_s3 + $0x8] sm:$0xf] %vm399_vm1, %v393_v14  ;;  %v342_v17 = vadd.f32 %v341_v7, %v313_v15  ;;  %v344_v18 = vpop.f32.mrf.mxu1 }
  0xb1   :  { %v371_v20 = vadd.f32 %v370_v9, %v342_v17 }
  0xb3   :  { %v386_v23 = vmax.f32 %v371_v20, 0.0 }
  0xb4   :  { %v315_v24 = vpop.f32.mrf.mxu3 }
  0xb5   :  { %v394_v25 = vpack.c.bf16 %v386_v23, %v386_v23  ;;  %v316_v26 = vadd.f32 %v315_v24, %v98_v19 }
  0xb6   :  { %v375_v35 = vpop.f32.mrf.mxu2 }
  0xb7   :  { %403 = vst.msk [vmem:[%s816_s3 + $0xc] sm:$0xf] %vm399_vm1, %v394_v25  ;;  %v345_v27 = vadd.f32 %v344_v18, %v316_v26  ;;  %v346_v31 = vpop.f32.mrf.mxu1 }
  0xb9   :  { %v374_v29 = vadd.f32 %v373_v22, %v345_v27 }
  0xbb   :  { %v387_v33 = vmax.f32 %v374_v29, 0.0 }
  0xbc   :  { %v317_v37 = vpop.f32.mrf.mxu3 }
  0xbd   :  { %v395_v38 = vpack.c.bf16 %v387_v33, %v387_v33  ;;  %v318_v39 = vadd.f32 %v317_v37, %v103_v32 }
  0xbe   :  { %v334_v34 = vpop.f32.mrf.mxu0  ;;  %v378_v54 = vpop.f32.mrf.mxu2 }
  0xbf   :  { %v335_v36 = vadd.f32 %v334_v34, %v306_v30  ;;  %404 = vst.msk [vmem:[%s816_s3 + $0x10] sm:$0xf] %vm399_vm1, %v395_v38  ;;  %v347_v41 = vadd.f32 %v346_v31, %v318_v39  ;;  %v349_v49 = vpop.f32.mrf.mxu1 }
  0xc1   :  { %v364_v40 = vadd.f32 %v363_v63, %v335_v36  ;;  %v376_v43 = vadd.f32 %v375_v35, %v347_v41 }
  0xc3   :  { %v383_v42 = vmax.f32 %v364_v40, 0.0  ;;  %v388_v47 = vmax.f32 %v376_v43, 0.0 }
  0xc4   :  { %v320_v51 = vpop.f32.mrf.mxu3 }
  0xc5   :  { %v391_v45 = vpack.c.bf16 %v383_v42, %v383_v42  ;;  %v396_v52 = vpack.c.bf16 %v388_v47, %v388_v47  ;;  %v321_v53 = vadd.f32 %v320_v51, %v108_v46 }
  0xc6   :  { %v336_v48 = vpop.f32.mrf.mxu0  ;;  %v380_v3 = vpop.f32.mrf.mxu2 }
  0xc7   :  { %400 = vst.msk [vmem:[%s816_s3] sm:$0xf] %vm399_vm1, %v391_v45  ;;  %v337_v50 = vadd.f32 %v336_v48, %v308_v44  ;;  %v350_v56 = vadd.f32 %v349_v49, %v321_v53 }
  0xc8   :  { %405 = vst.msk [vmem:[%s816_s3 + $0x14] sm:$0xf] %vm399_vm1, %v396_v52 }
  0xc9   :  { %v366_v55 = vadd.f32 %v365_v0, %v337_v50  ;;  %v379_v58 = vadd.f32 %v378_v54, %v350_v56  ;;  %v351_v0 = vpop.f32.mrf.mxu1 }
  0xcb   :  { %v384_v57 = vmax.f32 %v366_v55, 0.0  ;;  %v389_v60 = vmax.f32 %v379_v58, 0.0 }
  0xcc   :  { %v322_v62 = vpop.f32.mrf.mxu3 }
  0xcd   :  { %v392_v59 = vpack.c.bf16 %v384_v57, %v384_v57  ;;  %v397_v63 = vpack.c.bf16 %v389_v60, %v389_v60  ;;  %v323_v1 = vadd.f32 %v322_v62, %v113_v61 }
  0xcf   :  { %401 = vst.msk [vmem:[%s816_s3 + $0x4] sm:$0xf] %vm399_vm1, %v392_v59  ;;  %v352_v2 = vadd.f32 %v351_v0, %v323_v1 }
  0xd0   :  { %406 = vst.msk [vmem:[%s816_s3 + $0x18] sm:$0xf] %vm399_vm1, %v397_v63 }
  0xd1   :  { %v381_v4 = vadd.f32 %v380_v3, %v352_v2 }
  0xd3   :  { %v390_v5 = vmax.f32 %v381_v4, 0.0 }
  0xd5   :  { %v398_v6 = vpack.c.bf16 %v390_v5, %v390_v5 }
  0xd7   :  { %407 = vst.msk [vmem:[%s816_s3 + $0x1c] sm:$0xf] %vm399_vm1, %v398_v6 }

// kernel: actor_forward.9
= control target key start
LH: loop header
LB: loop body
LE: loop exit
PB: predicated region body
PF: predicated region fallthrough
CT: control target
= control target key end

     0   :  { %vm489_vm0 = vcmask 523264   ;;  %vm1903_vm1 = vcmask 261120   ;;  %vm1966_vm2 = vcmask 23552   ;;  %vm2010_vm4 = vcmask 7168   ;;  %s4592_s1 = inlined_call_operand.vmem [shape: bf16[576,128], index: 1, kind: input, shape index: {}]   ;;  %s4593_s2 = inlined_call_operand.vmem [shape: f32[1,128], index: 2, kind: input, shape index: {}]   ;;  %s4594_s0 = inlined_call_operand.vmem [shape: bf16[72,576], index: 0, kind: input, shape index: {}]   ;;  %s4595_s3 = inlined_call_operand.vmem [shape: bf16[9,128,256], index: 3, kind: input, shape index: {}]   ;;  %s4596_s6 = inlined_call_operand.vmem [shape: f32[1,32], index: 6, kind: input, shape index: {}]   ;;  %s4597_s5 = inlined_call_operand.vmem [shape: f32[256,32], index: 5, kind: input, shape index: {}]   ;;  %s4598_s4 = inlined_call_operand.vmem [shape: f32[1,256], index: 4, kind: input, shape index: {}]   ;;  %s4599_s8 = inlined_call_operand.vmem [shape: f32[1,3], index: 8, kind: input, shape index: {}]   ;;  %s4600_s7 = inlined_call_operand.vmem [shape: f32[32,3], index: 7, kind: input, shape index: {}]   ;;  %s4601_s9 = inlined_call_operand.vmem [shape: f32[32,3], index: 9, kind: input, shape index: {}]   ;;  %s4602_s10 = inlined_call_operand.vmem [shape: f32[1,3], index: 10, kind: input, shape index: {}]   ;;  %s4603_s12 = inlined_call_operand.vmem [shape: f32[1,3], index: 12, kind: input, shape index: {}]   ;;  %s4604_s13 = inlined_call_operand.vmem [shape: f32[1,3], index: 13, kind: input, shape index: {}]   ;;  %s4605_s14 = inlined_call_operand.vmem [shape: f32[1,3], index: 14, kind: input, shape index: {}]   ;;  %s4606_s11 = inlined_call_operand.vmem [shape: f32[8,3], index: 11, kind: input, shape index: {}]   ;;  %s4607_s15 = inlined_call_operand.vmem [shape: f32[8,3], index: 15, kind: output, shape index: {0}]   ;;  %s4608_s16 = inlined_call_operand.vmem [shape: f32[8,1], index: 16, kind: output, shape index: {1}]  }
   0x1   :  { %4610 = sst [smem:[#allocation2_spill]] %s4592_s1  ;;  %v2022_v32 = vld [vmem:[%s4594_s0] sm:$0xf]  ;;  %v2958_v33 = vld [vmem:[%s4594_s0 + $0x10] sm:$0xf0] }
   0x2   :  { %s4611_s23 = sld [smem:[#allocation2_spill]]  ;;  %v2030_v34 = vld [vmem:[%s4594_s0 + $0x8] sm:$0xf]  ;;  %v2959_v35 = vld [vmem:[%s4594_s0 + $0x18] sm:$0xf0]  ;;  %v2023_v41 = vor.u32 %v2958_v33, %v2022_v32 }
   0x3   :  { %v2956_v36 = vld [vmem:[%s4594_s0 + $0x4] sm:$0xf]  ;;  %v2024_v37 = vld [vmem:[%s4594_s0 + $0x14] sm:$0xf0]  ;;  %v2957_v38 = vld [vmem:[%s4594_s0 + $0xc] sm:$0xf]  ;;  %v2031_v42 = vor.u32 %v2959_v35, %v2030_v34 }
   0x4   :  { %v2032_v39 = vld [vmem:[%s4594_s0 + $0x1c] sm:$0xf0]  ;;  %v2027_v43 = vor.u32 %v2956_v36, %v2024_v37  ;;  %v2042_v46 = vld [vmem:[%s4594_s0 + $0x28] sm:$0xf]  ;;  %v2963_v47 = vld [vmem:[%s4594_s0 + $0x38] sm:$0xf0] }
   0x5   :  { %v2035_v44 = vor.u32 %v2957_v38, %v2032_v39  ;;  %v2050_v48 = vld [vmem:[%s4594_s0 + $0x30] sm:$0xf]  ;;  %v2964_v49 = vld [vmem:[%s4594_s0 + $0x40] sm:$0xf0]  ;;  %v2961_v50 = vld [vmem:[%s4594_s0 + $0x2c] sm:$0xf]  ;;  %v2043_v54 = vor.u32 %v2963_v47, %v2042_v46 }
   0x6   :  { %v2044_v51 = vld [vmem:[%s4594_s0 + $0x3c] sm:$0xf0]  ;;  %v2962_v52 = vld [vmem:[%s4594_s0 + $0x34] sm:$0xf]  ;;  %v2052_v53 = vld [vmem:[%s4594_s0 + $0x44] sm:$0xf0]  ;;  %v2051_v55 = vor.u32 %v2964_v49, %v2050_v48 }
   0x7   :  { %v2047_v56 = vor.u32 %v2961_v50, %v2044_v51  ;;  %v2055_v57 = vor.u32 %v2962_v52, %v2052_v53  ;;  %v2062_v58 = vld [vmem:[%s4594_s0 + $0x50] sm:$0xf]  ;;  %v2968_v59 = vld [vmem:[%s4594_s0 + $0x60] sm:$0xf0]  ;;  %v2070_v60 = vld [vmem:[%s4594_s0 + $0x58] sm:$0xf] }
   0x8   :  { %v2983_v0 = vld [vmem:[%s4611_s23 + $0x38] sm:$0xff]  ;;  %v2982_v4 = vld [vmem:[%s4611_s23 + $0x30] sm:$0xff]  ;;  %v2981_v8 = vld [vmem:[%s4611_s23 + $0x28] sm:$0xff] }
   0x9   :  { %v2999_v1 = vld [vmem:[%s4611_s23 + $0xb8] sm:$0xff]  ;;  %505 = vmatpush.bf16.msra.mxu0 %v2983_v0  ;;  %v2998_v5 = vld [vmem:[%s4611_s23 + $0xb0] sm:$0xff]  ;;  %v2997_v9 = vld [vmem:[%s4611_s23 + $0xa8] sm:$0xff] }
   0xa   :  { %v2991_v2 = vld [vmem:[%s4611_s23 + $0x78] sm:$0xff]  ;;  %571 = vmatpush.bf16.msra.mxu2 %v2999_v1  ;;  %v2990_v6 = vld [vmem:[%s4611_s23 + $0x70] sm:$0xff]  ;;  %v2989_v10 = vld [vmem:[%s4611_s23 + $0x68] sm:$0xff] }
   0xb   :  { %v3007_v3 = vld [vmem:[%s4611_s23 + $0xf8] sm:$0xff]  ;;  %538 = vmatpush.bf16.msra.mxu1 %v2991_v2  ;;  %v3006_v7 = vld [vmem:[%s4611_s23 + $0xf0] sm:$0xff]  ;;  %v3005_v11 = vld [vmem:[%s4611_s23 + $0xe8] sm:$0xff]  ;;  %v2063_v2 = vor.u32 %v2968_v59, %v2062_v58 }
   0xc   :  { %604 = vmatpush.bf16.msra.mxu3 %v3007_v3  ;;  %v2980_v12 = vld [vmem:[%s4611_s23 + $0x20] sm:$0xff]  ;;  %v2979_v16 = vld [vmem:[%s4611_s23 + $0x18] sm:$0xff]  ;;  %v2978_v20 = vld [vmem:[%s4611_s23 + $0x10] sm:$0xff] }
   0xd   :  { %506 = vmatpush.bf16.msra.mxu0 %v2982_v4  ;;  %v2996_v13 = vld [vmem:[%s4611_s23 + $0xa0] sm:$0xff]  ;;  %v2995_v17 = vld [vmem:[%s4611_s23 + $0x98] sm:$0xff]  ;;  %v2994_v21 = vld [vmem:[%s4611_s23 + $0x90] sm:$0xff] }
   0xe   :  { %572 = vmatpush.bf16.msra.mxu2 %v2998_v5  ;;  %v2988_v14 = vld [vmem:[%s4611_s23 + $0x60] sm:$0xff]  ;;  %v2987_v18 = vld [vmem:[%s4611_s23 + $0x58] sm:$0xff]  ;;  %v2986_v22 = vld [vmem:[%s4611_s23 + $0x50] sm:$0xff] }
   0xf   :  { %539 = vmatpush.bf16.msra.mxu1 %v2990_v6  ;;  %v3004_v15 = vld [vmem:[%s4611_s23 + $0xe0] sm:$0xff]  ;;  %v3003_v19 = vld [vmem:[%s4611_s23 + $0xd8] sm:$0xff]  ;;  %v3002_v23 = vld [vmem:[%s4611_s23 + $0xd0] sm:$0xff] }
  0x10   :  { %605 = vmatpush.bf16.msra.mxu3 %v3006_v7  ;;  %v2977_v24 = vld [vmem:[%s4611_s23 + $0x8] sm:$0xff]  ;;  %v2976_v28 = vld [vmem:[%s4611_s23] sm:$0xff]  ;;  %v3011_v40 = vld [vmem:[%s4611_s23 + $0x118] sm:$0xff] }
  0x11   :  { %507 = vmatpush.bf16.msra.mxu0 %v2981_v8  ;;  %v2993_v25 = vld [vmem:[%s4611_s23 + $0x88] sm:$0xff]  ;;  %v2992_v29 = vld [vmem:[%s4611_s23 + $0x80] sm:$0xff]  ;;  %v3010_v45 = vld [vmem:[%s4611_s23 + $0x110] sm:$0xff] }
  0x12   :  { %573 = vmatpush.bf16.msra.mxu2 %v2997_v9  ;;  %v2985_v26 = vld [vmem:[%s4611_s23 + $0x48] sm:$0xff]  ;;  %v2984_v30 = vld [vmem:[%s4611_s23 + $0x40] sm:$0xff]  ;;  %v2966_v62 = vld [vmem:[%s4594_s0 + $0x54] sm:$0xf] }
  0x13   :  { %540 = vmatpush.bf16.msra.mxu1 %v2989_v10  ;;  %v3001_v27 = vld [vmem:[%s4611_s23 + $0xc8] sm:$0xff]  ;;  %v3000_v31 = vld [vmem:[%s4611_s23 + $0xc0] sm:$0xff]  ;;  %v2967_v0 = vld [vmem:[%s4594_s0 + $0x5c] sm:$0xf] }
  0x14   :  { %606 = vmatpush.bf16.msra.mxu3 %v3005_v11  ;;  %v2969_v61 = vld [vmem:[%s4594_s0 + $0x68] sm:$0xf0]  ;;  %v2064_v63 = vld [vmem:[%s4594_s0 + $0x64] sm:$0xf0]  ;;  %v2072_v1 = vld [vmem:[%s4594_s0 + $0x6c] sm:$0xf0] }
  0x15   :  { %508 = vmatpush.bf16.msra.mxu0 %v2980_v12  ;;  %v2071_v3 = vor.u32 %v2969_v61, %v2070_v60  ;;  %v2067_v4 = vor.u32 %v2966_v62, %v2064_v63  ;;  %v2075_v5 = vor.u32 %v2967_v0, %v2072_v1  ;;  %v3009_v6 = vld [vmem:[%s4611_s23 + $0x108] sm:$0xff]  ;;  %v3008_v7 = vld [vmem:[%s4611_s23 + $0x100] sm:$0xff]  ;;  %v2082_v8 = vld [vmem:[%s4594_s0 + $0x78] sm:$0xf] }
  0x16   :  { %574 = vmatpush.bf16.msra.mxu2 %v2996_v13  ;;  %v2973_v9 = vld [vmem:[%s4594_s0 + $0x88] sm:$0xf0]  ;;  %v2090_v10 = vld [vmem:[%s4594_s0 + $0x80] sm:$0xf]  ;;  %v2974_v11 = vld [vmem:[%s4594_s0 + $0x90] sm:$0xf0] }
  0x17   :  { %541 = vmatpush.bf16.msra.mxu1 %v2988_v14  ;;  %v2971_v12 = vld [vmem:[%s4594_s0 + $0x7c] sm:$0xf]  ;;  %v2084_v13 = vld [vmem:[%s4594_s0 + $0x8c] sm:$0xf0]  ;;  %v2972_v14 = vld [vmem:[%s4594_s0 + $0x84] sm:$0xf] }
  0x18   :  { %607 = vmatpush.bf16.msra.mxu3 %v3004_v15  ;;  %v2092_v15 = vld [vmem:[%s4594_s0 + $0x94] sm:$0xf0]  ;;  %v2965_v34 = vld [vmem:[%s4594_s0 + $0x48] sm:$0xf0]  ;;  %v2078_v36 = vld [vmem:[%s4594_s0 + $0x60] sm:$0xf] }
  0x19   :  { %509 = vmatpush.bf16.msra.mxu0 %v2979_v16  ;;  %v2083_v16 = vor.u32 %v2973_v9, %v2082_v8  ;;  %v2058_v33 = vld [vmem:[%s4594_s0 + $0x38] sm:$0xf]  ;;  %v2970_v37 = vld [vmem:[%s4594_s0 + $0x70] sm:$0xf0]  ;;  %v2387_v39 = vld [vmem:[%s4595_s3 + $0x70] sm:$0xf] }
  0x1a   :  { %575 = vmatpush.bf16.msra.mxu2 %v2995_v17  ;;  %v2091_v17 = vor.u32 %v2974_v11, %v2090_v10  ;;  %v2059_v35 = vor.u32 %v2965_v34, %v2058_v33  ;;  %v2079_v38 = vor.u32 %v2970_v37, %v2078_v36  ;;  %v3025_v46 = vld [vmem:[%s4595_s3 + $0x64] sm:$0xf0]  ;;  %v2323_v52 = vld [vmem:[%s4595_s3 + $0xf0] sm:$0xf]  ;;  %v3043_v53 = vld [vmem:[%s4595_s3 + $0xf4] sm:$0xf0] }
  0x1b   :  { %542 = vmatpush.bf16.msra.mxu1 %v2987_v18  ;;  %v2087_v18 = vor.u32 %v2971_v12, %v2084_v13  ;;  %v2371_v58 = vld [vmem:[%s4595_s3 + $0x50] sm:$0xf]  ;;  %v3023_v59 = vld [vmem:[%s4595_s3 + $0x54] sm:$0xf0]  ;;  %v2315_v63 = vld [vmem:[%s4595_s3 + $0xe0] sm:$0xf] }
  0x1c   :  { %608 = vmatpush.bf16.msra.mxu3 %v3003_v19  ;;  %v2095_v19 = vor.u32 %v2972_v14, %v2092_v15  ;;  %v2372_v61 = vor.u32 %v3023_v59, %v2371_v58  ;;  %v3041_v0 = vld [vmem:[%s4595_s3 + $0xe4] sm:$0xf0]  ;;  %v3040_v1 = vld [vmem:[%s4595_s3 + $0xe4] sm:$0xf]  ;;  %v79_v9 = vld [vmem:[%s4594_s0 + $0xb0] sm:$0xf] }
  0x1d   :  { %510 = vmatpush.bf16.msra.mxu0 %v2978_v20  ;;  %v77_v20 = vld [vmem:[%s4594_s0 + $0xa0] sm:$0xff]  ;;  %v2307_v15 = vld [vmem:[%s4595_s3 + $0xd0] sm:$0xf]  ;;  %v2301_v34 = vld [vmem:[%s4595_s3 + $0xc8] sm:$0xf0] }
  0x1e   :  { %576 = vmatpush.bf16.msra.mxu2 %v2994_v21  ;;  %v78_v21 = vld [vmem:[%s4594_s0 + $0xa8] sm:$0xff] }
  0x1f   :  { %543 = vmatpush.bf16.msra.mxu1 %v2986_v22  ;;  %v223_v22 = vunpack.c.l.b16 %v77_v20  ;;  %v3017_v36 = vld [vmem:[%s4595_s3 + $0x24] sm:$0xf0] }
  0x20   :  { %609 = vmatpush.bf16.msra.mxu3 %v3002_v23  ;;  %v225_v23 = vunpack.c.l.b16 %v78_v21 }
  0x21   :  { %511 = vmatpush.bf16.msra.mxu0 %v2977_v24  ;;  %v224_v24 = vunpack.c.h.b16 %v77_v20  ;;  %v2309_v20 = vld [vmem:[%s4595_s3 + $0xd8] sm:$0xf0] }
  0x22   :  { %577 = vmatpush.bf16.msra.mxu2 %v2993_v25  ;;  %v226_v25 = vunpack.c.h.b16 %v78_v21  ;;  %v2355_v21 = vld [vmem:[%s4595_s3 + $0x30] sm:$0xf] }
  0x23   :  { %544 = vmatpush.bf16.msra.mxu1 %v2985_v26  ;;  %v248_v26 = vpack.c.b16 %v223_v22, %v223_v22  ;;  %v3019_v22 = vld [vmem:[%s4595_s3 + $0x34] sm:$0xf0] }
  0x24   :  { %610 = vmatpush.bf16.msra.mxu3 %v3001_v27  ;;  %v250_v27 = vpack.c.b16 %v225_v23, %v225_v23 }
  0x25   :  { %512 = vmatpush.bf16.msra.mxu0 %v2976_v28  ;;  %v249_v28 = vpack.c.b16 %v224_v24, %v224_v24  ;;  %v2356_v24 = vor.u32 %v3019_v22, %v2355_v21  ;;  %v2629_v21 = vld [vmem:[%s4595_s3 + $0x278] sm:$0xf0] }
  0x26   :  { %578 = vmatpush.bf16.msra.mxu2 %v2992_v29  ;;  %v251_v29 = vpack.c.b16 %v226_v25, %v226_v25 }
  0x27   :  { %545 = vmatpush.bf16.msra.mxu1 %v2984_v30  ;;  %v2038_v30 = vld [vmem:[%s4594_s0 + $0x10] sm:$0xf] }
  0x28   :  { %611 = vmatpush.bf16.msra.mxu3 %v3000_v31  ;;  %513 = vmatmul.bf16.vlgmr.msra.gmra.mxu0 %v2023_v41  ;;  %v2960_v31 = vld [vmem:[%s4594_s0 + $0x20] sm:$0xf0] }
  0x29   :  { %641 = vmatpush.bf16.msrb.mxu0 %v3011_v40  ;;  %579 = vmatmul.bf16.vlgmr.msra.gmra.mxu2 %v2031_v42  ;;  %v2039_v32 = vor.u32 %v2960_v31, %v2038_v30  ;;  %v3027_v40 = vld [vmem:[%s4595_s3 + $0x74] sm:$0xf0]  ;;  %v2098_v42 = vld [vmem:[%s4594_s0 + $0x88] sm:$0xf] }
  0x2a   :  { %546 = vmatmul.bf16.vlgmr.msra.gmra.mxu1 %v2027_v43  ;;  %v2388_v41 = vor.u32 %v3027_v40, %v2387_v39  ;;  %v2975_v43 = vld [vmem:[%s4594_s0 + $0x98] sm:$0xf0] }
  0x2b   :  { %612 = vmatmul.bf16.vlgmr.msra.gmra.mxu3 %v2035_v44  ;;  %v3502_v44 = vld [vmem:[%s4593_s2] ss:$0 sm:$0xff]  ;;  %v2099_v47 = vor.u32 %v2975_v43, %v2098_v42  ;;  %v2291_v43 = vld [vmem:[%s4595_s3 + $0xb0] sm:$0xf] }
  0x2c   :  { %907 = vmatpush.bf16.msrb.mxu3 %v2388_v41 }
  0x2d   :  { %642 = vmatpush.bf16.msrb.mxu0 %v3010_v45  ;;  %v2379_v45 = vld [vmem:[%s4595_s3 + $0x60] sm:$0xf] }
  0x2e   :  { %v2380_v48 = vor.u32 %v3025_v46, %v2379_v45  ;;  %v3035_v45 = vld [vmem:[%s4595_s3 + $0xb4] sm:$0xf0]  ;;  %v3034_v46 = vld [vmem:[%s4595_s3 + $0xb4] sm:$0xf] }
  0x30   :  { %908 = vmatpush.bf16.msrb.mxu3 %v2380_v48  ;;  %v2292_v48 = vor.u32 %v3035_v45, %v2291_v43  ;;  %v2453_v45 = vld [vmem:[%s4595_s3 + $0x158] sm:$0xf0] }
  0x31   :  { %643 = vmatpush.bf16.msrb.mxu0 %v3009_v6  ;;  %v2363_v6 = vld [vmem:[%s4595_s3 + $0x40] sm:$0xf] }
  0x34   :  { %909 = vmatpush.bf16.msrb.mxu3 %v2372_v61  ;;  %v2285_v61 = vld [vmem:[%s4595_s3 + $0xa8] sm:$0xf0] }
  0x35   :  { %644 = vmatpush.bf16.msrb.mxu0 %v3008_v7  ;;  %v3021_v7 = vld [vmem:[%s4595_s3 + $0x44] sm:$0xf0] }
  0x36   :  { %v2364_v11 = vor.u32 %v3021_v7, %v2363_v6 }
  0x38   :  { %518 = vmatmul.bf16.gmra.mxu0 %v2043_v54  ;;  %v3042_v54 = vld [vmem:[%s4595_s3 + $0xf4] sm:$0xf]  ;;  %910 = vmatpush.bf16.msrb.mxu3 %v2364_v11 }
  0x39   :  { %584 = vmatmul.bf16.gmra.mxu2 %v2051_v55  ;;  %v3030_v11 = vld [vmem:[%s4595_s3 + $0x94] sm:$0xf] }
  0x3a   :  { %551 = vmatmul.bf16.gmra.mxu1 %v2047_v56  ;;  %v2324_v56 = vor.u32 %v3043_v53, %v2323_v52 }
  0x3b   :  { %617 = vmatmul.bf16.gmra.mxu3 %v2055_v57  ;;  %v2325_v57 = vld [vmem:[%s4595_s3 + $0xf8] sm:$0xf0] }
  0x3c   :  { %v2328_v60 = vor.u32 %v3042_v54, %v2325_v57  ;;  %801 = vmatpush.bf16.msrb.mxu1 %v2324_v56  ;;  %911 = vmatpush.bf16.msrb.mxu3 %v2356_v24  ;;  %v3033_v56 = vld [vmem:[%s4595_s3 + $0xa4] sm:$0xf0]  ;;  %v3032_v57 = vld [vmem:[%s4595_s3 + $0xa4] sm:$0xf]  ;;  %v2267_v24 = vld [vmem:[%s4595_s3 + $0x80] sm:$0xf] }
  0x3e   :  { %814 = vmatpush.bf16.msrb.mxu2 %v2328_v60 }
  0x48   :  { %523 = vmatmul.bf16.gmra.mxu0 %v2063_v2 }
  0x49   :  { %589 = vmatmul.bf16.gmra.mxu2 %v2071_v3 }
  0x4a   :  { %556 = vmatmul.bf16.gmra.mxu1 %v2067_v4  ;;  %v2316_v4 = vor.u32 %v3041_v0, %v2315_v63  ;;  %v3013_v63 = vld [vmem:[%s4595_s3 + $0x4] sm:$0xf0] }
  0x4b   :  { %622 = vmatmul.bf16.gmra.mxu3 %v2075_v5  ;;  %v2317_v5 = vld [vmem:[%s4595_s3 + $0xe8] sm:$0xf0] }
  0x4c   :  { %v2320_v10 = vor.u32 %v3040_v1, %v2317_v5  ;;  %802 = vmatpush.bf16.msrb.mxu1 %v2316_v4  ;;  %v2288_v1 = vor.u32 %v3032_v57, %v2285_v61  ;;  %v2469_v4 = vld [vmem:[%s4595_s3 + $0x178] sm:$0xf0]  ;;  %v2445_v57 = vld [vmem:[%s4595_s3 + $0x148] sm:$0xf0] }
  0x4d   :  { %v2613_v61 = vld [vmem:[%s4595_s3 + $0x258] sm:$0xf0] }
  0x4e   :  { %815 = vmatpush.bf16.msrb.mxu2 %v2320_v10  ;;  %v3031_v10 = vld [vmem:[%s4595_s3 + $0x94] sm:$0xf0] }
  0x58   :  { %528 = vmatmul.bf16.gmra.mxu0 %v2083_v16  ;;  %v3039_v16 = vld [vmem:[%s4595_s3 + $0xd4] sm:$0xf0] }
  0x59   :  { %594 = vmatmul.bf16.gmra.mxu2 %v2091_v17  ;;  %v3038_v17 = vld [vmem:[%s4595_s3 + $0xd4] sm:$0xf] }
  0x5a   :  { %561 = vmatmul.bf16.gmra.mxu1 %v2087_v18  ;;  %v227_v18 = vunpack.c.l.b16 %v79_v9  ;;  %v2312_v23 = vor.u32 %v3038_v17, %v2309_v20  ;;  %v2275_v9 = vld [vmem:[%s4595_s3 + $0x90] sm:$0xf]  ;;  %v2461_v17 = vld [vmem:[%s4595_s3 + $0x168] sm:$0xf0]  ;;  %v3090_v20 = vld [vmem:[%s4595_s3 + $0x274] sm:$0xf] }
  0x5b   :  { %627 = vmatmul.bf16.gmra.mxu3 %v2095_v19  ;;  %v2308_v19 = vor.u32 %v3039_v16, %v2307_v15  ;;  %v2277_v15 = vld [vmem:[%s4595_s3 + $0x98] sm:$0xf0]  ;;  %v3056_v16 = vld [vmem:[%s4595_s3 + $0x164] sm:$0xf]  ;;  %v2632_v22 = vor.u32 %v3090_v20, %v2629_v21  ;;  %v2365_v21 = vld [vmem:[%s4595_s3 + $0x48] sm:$0xf0] }
  0x5c   :  { %816 = vmatpush.bf16.msrb.mxu2 %v2312_v23 }
  0x5d   :  { %803 = vmatpush.bf16.msrb.mxu1 %v2308_v19  ;;  %v2464_v19 = vor.u32 %v3056_v16, %v2461_v17  ;;  %1293 = vmatpush.bf16.msra.mxu0 %v2632_v22  ;;  %v3084_v17 = vld [vmem:[%s4595_s3 + $0x244] sm:$0xf]  ;;  %v2443_v22 = vld [vmem:[%s4595_s3 + $0x140] sm:$0xf] }
  0x68   :  { %533 = vmatmul.bf16.gmra.mxu0 %v248_v26 }
  0x69   :  { %599 = vmatmul.bf16.gmra.mxu2 %v250_v27  ;;  %v2299_v27 = vld [vmem:[%s4595_s3 + $0xc0] sm:$0xf] }
  0x6a   :  { %566 = vmatmul.bf16.gmra.mxu1 %v249_v28  ;;  %v3037_v28 = vld [vmem:[%s4595_s3 + $0xc4] sm:$0xf0] }
  0x6b   :  { %632 = vmatmul.bf16.gmra.mxu3 %v251_v29  ;;  %v3036_v29 = vld [vmem:[%s4595_s3 + $0xc4] sm:$0xf]  ;;  %v2300_v33 = vor.u32 %v3037_v28, %v2299_v27 }
  0x6d   :  { %804 = vmatpush.bf16.msrb.mxu1 %v2300_v33 }
  0x71   :  { %805 = vmatpush.bf16.msrb.mxu1 %v2292_v48 }
  0x78   :  { %2244 = vmatmul.msk.bf16.vlgmr.msrb.gmra.mxu0 %vm489_vm0, %v2039_v32  ;;  %v252_v32 = vpack.c.b16 %v227_v18, %v227_v18  ;;  %v2280_v18 = vor.u32 %v3030_v11, %v2277_v15 }
  0x88   :  { %2245 = vmatmul.msk.bf16.gmra.mxu0 %vm489_vm0, %v2059_v35  ;;  %v2347_v35 = vld [vmem:[%s4595_s3 + $0x20] sm:$0xf] }
  0x89   :  { %v2348_v39 = vor.u32 %v3017_v36, %v2347_v35  ;;  %v2467_v36 = vld [vmem:[%s4595_s3 + $0x170] sm:$0xf] }
  0x8b   :  { %912 = vmatpush.bf16.msrb.mxu3 %v2348_v39 }
  0x98   :  { %2246 = vmatmul.msk.bf16.gmra.mxu0 %vm489_vm0, %v2079_v38  ;;  %v2304_v38 = vor.u32 %v3036_v29, %v2301_v34 }
  0x9a   :  { %817 = vmatpush.bf16.msrb.mxu2 %v2304_v38  ;;  %v3054_v38 = vld [vmem:[%s4595_s3 + $0x154] sm:$0xf] }
  0x9b   :  { %v2456_v48 = vor.u32 %v3054_v38, %v2453_v45  ;;  %v2435_v38 = vld [vmem:[%s4595_s3 + $0x130] sm:$0xf]  ;;  %v3046_v45 = vld [vmem:[%s4595_s3 + $0x114] sm:$0xf] }
  0xa5   :  { %v514_v49 = vpop.f32.mrf.mxu0 }
  0xa6   :  { %v515_v50 = vadd.f32 %v3502_v44, %v514_v49  ;;  %v2293_v49 = vld [vmem:[%s4595_s3 + $0xb8] sm:$0xf0] }
  0xa7   :  { %v547_v51 = vpop.f32.mrf.mxu1  ;;  %v2296_v52 = vor.u32 %v3034_v46, %v2293_v49  ;;  %v3088_v46 = vld [vmem:[%s4595_s3 + $0x264] sm:$0xf] }
  0xa8   :  { %v548_v55 = vadd.f32 %v547_v51, %v515_v50  ;;  %2247 = vmatmul.msk.bf16.gmra.mxu0 %vm489_vm0, %v2099_v47  ;;  %v2339_v50 = vld [vmem:[%s4595_s3 + $0x10] sm:$0xf]  ;;  %v3015_v51 = vld [vmem:[%s4595_s3 + $0x14] sm:$0xf0] }
  0xa9   :  { %v2340_v53 = vor.u32 %v3015_v51, %v2339_v50  ;;  %818 = vmatpush.bf16.msrb.mxu2 %v2296_v52  ;;  %v3024_v51 = vld [vmem:[%s4595_s3 + $0x64] sm:$0xf]  ;;  %v2381_v52 = vld [vmem:[%s4595_s3 + $0x68] sm:$0xf0] }
  0xab   :  { %913 = vmatpush.bf16.msrb.mxu3 %v2340_v53  ;;  %v2459_v53 = vld [vmem:[%s4595_s3 + $0x160] sm:$0xf] }
  0xac   :  { %v580_v62 = vpop.f32.mrf.mxu2 }
  0xad   :  { %v581_v2 = vadd.f32 %v580_v62, %v548_v55  ;;  %v516_v8 = vpop.f32.mrf.mxu0  ;;  %v2283_v55 = vld [vmem:[%s4595_s3 + $0xa0] sm:$0xf]  ;;  %819 = vmatpush.bf16.msrb.mxu2 %v2288_v1 }
  0xae   :  { %v613_v3 = vpop.f32.mrf.mxu3  ;;  %v517_v12 = vadd.f32 %v3502_v44, %v516_v8  ;;  %v2284_v60 = vor.u32 %v3033_v56, %v2283_v55  ;;  %v2331_v62 = vld [vmem:[%s4595_s3] sm:$0xf]  ;;  %v3057_v55 = vld [vmem:[%s4595_s3 + $0x164] sm:$0xf0]  ;;  %v3052_v56 = vld [vmem:[%s4595_s3 + $0x144] sm:$0xf] }
  0xaf   :  { %v3552_v13 = vadd.f32 %v613_v3, %v581_v2  ;;  %v549_v14 = vpop.f32.mrf.mxu1  ;;  %v2332_v2 = vor.u32 %v3013_v63, %v2331_v62  ;;  %v3058_v3 = vld [vmem:[%s4595_s3 + $0x174] sm:$0xf] }
  0xb0   :  { %v550_v25 = vadd.f32 %v549_v14, %v517_v12  ;;  %806 = vmatpush.bf16.msrb.mxu1 %v2284_v60  ;;  %v2472_v8 = vor.u32 %v3058_v3, %v2469_v4  ;;  %v2276_v14 = vor.u32 %v3031_v10, %v2275_v9  ;;  %v3086_v60 = vld [vmem:[%s4595_s3 + $0x254] sm:$0xf]  ;;  %v2373_v3 = vld [vmem:[%s4595_s3 + $0x58] sm:$0xf0]  ;;  %v2451_v4 = vld [vmem:[%s4595_s3 + $0x150] sm:$0xf] }
  0xb1   :  { %914 = vmatpush.bf16.msrb.mxu3 %v2332_v2  ;;  %820 = vmatpush.bf16.msrb.mxu2 %v2280_v18  ;;  %v2616_v63 = vor.u32 %v3086_v60, %v2613_v61  ;;  %v3022_v2 = vld [vmem:[%s4595_s3 + $0x54] sm:$0xf]  ;;  %v2437_v10 = vld [vmem:[%s4595_s3 + $0x138] sm:$0xf0]  ;;  %v2605_v18 = vld [vmem:[%s4595_s3 + $0x248] sm:$0xf0] }
  0xb2   :  { %v3050_v9 = vld [vmem:[%s4595_s3 + $0x134] sm:$0xf]  ;;  %v2608_v20 = vor.u32 %v3084_v17, %v2605_v18  ;;  %v3049_v60 = vld [vmem:[%s4595_s3 + $0x124] sm:$0xf0]  ;;  %v3044_v61 = vld [vmem:[%s4595_s3 + $0x104] sm:$0xf] }
  0xb3   :  { %v2440_v16 = vor.u32 %v3050_v9, %v2437_v10  ;;  %v3014_v9 = vld [vmem:[%s4595_s3 + $0x14] sm:$0xf]  ;;  %v2341_v10 = vld [vmem:[%s4595_s3 + $0x18] sm:$0xf0]  ;;  %v3047_v18 = vld [vmem:[%s4595_s3 + $0x114] sm:$0xf0] }
  0xb4   :  { %v582_v26 = vpop.f32.mrf.mxu2  ;;  %807 = vmatpush.bf16.msrb.mxu1 %v2276_v14  ;;  %v2344_v17 = vor.u32 %v3014_v9, %v2341_v10  ;;  %v3110_v10 = vld [vmem:[%s4595_s3 + $0x314] sm:$0xf] }
  0xb5   :  { %v583_v30 = vadd.f32 %v582_v26, %v550_v25  ;;  %v519_v37 = vpop.f32.mrf.mxu0  ;;  %1043 = vmatpush.bf16.msra.mxu3 %v2472_v8  ;;  %v3029_v25 = vld [vmem:[%s4595_s3 + $0x84] sm:$0xf0]  ;;  %v3028_v26 = vld [vmem:[%s4595_s3 + $0x84] sm:$0xf]  ;;  %v3055_v8 = vld [vmem:[%s4595_s3 + $0x154] sm:$0xf0] }
  0xb6   :  { %v615_v31 = vpop.f32.mrf.mxu3  ;;  %v520_v40 = vadd.f32 %v3502_v44, %v519_v37  ;;  %v2268_v29 = vor.u32 %v3029_v25, %v2267_v24  ;;  %v3059_v37 = vld [vmem:[%s4595_s3 + $0x174] sm:$0xf0]  ;;  %v2452_v15 = vor.u32 %v3055_v8, %v2451_v4 }
  0xb7   :  { %v3591_v41 = vadd.f32 %v615_v31, %v583_v30  ;;  %v552_v42 = vpop.f32.mrf.mxu1  ;;  %v2269_v30 = vld [vmem:[%s4595_s3 + $0x88] sm:$0xf0]  ;;  %v3026_v31 = vld [vmem:[%s4595_s3 + $0x74] sm:$0xf]  ;;  %v2468_v43 = vor.u32 %v3059_v37, %v2467_v36  ;;  %v2357_v37 = vld [vmem:[%s4595_s3 + $0x38] sm:$0xf0] }
  0xb8   :  { %v553_v47 = vadd.f32 %v552_v42, %v520_v40  ;;  %2248 = vmatmul.msk.bf16.gmra.mxu0 %vm489_vm0, %v252_v32  ;;  %v2389_v32 = vld [vmem:[%s4595_s3 + $0x78] sm:$0xf0]  ;;  %v2272_v34 = vor.u32 %v3028_v26, %v2269_v30  ;;  %808 = vmatpush.bf16.msrb.mxu1 %v2268_v29  ;;  %v3082_v29 = vld [vmem:[%s4595_s3 + $0x234] sm:$0xf] }
  0xb9   :  { %1044 = vmatpush.bf16.msra.mxu3 %v2464_v19  ;;  %v2392_v35 = vor.u32 %v3026_v31, %v2389_v32  ;;  %v3020_v19 = vld [vmem:[%s4595_s3 + $0x44] sm:$0xf]  ;;  %v2597_v31 = vld [vmem:[%s4595_s3 + $0x238] sm:$0xf0]  ;;  %v3018_v36 = vld [vmem:[%s4595_s3 + $0x34] sm:$0xf] }
  0xba   :  { %821 = vmatpush.bf16.msrb.mxu2 %v2272_v34  ;;  %v2368_v25 = vor.u32 %v3020_v19, %v2365_v21  ;;  %v2600_v32 = vor.u32 %v3082_v29, %v2597_v31  ;;  %v3076_v19 = vld [vmem:[%s4595_s3 + $0x204] sm:$0xf]  ;;  %v2411_v29 = vld [vmem:[%s4595_s3 + $0x100] sm:$0xf]  ;;  %v3045_v31 = vld [vmem:[%s4595_s3 + $0x104] sm:$0xf0] }
  0xbc   :  { %v585_v54 = vpop.f32.mrf.mxu2  ;;  %920 = vmatpush.bf16.msra.mxu1 %v2392_v35 }
  0xbd   :  { %v586_v58 = vadd.f32 %v585_v54, %v553_v47  ;;  %v521_v0 = vpop.f32.mrf.mxu0  ;;  %v2621_v47 = vld [vmem:[%s4595_s3 + $0x268] sm:$0xf0]  ;;  %1045 = vmatpush.bf16.msra.mxu3 %v2456_v48  ;;  %v2384_v54 = vor.u32 %v3024_v51, %v2381_v52  ;;  %v3080_v52 = vld [vmem:[%s4595_s3 + $0x224] sm:$0xf] }
  0xbe   :  { %v618_v59 = vpop.f32.mrf.mxu3  ;;  %v522_v5 = vadd.f32 %v3502_v44, %v521_v0  ;;  %v2624_v49 = vor.u32 %v3088_v46, %v2621_v47  ;;  %1030 = vmatpush.bf16.msra.mxu2 %v2468_v43  ;;  %v3051_v43 = vld [vmem:[%s4595_s3 + $0x134] sm:$0xf0]  ;;  %v2421_v46 = vld [vmem:[%s4595_s3 + $0x118] sm:$0xf0] }
  0xbf   :  { %v3637_v6 = vadd.f32 %v618_v59, %v586_v58  ;;  %v554_v7 = vpop.f32.mrf.mxu1  ;;  %v2460_v58 = vor.u32 %v3057_v55, %v2459_v53  ;;  %v2448_v59 = vor.u32 %v3052_v56, %v2445_v57  ;;  %v2424_v51 = vor.u32 %v3046_v45, %v2421_v46  ;;  %v2589_v53 = vld [vmem:[%s4595_s3 + $0x228] sm:$0xf0]  ;;  %v3016_v56 = vld [vmem:[%s4595_s3 + $0x24] sm:$0xf] }
  0xc0   :  { %v555_v12 = vadd.f32 %v554_v7, %v522_v5  ;;  %1294 = vmatpush.bf16.msra.mxu0 %v2624_v49  ;;  %921 = vmatpush.bf16.msra.mxu1 %v2384_v54  ;;  %v2376_v7 = vor.u32 %v3022_v2, %v2373_v3  ;;  %v2592_v54 = vor.u32 %v3080_v52, %v2589_v53  ;;  %v2349_v57 = vld [vmem:[%s4595_s3 + $0x28] sm:$0xf0]  ;;  %v2581_v2 = vld [vmem:[%s4595_s3 + $0x218] sm:$0xf0] }
  0xc1   :  { %1046 = vmatpush.bf16.msra.mxu3 %v2448_v59  ;;  %v2352_v59 = vor.u32 %v3016_v56, %v2349_v57 }
  0xc2   :  { %1031 = vmatpush.bf16.msra.mxu2 %v2460_v58  ;;  %v2427_v58 = vld [vmem:[%s4595_s3 + $0x120] sm:$0xf] }
  0xc4   :  { %v587_v23 = vpop.f32.mrf.mxu2  ;;  %1295 = vmatpush.bf16.msra.mxu0 %v2616_v63  ;;  %922 = vmatpush.bf16.msra.mxu1 %v2376_v7  ;;  %v2428_v63 = vor.u32 %v3049_v60, %v2427_v58  ;;  %v2757_v60 = vld [vmem:[%s4595_s3 + $0x338] sm:$0xf0] }
  0xc5   :  { %v588_v27 = vadd.f32 %v587_v23, %v555_v12  ;;  %v524_v33 = vpop.f32.mrf.mxu0  ;;  %v3053_v23 = vld [vmem:[%s4595_s3 + $0x144] sm:$0xf0]  ;;  %1047 = vmatpush.bf16.msra.mxu3 %v2440_v16 }
  0xc6   :  { %v620_v28 = vpop.f32.mrf.mxu3  ;;  %v525_v39 = vadd.f32 %v3502_v44, %v524_v33  ;;  %1032 = vmatpush.bf16.msra.mxu2 %v2452_v15  ;;  %v2444_v26 = vor.u32 %v3053_v23, %v2443_v22  ;;  %v3122_v23 = vld [vmem:[%s4595_s3 + $0x374] sm:$0xf] }
  0xc7   :  { %v3691_v40 = vadd.f32 %v620_v28, %v588_v27  ;;  %v557_v42 = vpop.f32.mrf.mxu1  ;;  %v3048_v27 = vld [vmem:[%s4595_s3 + $0x124] sm:$0xf]  ;;  %v2429_v28 = vld [vmem:[%s4595_s3 + $0x128] sm:$0xf0] }
  0xc8   :  { %v558_v50 = vadd.f32 %v557_v42, %v525_v39  ;;  %1296 = vmatpush.bf16.msra.mxu0 %v2608_v20  ;;  %v2432_v30 = vor.u32 %v3048_v27, %v2429_v28  ;;  %923 = vmatpush.bf16.msra.mxu1 %v2368_v25  ;;  %v2360_v42 = vor.u32 %v3018_v36, %v2357_v37  ;;  %v2573_v20 = vld [vmem:[%s4595_s3 + $0x208] sm:$0xf0]  ;;  %v2789_v25 = vld [vmem:[%s4595_s3 + $0x378] sm:$0xf0]  ;;  %v3012_v27 = vld [vmem:[%s4595_s3 + $0x4] sm:$0xf] }
  0xc9   :  { %v2576_v22 = vor.u32 %v3076_v19, %v2573_v20  ;;  %v2333_v28 = vld [vmem:[%s4595_s3 + $0x8] sm:$0xf0]  ;;  %v3120_v36 = vld [vmem:[%s4595_s3 + $0x364] sm:$0xf] }
  0xca   :  { %1033 = vmatpush.bf16.msra.mxu2 %v2444_v26  ;;  %1048 = vmatpush.bf16.msra.mxu3 %v2432_v30  ;;  %v2792_v26 = vor.u32 %v3122_v23, %v2789_v25  ;;  %v2336_v30 = vor.u32 %v3012_v27, %v2333_v28  ;;  %v2781_v37 = vld [vmem:[%s4595_s3 + $0x368] sm:$0xf0]  ;;  %v3075_v25 = vld [vmem:[%s4595_s3 + $0x1f4] sm:$0xf0]  ;;  %v2549_v27 = vld [vmem:[%s4595_s3 + $0x1f8] sm:$0xf0] }
  0xcb   :  { %v2733_v19 = vld [vmem:[%s4595_s3 + $0x308] sm:$0xf0]  ;;  %v2611_v28 = vld [vmem:[%s4595_s3 + $0x250] sm:$0xf] }
  0xcc   :  { %v590_v62 = vpop.f32.mrf.mxu2  ;;  %1297 = vmatpush.bf16.msra.mxu0 %v2600_v32  ;;  %924 = vmatpush.bf16.msra.mxu1 %v2360_v42 }
  0xcd   :  { %v591_v0 = vadd.f32 %v590_v62, %v558_v50  ;;  %v526_v5 = vpop.f32.mrf.mxu0  ;;  %v2436_v50 = vor.u32 %v3051_v43, %v2435_v38  ;;  %v2413_v62 = vld [vmem:[%s4595_s3 + $0x108] sm:$0xf0] }
  0xce   :  { %v623_v1 = vpop.f32.mrf.mxu3  ;;  %v527_v11 = vadd.f32 %v3502_v44, %v526_v5  ;;  %1049 = vmatpush.bf16.msra.mxu3 %v2424_v51 }
  0xcf   :  { %v3745_v12 = vadd.f32 %v623_v1, %v591_v0  ;;  %v559_v14 = vpop.f32.mrf.mxu1  ;;  %1034 = vmatpush.bf16.msra.mxu2 %v2436_v50  ;;  %v2416_v0 = vor.u32 %v3044_v61, %v2413_v62  ;;  %v3078_v1 = vld [vmem:[%s4595_s3 + $0x214] sm:$0xf] }
  0xd0   :  { %v560_v24 = vadd.f32 %v559_v14, %v527_v11  ;;  %1298 = vmatpush.bf16.msra.mxu0 %v2592_v54  ;;  %925 = vmatpush.bf16.msra.mxu1 %v2352_v59  ;;  %v2584_v4 = vor.u32 %v3078_v1, %v2581_v2  ;;  %v2419_v11 = vld [vmem:[%s4595_s3 + $0x110] sm:$0xf]  ;;  %v3114_v59 = vld [vmem:[%s4595_s3 + $0x334] sm:$0xf]  ;;  %v3112_v1 = vld [vmem:[%s4595_s3 + $0x324] sm:$0xf] }
  0xd1   :  { %v2420_v21 = vor.u32 %v3047_v18, %v2419_v11  ;;  %v2760_v61 = vor.u32 %v3114_v59, %v2757_v60  ;;  %v2749_v2 = vld [vmem:[%s4595_s3 + $0x328] sm:$0xf0]  ;;  %v3108_v18 = vld [vmem:[%s4595_s3 + $0x304] sm:$0xf] }
  0xd2   :  { %1050 = vmatpush.bf16.msra.mxu3 %v2416_v0  ;;  %v2736_v23 = vor.u32 %v3108_v18, %v2733_v19  ;;  %v2507_v18 = vld [vmem:[%s4595_s3 + $0x1a0] sm:$0xf] }
  0xd3   :  { %1035 = vmatpush.bf16.msra.mxu2 %v2428_v63 }
  0xd4   :  { %v592_v33 = vpop.f32.mrf.mxu2  ;;  %1299 = vmatpush.bf16.msra.mxu0 %v2584_v4  ;;  %926 = vmatpush.bf16.msra.mxu1 %v2344_v17  ;;  %v2627_v4 = vld [vmem:[%s4595_s3 + $0x270] sm:$0xf] }
  0xd5   :  { %v593_v34 = vadd.f32 %v592_v33, %v560_v24  ;;  %v529_v39 = vpop.f32.mrf.mxu0  ;;  %v2412_v33 = vor.u32 %v3045_v31, %v2411_v29 }
  0xd6   :  { %v625_v35 = vpop.f32.mrf.mxu3  ;;  %v530_v47 = vadd.f32 %v3502_v44, %v529_v39  ;;  %v2784_v39 = vor.u32 %v3120_v36, %v2781_v37  ;;  %v3072_v36 = vld [vmem:[%s4595_s3 + $0x1e4] sm:$0xf]  ;;  %v2541_v37 = vld [vmem:[%s4595_s3 + $0x1e8] sm:$0xf0] }
  0xd7   :  { %v3796_v48 = vadd.f32 %v625_v35, %v593_v34  ;;  %v562_v49 = vpop.f32.mrf.mxu1  ;;  %1036 = vmatpush.bf16.msra.mxu2 %v2420_v21 }
  0xd8   :  { %v563_v55 = vadd.f32 %v562_v49, %v530_v47  ;;  %1300 = vmatpush.bf16.msra.mxu0 %v2576_v22  ;;  %927 = vmatpush.bf16.msra.mxu1 %v2336_v30  ;;  %v3118_v47 = vld [vmem:[%s4595_s3 + $0x354] sm:$0xf]  ;;  %v2773_v49 = vld [vmem:[%s4595_s3 + $0x358] sm:$0xf0]  ;;  %v2547_v22 = vld [vmem:[%s4595_s3 + $0x1f0] sm:$0xf] }
  0xd9   :  { %v2776_v50 = vor.u32 %v3118_v47, %v2773_v49  ;;  %v2548_v30 = vor.u32 %v3075_v25, %v2547_v22  ;;  %v2531_v47 = vld [vmem:[%s4595_s3 + $0x1d0] sm:$0xf]  ;;  %v2509_v22 = vld [vmem:[%s4595_s3 + $0x1a8] sm:$0xf0] }
  0xda   :  { %v2787_v25 = vld [vmem:[%s4595_s3 + $0x370] sm:$0xf] }
  0xdb   :  { %1037 = vmatpush.bf16.msra.mxu2 %v2412_v33 }
  0xdc   :  { %v595_v3 = vpop.f32.mrf.mxu2  ;;  %1543 = vmatpush.bf16.msrb.mxu0 %v2792_v26  ;;  %v3074_v26 = vld [vmem:[%s4595_s3 + $0x1f4] sm:$0xf] }
  0xdd   :  { %v596_v5 = vadd.f32 %v595_v3, %v563_v55  ;;  %v531_v8 = vpop.f32.mrf.mxu0  ;;  %v2765_v55 = vld [vmem:[%s4595_s3 + $0x348] sm:$0xf0]  ;;  %v2552_v31 = vor.u32 %v3074_v26, %v2549_v27  ;;  %v3123_v26 = vld [vmem:[%s4595_s3 + $0x374] sm:$0xf0] }
  0xde   :  { %v628_v7 = vpop.f32.mrf.mxu3  ;;  %v532_v14 = vadd.f32 %v3502_v44, %v531_v8 }
  0xdf   :  { %v3838_v15 = vadd.f32 %v628_v7, %v596_v5  ;;  %v564_v16 = vpop.f32.mrf.mxu1  ;;  %v3091_v5 = vld [vmem:[%s4595_s3 + $0x274] sm:$0xf0]  ;;  %v2752_v7 = vor.u32 %v3112_v1, %v2749_v2  ;;  %v3081_v1 = vld [vmem:[%s4595_s3 + $0x224] sm:$0xf0] }
  0xe0   :  { %v565_v24 = vadd.f32 %v564_v16, %v532_v14  ;;  %1544 = vmatpush.bf16.msrb.mxu0 %v2784_v39  ;;  %v2628_v9 = vor.u32 %v3091_v5, %v2627_v4  ;;  %v2619_v14 = vld [vmem:[%s4595_s3 + $0x260] sm:$0xf]  ;;  %v3089_v16 = vld [vmem:[%s4595_s3 + $0x264] sm:$0xf0]  ;;  %v2515_v5 = vld [vmem:[%s4595_s3 + $0x1b0] sm:$0xf] }
  0xe1   :  { %v2620_v21 = vor.u32 %v3089_v16, %v2619_v14  ;;  %v3085_v39 = vld [vmem:[%s4595_s3 + $0x244] sm:$0xf0]  ;;  %v3079_v14 = vld [vmem:[%s4595_s3 + $0x214] sm:$0xf0] }
  0xe4   :  { %v597_v32 = vpop.f32.mrf.mxu2  ;;  %1545 = vmatpush.bf16.msrb.mxu0 %v2776_v50 }
  0xe5   :  { %v598_v34 = vadd.f32 %v597_v32, %v565_v24  ;;  %v534_v38 = vpop.f32.mrf.mxu0  ;;  %v2539_v32 = vld [vmem:[%s4595_s3 + $0x1e0] sm:$0xf] }
  0xe6   :  { %v630_v35 = vpop.f32.mrf.mxu3  ;;  %v535_v42 = vadd.f32 %v3502_v44, %v534_v38  ;;  %v3116_v44 = vld [vmem:[%s4595_s3 + $0x344] sm:$0xf]  ;;  %v2603_v38 = vld [vmem:[%s4595_s3 + $0x240] sm:$0xf] }
  0xe7   :  { %v3874_v43 = vadd.f32 %v630_v35, %v598_v34  ;;  %v567_v45 = vpop.f32.mrf.mxu1  ;;  %v2768_v57 = vor.u32 %v3116_v44, %v2765_v55  ;;  %v3073_v35 = vld [vmem:[%s4595_s3 + $0x1e4] sm:$0xf0]  ;;  %v2604_v50 = vor.u32 %v3085_v39, %v2603_v38 }
  0xe8   :  { %v568_v46 = vadd.f32 %v567_v45, %v535_v42  ;;  %v2540_v45 = vor.u32 %v3073_v35, %v2539_v32  ;;  %v3062_v32 = vld [vmem:[%s4595_s3 + $0x194] sm:$0xf]  ;;  %v3121_v38 = vld [vmem:[%s4595_s3 + $0x364] sm:$0xf0] }
  0xe9   :  { %1546 = vmatpush.bf16.msrb.mxu0 %v2768_v57  ;;  %v3154_v35 = vld [vmem:[%s4595_s3 + $0x474] sm:$0xf] }
  0xec   :  { %v600_v51 = vpop.f32.mrf.mxu2 }
  0xed   :  { %v601_v52 = vadd.f32 %v600_v51, %v568_v46  ;;  %v536_v54 = vpop.f32.mrf.mxu0  ;;  %1547 = vmatpush.bf16.msrb.mxu0 %v2760_v61  ;;  %v2544_v46 = vor.u32 %v3072_v36, %v2541_v37  ;;  %v3071_v51 = vld [vmem:[%s4595_s3 + $0x1d4] sm:$0xf0]  ;;  %v3069_v61 = vld [vmem:[%s4595_s3 + $0x1c4] sm:$0xf0]  ;;  %v2779_v37 = vld [vmem:[%s4595_s3 + $0x360] sm:$0xf] }
  0xee   :  { %v633_v53 = vpop.f32.mrf.mxu3  ;;  %v2595_v54 = vld [vmem:[%s4595_s3 + $0x230] sm:$0xf]  ;;  %v2532_v55 = vor.u32 %v3071_v51, %v2531_v47  ;;  %v3060_v47 = vld [vmem:[%s4595_s3 + $0x184] sm:$0xf] }
  0xef   :  { %v3888_v56 = vadd.f32 %v633_v53, %v601_v52  ;;  %v569_v58 = vpop.f32.mrf.mxu1  ;;  %v3070_v52 = vld [vmem:[%s4595_s3 + $0x1d4] sm:$0xf]  ;;  %v2533_v53 = vld [vmem:[%s4595_s3 + $0x1d8] sm:$0xf0] }
  0xf0   :  { %v2536_v57 = vor.u32 %v3070_v52, %v2533_v53  ;;  %v2523_v58 = vld [vmem:[%s4595_s3 + $0x1c0] sm:$0xf]  ;;  %v2493_v52 = vld [vmem:[%s4595_s3 + $0x188] sm:$0xf0]  ;;  %v2707_v53 = vld [vmem:[%s4595_s3 + $0x2f0] sm:$0xf] }
  0xf1   :  { %1548 = vmatpush.bf16.msrb.mxu0 %v2752_v7 }
  0xf4   :  { %v602_v62 = vpop.f32.mrf.mxu2 }
  0xf5   :  { %v646_v0 = vpop.f32.mrf.mxu0  ;;  %v3068_v62 = vld [vmem:[%s4595_s3 + $0x1c4] sm:$0xf] }
  0xf6   :  { %v635_v63 = vpop.f32.mrf.mxu3  ;;  %v647_v3 = vadd.f32 %v646_v0, %v3552_v13  ;;  %v2741_v13 = vld [vmem:[%s4595_s3 + $0x318] sm:$0xf0]  ;;  %v2587_v0 = vld [vmem:[%s4595_s3 + $0x220] sm:$0xf] }
  0xf7   :  { %v2744_v17 = vor.u32 %v3110_v10, %v2741_v13  ;;  %v2525_v63 = vld [vmem:[%s4595_s3 + $0x1c8] sm:$0xf0]  ;;  %v2588_v7 = vor.u32 %v3081_v1, %v2587_v0  ;;  %v2517_v10 = vld [vmem:[%s4595_s3 + $0x1b8] sm:$0xf0]  ;;  %v2579_v13 = vld [vmem:[%s4595_s3 + $0x210] sm:$0xf] }
  0xf8   :  { %v670_v8 = vmax.f32 %v647_v3, 0.0  ;;  %v2524_v3 = vor.u32 %v3069_v61, %v2523_v58  ;;  %v2528_v4 = vor.u32 %v3068_v62, %v2525_v63  ;;  %v2580_v19 = vor.u32 %v3079_v14, %v2579_v13  ;;  %v3152_v58 = vld [vmem:[%s4595_s3 + $0x464] sm:$0xf]  ;;  %v3150_v13 = vld [vmem:[%s4595_s3 + $0x454] sm:$0xf] }
  0xf9   :  { %1549 = vmatpush.bf16.msrb.mxu0 %v2744_v17  ;;  %v2496_v62 = vor.u32 %v3060_v47, %v2493_v52  ;;  %v2933_v14 = vld [vmem:[%s4595_s3 + $0x458] sm:$0xf0]  ;;  %v2675_v47 = vld [vmem:[%s4595_s3 + $0x2b0] sm:$0xf]  ;;  %v3098_v52 = vld [vmem:[%s4595_s3 + $0x2b4] sm:$0xf] }
  0xfa   :  { %v3915_v11 = vpack.c.bf16 %v670_v8, %v670_v8  ;;  %v3067_v8 = vld [vmem:[%s4595_s3 + $0x1b4] sm:$0xf0] }
  0xfb   :  { %v2516_v16 = vor.u32 %v3067_v8, %v2515_v5  ;;  %v2701_v8 = vld [vmem:[%s4595_s3 + $0x2e8] sm:$0xf0] }
  0xfc   :  { %915 = vmatmul.bf16.vlgmr.msrb.gmra.mxu3 %v3915_v11 }
  0xfd   :  { %1280 = vmatpush.bf16.msrb.mxu3 %v2628_v9  ;;  %v648_v20 = vpop.f32.mrf.mxu0  ;;  %1550 = vmatpush.bf16.msrb.mxu0 %v2736_v23  ;;  %v3066_v9 = vld [vmem:[%s4595_s3 + $0x1b4] sm:$0xf]  ;;  %v2571_v23 = vld [vmem:[%s4595_s3 + $0x200] sm:$0xf] }
  0xfe   :  { %v649_v24 = vadd.f32 %v648_v20, %v3591_v41  ;;  %v3087_v41 = vld [vmem:[%s4595_s3 + $0x254] sm:$0xf0]  ;;  %v2520_v17 = vor.u32 %v3066_v9, %v2517_v10  ;;  %v3065_v20 = vld [vmem:[%s4595_s3 + $0x1a4] sm:$0xf0]  ;;  %v2763_v9 = vld [vmem:[%s4595_s3 + $0x340] sm:$0xf] }
  0xff   :  { %v2612_v34 = vor.u32 %v3087_v41, %v2611_v28  ;;  %v2508_v28 = vor.u32 %v3065_v20, %v2507_v18  ;;  %v3117_v10 = vld [vmem:[%s4595_s3 + $0x344] sm:$0xf0]  ;;  %v3103_v20 = vld [vmem:[%s4595_s3 + $0x2d4] sm:$0xf0] }
 0x100   :  { %v671_v29 = vmax.f32 %v649_v24, 0.0  ;;  %v3077_v24 = vld [vmem:[%s4595_s3 + $0x204] sm:$0xf0] }
 0x101   :  { %1281 = vmatpush.bf16.msrb.mxu3 %v2620_v21  ;;  %v3064_v21 = vld [vmem:[%s4595_s3 + $0x1a4] sm:$0xf] }
 0x102   :  { %v680_v33 = vpack.c.bf16 %v671_v29, %v671_v29  ;;  %v2512_v41 = vor.u32 %v3064_v21, %v2509_v22  ;;  %v2499_v29 = vld [vmem:[%s4595_s3 + $0x190] sm:$0xf]  ;;  %v2764_v21 = vor.u32 %v3117_v10, %v2763_v9  ;;  %v2936_v22 = vor.u32 %v3150_v13, %v2933_v14 }
 0x104   :  { %809 = vmatmul.bf16.vlgmr.msrb.gmra.mxu1 %v680_v33  ;;  %822 = vmatmul.bf16.vlgmr.msrb.gmra.mxu2 %v680_v33  ;;  %v2501_v33 = vld [vmem:[%s4595_s3 + $0x198] sm:$0xf0] }
 0x105   :  { %1155 = vmatpush.bf16.msrb.mxu1 %v2548_v30  ;;  %1168 = vmatpush.bf16.msrb.mxu2 %v2552_v31  ;;  %v651_v42 = vpop.f32.mrf.mxu0  ;;  %v2572_v30 = vor.u32 %v3077_v24, %v2571_v23  ;;  %v3063_v31 = vld [vmem:[%s4595_s3 + $0x194] sm:$0xf0]  ;;  %v3102_v23 = vld [vmem:[%s4595_s3 + $0x2d4] sm:$0xf]  ;;  %v2693_v24 = vld [vmem:[%s4595_s3 + $0x2d8] sm:$0xf0] }
 0x106   :  { %1282 = vmatpush.bf16.msrb.mxu3 %v2612_v34  ;;  %v652_v49 = vadd.f32 %v651_v42, %v3637_v6  ;;  %v3083_v6 = vld [vmem:[%s4595_s3 + $0x234] sm:$0xf0]  ;;  %v2788_v34 = vor.u32 %v3123_v26, %v2787_v25  ;;  %v2500_v39 = vor.u32 %v3063_v31, %v2499_v29  ;;  %v2504_v42 = vor.u32 %v3062_v32, %v2501_v33  ;;  %v2755_v25 = vld [vmem:[%s4595_s3 + $0x330] sm:$0xf]  ;;  %v2683_v31 = vld [vmem:[%s4595_s3 + $0x2c0] sm:$0xf] }
 0x107   :  { %v2596_v60 = vor.u32 %v3083_v6, %v2595_v54  ;;  %v3107_v54 = vld [vmem:[%s4595_s3 + $0x2f4] sm:$0xf0]  ;;  %v2780_v6 = vor.u32 %v3121_v38, %v2779_v37  ;;  %v3101_v32 = vld [vmem:[%s4595_s3 + $0x2c4] sm:$0xf0]  ;;  %v3100_v33 = vld [vmem:[%s4595_s3 + $0x2c4] sm:$0xf] }
 0x108   :  { %v672_v44 = vmax.f32 %v652_v49, 0.0  ;;  %v2708_v0 = vor.u32 %v3107_v54, %v2707_v53  ;;  %v3115_v26 = vld [vmem:[%s4595_s3 + $0x334] sm:$0xf0]  ;;  %v3146_v38 = vld [vmem:[%s4595_s3 + $0x434] sm:$0xf] }
 0x109   :  { %1156 = vmatpush.bf16.msrb.mxu1 %v2540_v45  ;;  %1169 = vmatpush.bf16.msrb.mxu2 %v2544_v46  ;;  %v2491_v45 = vld [vmem:[%s4595_s3 + $0x180] sm:$0xf]  ;;  %v3061_v46 = vld [vmem:[%s4595_s3 + $0x184] sm:$0xf0]  ;;  %v2677_v53 = vld [vmem:[%s4595_s3 + $0x2b8] sm:$0xf0] }
 0x10a   :  { %v681_v59 = vpack.c.bf16 %v672_v44, %v672_v44  ;;  %1283 = vmatpush.bf16.msrb.mxu3 %v2604_v50  ;;  %v2709_v44 = vld [vmem:[%s4595_s3 + $0x2f8] sm:$0xf0]  ;;  %v2492_v61 = vor.u32 %v3061_v46, %v2491_v45  ;;  %v2684_v45 = vor.u32 %v3101_v32, %v2683_v31  ;;  %v2739_v54 = vld [vmem:[%s4595_s3 + $0x310] sm:$0xf]  ;;  %v2653_v31 = vld [vmem:[%s4595_s3 + $0x288] sm:$0xf0] }
 0x10b   :  { %v2867_v32 = vld [vmem:[%s4595_s3 + $0x3f0] sm:$0xf] }
 0x10c   :  { %1051 = vmatmul.bf16.vlgmr.msra.gmra.mxu3 %v681_v59 }
 0x10d   :  { %1157 = vmatpush.bf16.msrb.mxu1 %v2532_v55  ;;  %1170 = vmatpush.bf16.msrb.mxu2 %v2536_v57  ;;  %v653_v2 = vpop.f32.mrf.mxu0  ;;  %v2771_v55 = vld [vmem:[%s4595_s3 + $0x350] sm:$0xf]  ;;  %v3119_v57 = vld [vmem:[%s4595_s3 + $0x354] sm:$0xf0] }
 0x10e   :  { %1284 = vmatpush.bf16.msrb.mxu3 %v2596_v60  ;;  %v654_v49 = vadd.f32 %v653_v2, %v3691_v40  ;;  %v3106_v40 = vld [vmem:[%s4595_s3 + $0x2f4] sm:$0xf]  ;;  %v2699_v2 = vld [vmem:[%s4595_s3 + $0x2e0] sm:$0xf] }
 0x10f   :  { %v2712_v1 = vor.u32 %v3106_v40, %v2709_v44  ;;  %v3144_v40 = vld [vmem:[%s4595_s3 + $0x424] sm:$0xf]  ;;  %v2909_v44 = vld [vmem:[%s4595_s3 + $0x428] sm:$0xf0] }
 0x110   :  { %v673_v63 = vmax.f32 %v654_v49, 0.0  ;;  %v3099_v49 = vld [vmem:[%s4595_s3 + $0x2b4] sm:$0xf0] }
 0x111   :  { %1158 = vmatpush.bf16.msrb.mxu1 %v2524_v3  ;;  %1171 = vmatpush.bf16.msrb.mxu2 %v2528_v4  ;;  %v3105_v3 = vld [vmem:[%s4595_s3 + $0x2e4] sm:$0xf0]  ;;  %v2772_v4 = vor.u32 %v3119_v57, %v2771_v55  ;;  %v2676_v57 = vor.u32 %v3099_v49, %v2675_v47  ;;  %v2859_v49 = vld [vmem:[%s4595_s3 + $0x3e0] sm:$0xf] }
 0x112   :  { %1285 = vmatpush.bf16.msrb.mxu3 %v2588_v7  ;;  %v3104_v7 = vld [vmem:[%s4595_s3 + $0x2e4] sm:$0xf] }
 0x113   :  { %v2704_v18 = vor.u32 %v3104_v7, %v2701_v8  ;;  %v2947_v7 = vld [vmem:[%s4595_s3 + $0x470] sm:$0xf]  ;;  %v3155_v8 = vld [vmem:[%s4595_s3 + $0x474] sm:$0xf0] }
 0x114   :  { %928 = vmatmul.bf16.vlgmr.msra.gmra.mxu1 %v3915_v11  ;;  %1038 = vmatmul.bf16.vlgmr.msra.gmra.mxu2 %v681_v59  ;;  %v2941_v59 = vld [vmem:[%s4595_s3 + $0x468] sm:$0xf0] }
 0x115   :  { %1159 = vmatpush.bf16.msrb.mxu1 %v2516_v16  ;;  %1172 = vmatpush.bf16.msrb.mxu2 %v2520_v17  ;;  %v656_v27 = vpop.f32.mrf.mxu0  ;;  %v2944_v5 = vor.u32 %v3152_v58, %v2941_v59  ;;  %v682_v16 = vpack.c.bf16 %v673_v63, %v673_v63  ;;  %v2700_v17 = vor.u32 %v3105_v3, %v2699_v2  ;;  %v2667_v59 = vld [vmem:[%s4595_s3 + $0x2a0] sm:$0xf]  ;;  %v3109_v3 = vld [vmem:[%s4595_s3 + $0x304] sm:$0xf0] }
 0x116   :  { %1286 = vmatpush.bf16.msrb.mxu3 %v2580_v19  ;;  %v657_v11 = vadd.f32 %v656_v27, %v3745_v12  ;;  %v2949_v12 = vld [vmem:[%s4595_s3 + $0x478] sm:$0xf0]  ;;  %v2691_v19 = vld [vmem:[%s4595_s3 + $0x2d0] sm:$0xf]  ;;  %v3148_v27 = vld [vmem:[%s4595_s3 + $0x444] sm:$0xf]  ;;  %v2680_v58 = vor.u32 %v3098_v52, %v2677_v53  ;;  %v2912_v63 = vor.u32 %v3144_v40, %v2909_v44 }
 0x117   :  { %v2952_v51 = vor.u32 %v3154_v35, %v2949_v12  ;;  %v2685_v35 = vld [vmem:[%s4595_s3 + $0x2c8] sm:$0xf0]  ;;  %v2747_v12 = vld [vmem:[%s4595_s3 + $0x320] sm:$0xf]  ;;  %v3149_v53 = vld [vmem:[%s4595_s3 + $0x444] sm:$0xf0] }
 0x118   :  { %v674_v36 = vmax.f32 %v657_v11, 0.0  ;;  %v2692_v11 = vor.u32 %v3103_v20, %v2691_v19  ;;  %v2688_v46 = vor.u32 %v3100_v33, %v2685_v35  ;;  %v2731_v2 = vld [vmem:[%s4595_s3 + $0x300] sm:$0xf]  ;;  %v2948_v19 = vor.u32 %v3155_v8, %v2947_v7  ;;  %v2661_v20 = vld [vmem:[%s4595_s3 + $0x298] sm:$0xf0] }
 0x119   :  { %1160 = vmatpush.bf16.msrb.mxu1 %v2508_v28  ;;  %1173 = vmatpush.bf16.msrb.mxu2 %v2512_v41  ;;  %v2925_v28 = vld [vmem:[%s4595_s3 + $0x448] sm:$0xf0]  ;;  %v2732_v13 = vor.u32 %v3109_v3, %v2731_v2  ;;  %v2931_v35 = vld [vmem:[%s4595_s3 + $0x450] sm:$0xf]  ;;  %v2923_v52 = vld [vmem:[%s4595_s3 + $0x440] sm:$0xf] }
 0x11a   :  { %v683_v50 = vpack.c.bf16 %v674_v36, %v674_v36  ;;  %1287 = vmatpush.bf16.msrb.mxu3 %v2572_v30  ;;  %v2696_v30 = vor.u32 %v3102_v23, %v2693_v24  ;;  %v3113_v36 = vld [vmem:[%s4595_s3 + $0x324] sm:$0xf0]  ;;  %v2939_v24 = vld [vmem:[%s4595_s3 + $0x460] sm:$0xf]  ;;  %v3132_v7 = vld [vmem:[%s4595_s3 + $0x3c4] sm:$0xf] }
 0x11b   :  { %v2845_v8 = vld [vmem:[%s4595_s3 + $0x3c8] sm:$0xf0] }
 0x11c   :  { %1301 = vmatmul.bf16.vlgmr.msra.gmra.mxu0 %v683_v50 }
 0x11d   :  { %1161 = vmatpush.bf16.msrb.mxu1 %v2500_v39  ;;  %1174 = vmatpush.bf16.msrb.mxu2 %v2504_v42  ;;  %v4109_v60 = vpop.f32.mrf.mxu0  ;;  %v2917_v39 = vld [vmem:[%s4595_s3 + $0x438] sm:$0xf0] }
 0x11e   :  { %1530 = vmatpush.bf16.msra.mxu3 %v2788_v34  ;;  %1793 = vmatpush.bf16.msra.mxu0 %v2952_v51  ;;  %v2756_v34 = vor.u32 %v3115_v26, %v2755_v25  ;;  %v2920_v51 = vor.u32 %v3146_v38, %v2917_v39  ;;  %v3153_v25 = vld [vmem:[%s4595_s3 + $0x464] sm:$0xf0] }
 0x11f   :  { %1288 = vmatmul.bf16.vlgmr.msrb.gmra.mxu3 %v683_v50  ;;  %v2748_v50 = vor.u32 %v3113_v36, %v2747_v12  ;;  %v3151_v12 = vld [vmem:[%s4595_s3 + $0x454] sm:$0xf0] }
 0x120   :  { %v2932_v47 = vor.u32 %v3151_v12, %v2931_v35  ;;  %v2811_v12 = vld [vmem:[%s4595_s3 + $0x380] sm:$0xf] }
 0x121   :  { %1162 = vmatpush.bf16.msrb.mxu1 %v2492_v61  ;;  %1175 = vmatpush.bf16.msrb.mxu2 %v2496_v62  ;;  %v3097_v61 = vld [vmem:[%s4595_s3 + $0x2a4] sm:$0xf0] }
 0x122   :  { %1531 = vmatpush.bf16.msra.mxu3 %v2780_v6  ;;  %1794 = vmatpush.bf16.msra.mxu0 %v2944_v5  ;;  %v3111_v6 = vld [vmem:[%s4595_s3 + $0x314] sm:$0xf0]  ;;  %v2901_v5 = vld [vmem:[%s4595_s3 + $0x418] sm:$0xf0]  ;;  %v2668_v9 = vor.u32 %v3097_v61, %v2667_v59  ;;  %v3134_v61 = vld [vmem:[%s4595_s3 + $0x3d4] sm:$0xf] }
 0x123   :  { %v2740_v62 = vor.u32 %v3111_v6, %v2739_v54  ;;  %v3135_v59 = vld [vmem:[%s4595_s3 + $0x3d4] sm:$0xf0] }
 0x124   :  { %1163 = vmatmul.bf16.vlgmr.msrb.gmra.mxu1 %v682_v16  ;;  %1176 = vmatmul.bf16.vlgmr.msrb.gmra.mxu2 %v682_v16  ;;  %v2659_v16 = vld [vmem:[%s4595_s3 + $0x290] sm:$0xf] }
 0x125   :  { %1405 = vmatpush.bf16.msra.mxu1 %v2708_v0  ;;  %1418 = vmatpush.bf16.msra.mxu2 %v2712_v1  ;;  %v661_v41 = vpop.f32.mrf.mxu0  ;;  %v3096_v0 = vld [vmem:[%s4595_s3 + $0x2a4] sm:$0xf]  ;;  %v2669_v1 = vld [vmem:[%s4595_s3 + $0x2a8] sm:$0xf0] }
 0x126   :  { %1532 = vmatpush.bf16.msra.mxu3 %v2772_v4  ;;  %v662_v29 = vadd.f32 %v661_v41, %v3838_v15  ;;  %1795 = vmatpush.bf16.msra.mxu0 %v2936_v22  ;;  %v2928_v15 = vor.u32 %v3148_v27, %v2925_v28  ;;  %v3142_v4 = vld [vmem:[%s4595_s3 + $0x414] sm:$0xf]  ;;  %v2672_v10 = vor.u32 %v3096_v0, %v2669_v1  ;;  %v2893_v22 = vld [vmem:[%s4595_s3 + $0x408] sm:$0xf0]  ;;  %v2651_v28 = vld [vmem:[%s4595_s3 + $0x280] sm:$0xf] }
 0x127   :  { %v2904_v14 = vor.u32 %v3142_v4, %v2901_v5  ;;  %v3093_v41 = vld [vmem:[%s4595_s3 + $0x284] sm:$0xf0]  ;;  %v3147_v0 = vld [vmem:[%s4595_s3 + $0x434] sm:$0xf0]  ;;  %v2843_v4 = vld [vmem:[%s4595_s3 + $0x3c0] sm:$0xf] }
 0x128   :  { %v676_v37 = vmax.f32 %v662_v29, 0.0  ;;  %v659_v29 = vadd.f32 %v4109_v60, %v3796_v48  ;;  %v3139_v48 = vld [vmem:[%s4595_s3 + $0x3f4] sm:$0xf0]  ;;  %v3138_v60 = vld [vmem:[%s4595_s3 + $0x3f4] sm:$0xf] }
 0x129   :  { %1406 = vmatpush.bf16.msra.mxu1 %v2700_v17  ;;  %1419 = vmatpush.bf16.msra.mxu2 %v2704_v18  ;;  %v3095_v17 = vld [vmem:[%s4595_s3 + $0x294] sm:$0xf0]  ;;  %v3094_v18 = vld [vmem:[%s4595_s3 + $0x294] sm:$0xf]  ;;  %v3133_v5 = vld [vmem:[%s4595_s3 + $0x3c4] sm:$0xf0] }
 0x12a   :  { %1533 = vmatpush.bf16.msra.mxu3 %v2764_v21  ;;  %v4184_v42 = vpack.c.bf16 %v676_v37, %v676_v37  ;;  %1796 = vmatpush.bf16.msra.mxu0 %v2928_v15  ;;  %v3140_v21 = vld [vmem:[%s4595_s3 + $0x404] sm:$0xf]  ;;  %v2660_v27 = vor.u32 %v3095_v17, %v2659_v16  ;;  %v2869_v15 = vld [vmem:[%s4595_s3 + $0x3f8] sm:$0xf0]  ;;  %v2652_v37 = vor.u32 %v3093_v41, %v2651_v28  ;;  %v675_v38 = vmax.f32 %v659_v29, 0.0 }
 0x12b   :  { %v2835_v17 = vld [vmem:[%s4595_s3 + $0x3b0] sm:$0xf]  ;;  %v3128_v28 = vld [vmem:[%s4595_s3 + $0x3a4] sm:$0xf]  ;;  %v2829_v41 = vld [vmem:[%s4595_s3 + $0x3a8] sm:$0xf0] }
 0x12c   :  { %1551 = vmatmul.bf16.vlgmr.msrb.gmra.mxu0 %v4184_v42  ;;  %v684_v6 = vpack.c.bf16 %v675_v38, %v675_v38  ;;  %v2891_v29 = vld [vmem:[%s4595_s3 + $0x400] sm:$0xf]  ;;  %v3124_v38 = vld [vmem:[%s4595_s3 + $0x384] sm:$0xf] }
 0x12d   :  { %1407 = vmatpush.bf16.msra.mxu1 %v2692_v11  ;;  %1420 = vmatpush.bf16.msra.mxu2 %v2696_v30  ;;  %v4211_v55 = vpop.f32.mrf.mxu0  ;;  %v2664_v11 = vor.u32 %v3094_v18, %v2661_v20  ;;  %v2896_v30 = vor.u32 %v3140_v21, %v2893_v22  ;;  %v3131_v18 = vld [vmem:[%s4595_s3 + $0x3b4] sm:$0xf0]  ;;  %v2837_v20 = vld [vmem:[%s4595_s3 + $0x3b8] sm:$0xf0]  ;;  %v2899_v21 = vld [vmem:[%s4595_s3 + $0x410] sm:$0xf] }
 0x12e   :  { %1534 = vmatpush.bf16.msra.mxu3 %v2756_v34  ;;  %1797 = vmatpush.bf16.msra.mxu0 %v2920_v51  ;;  %v2940_v34 = vor.u32 %v3153_v25, %v2939_v24  ;;  %v2861_v51 = vld [vmem:[%s4595_s3 + $0x3e8] sm:$0xf0]  ;;  %v3143_v22 = vld [vmem:[%s4595_s3 + $0x414] sm:$0xf0] }
 0x12f   :  { %v2900_v25 = vor.u32 %v3143_v22, %v2899_v21  ;;  %v1827_v21 = vld [vmem:[%s4597_s5 + $0x48] sm:$0xff]  ;;  %v1846_v22 = vld [vmem:[%s4597_s5 + $0xe0] sm:$0xff] }
 0x131   :  { %1408 = vmatpush.bf16.msra.mxu1 %v2684_v45  ;;  %1421 = vmatpush.bf16.msra.mxu2 %v2688_v46  ;;  %v2868_v45 = vor.u32 %v3139_v48, %v2867_v32  ;;  %v2872_v46 = vor.u32 %v3138_v60, %v2869_v15  ;;  %v2819_v32 = vld [vmem:[%s4595_s3 + $0x390] sm:$0xf]  ;;  %v2821_v48 = vld [vmem:[%s4595_s3 + $0x398] sm:$0xf0]  ;;  %v664_v15 = vadd.f32 %v4211_v55, %v3874_v43 }
 0x132   :  { %1535 = vmatpush.bf16.msra.mxu3 %v2748_v50  ;;  %1798 = vmatpush.bf16.msra.mxu0 %v2912_v63  ;;  %v3137_v50 = vld [vmem:[%s4595_s3 + $0x3e4] sm:$0xf0]  ;;  %v2915_v63 = vld [vmem:[%s4595_s3 + $0x430] sm:$0xf] }
 0x133   :  { %v2860_v40 = vor.u32 %v3137_v50, %v2859_v49  ;;  %v2916_v3 = vor.u32 %v3147_v0, %v2915_v63  ;;  %v677_v55 = vmax.f32 %v664_v15, 0.0  ;;  %v1839_v15 = vld [vmem:[%s4597_s5 + $0xa8] sm:$0xff] }
 0x135   :  { %1409 = vmatpush.bf16.msra.mxu1 %v2676_v57  ;;  %1422 = vmatpush.bf16.msra.mxu2 %v2680_v58  ;;  %v666_v23 = vpop.f32.mrf.mxu0  ;;  %v2924_v57 = vor.u32 %v3149_v53, %v2923_v52  ;;  %v2851_v58 = vld [vmem:[%s4595_s3 + $0x3d0] sm:$0xf] }
 0x136   :  { %1536 = vmatpush.bf16.msra.mxu3 %v2740_v62  ;;  %v667_v26 = vadd.f32 %v666_v23, %v3888_v56  ;;  %1799 = vmatpush.bf16.msra.mxu0 %v2904_v14  ;;  %v3092_v56 = vld [vmem:[%s4595_s3 + $0x284] sm:$0xf]  ;;  %v2853_v62 = vld [vmem:[%s4595_s3 + $0x3d8] sm:$0xf0]  ;;  %v2852_v1 = vor.u32 %v3135_v59, %v2851_v58  ;;  %v2848_v14 = vor.u32 %v3132_v7, %v2845_v8 }
 0x137   :  { %v2656_v39 = vor.u32 %v3092_v56, %v2653_v31  ;;  %v2856_v2 = vor.u32 %v3134_v61, %v2853_v62  ;;  %v2836_v23 = vor.u32 %v3131_v18, %v2835_v17  ;;  %v2832_v56 = vor.u32 %v3128_v28, %v2829_v41  ;;  %v1848_v17 = vld [vmem:[%s4597_s5 + $0xf0] sm:$0xff]  ;;  %v1843_v41 = vld [vmem:[%s4597_s5 + $0xc8] sm:$0xff] }
 0x138   :  { %v678_v33 = vmax.f32 %v667_v26, 0.0  ;;  %v2827_v26 = vld [vmem:[%s4595_s3 + $0x3a0] sm:$0xf]  ;;  %v1828_v18 = vld [vmem:[%s4597_s5 + $0x50] sm:$0xff] }
 0x139   :  { %1410 = vmatpush.bf16.msra.mxu1 %v2668_v9  ;;  %1423 = vmatpush.bf16.msra.mxu2 %v2672_v10  ;;  %v2907_v9 = vld [vmem:[%s4595_s3 + $0x420] sm:$0xf]  ;;  %v3145_v10 = vld [vmem:[%s4595_s3 + $0x424] sm:$0xf0]  ;;  %v1824_v28 = vld [vmem:[%s4597_s5 + $0x30] sm:$0xff] }
 0x13a   :  { %1537 = vmatpush.bf16.msra.mxu3 %v2732_v13  ;;  %v4300_v36 = vpack.c.bf16 %v678_v33, %v678_v33  ;;  %1800 = vmatpush.bf16.msra.mxu0 %v2896_v30  ;;  %v2844_v13 = vor.u32 %v3133_v5, %v2843_v4  ;;  %v2908_v16 = vor.u32 %v3145_v10, %v2907_v9  ;;  %v3127_v33 = vld [vmem:[%s4595_s3 + $0x394] sm:$0xf0]  ;;  %v1831_v4 = vld [vmem:[%s4597_s5 + $0x68] sm:$0xff]  ;;  %v1830_v10 = vld [vmem:[%s4597_s5 + $0x60] sm:$0xff] }
 0x13b   :  { %v2820_v60 = vor.u32 %v3127_v33, %v2819_v32  ;;  %v1849_v5 = vld [vmem:[%s4597_s5 + $0xf8] sm:$0xff] }
 0x13c   :  { %v1821_v33 = vld [vmem:[%s4597_s5 + $0x18] sm:$0xff] }
 0x13d   :  { %1538 = vmatmul.bf16.vlgmr.msra.gmra.mxu3 %v4184_v42  ;;  %1411 = vmatpush.bf16.msra.mxu1 %v2660_v27  ;;  %v3136_v42 = vld [vmem:[%s4595_s3 + $0x3e4] sm:$0xf]  ;;  %v668_v54 = vpop.f32.mrf.mxu0  ;;  %v3129_v27 = vld [vmem:[%s4595_s3 + $0x3a4] sm:$0xf0] }
 0x13e   :  { %1780 = vmatpush.bf16.msrb.mxu3 %v2948_v19  ;;  %1424 = vmatpush.bf16.msra.mxu2 %v2664_v11  ;;  %v2864_v44 = vor.u32 %v3136_v42, %v2861_v51  ;;  %v3130_v19 = vld [vmem:[%s4595_s3 + $0x3b4] sm:$0xf]  ;;  %v3141_v11 = vld [vmem:[%s4595_s3 + $0x404] sm:$0xf0]  ;;  %v2828_v30 = vor.u32 %v3129_v27, %v2827_v26  ;;  %v1825_v26 = vld [vmem:[%s4597_s5 + $0x38] sm:$0xff] }
 0x13f   :  { %1801 = vmatmul.bf16.vlgmr.msra.gmra.mxu0 %v4300_v36  ;;  %v2840_v24 = vor.u32 %v3130_v19, %v2837_v20  ;;  %v2892_v31 = vor.u32 %v3141_v11, %v2891_v29  ;;  %v1847_v19 = vld [vmem:[%s4597_s5 + $0xe8] sm:$0xff]  ;;  %v1844_v27 = vld [vmem:[%s4597_s5 + $0xd0] sm:$0xff]  ;;  %v1842_v11 = vld [vmem:[%s4597_s5 + $0xc0] sm:$0xff] }
 0x140   :  { %v1823_v29 = vld [vmem:[%s4597_s5 + $0x28] sm:$0xff] }
 0x141   :  { %1412 = vmatpush.bf16.msra.mxu1 %v2652_v37  ;;  %v3125_v37 = vld [vmem:[%s4595_s3 + $0x384] sm:$0xf0] }
 0x142   :  { %1781 = vmatpush.bf16.msrb.mxu3 %v2940_v34  ;;  %1425 = vmatpush.bf16.msra.mxu2 %v2656_v39  ;;  %v3126_v34 = vld [vmem:[%s4595_s3 + $0x394] sm:$0xf]  ;;  %v2813_v39 = vld [vmem:[%s4595_s3 + $0x388] sm:$0xf0]  ;;  %v2812_v43 = vor.u32 %v3125_v37, %v2811_v12  ;;  %v1838_v12 = vld [vmem:[%s4597_s5 + $0xa0] sm:$0xff] }
 0x143   :  { %v2824_v35 = vor.u32 %v3126_v34, %v2821_v48  ;;  %v1840_v34 = vld [vmem:[%s4597_s5 + $0xb0] sm:$0xff] }
 0x144   :  { %1413 = vmatmul.bf16.vlgmr.msra.gmra.mxu1 %v684_v6 }
 0x145   :  { %1655 = vmatpush.bf16.msrb.mxu1 %v2868_v45  ;;  %1426 = vmatmul.bf16.vlgmr.msra.gmra.mxu2 %v684_v6  ;;  %v2816_v45 = vor.u32 %v3124_v38, %v2813_v39  ;;  %v1818_v38 = vld [vmem:[%s4597_s5] sm:$0xff]  ;;  %v1837_v39 = vld [vmem:[%s4597_s5 + $0x98] sm:$0xff] }
 0x146   :  { %1668 = vmatpush.bf16.msrb.mxu2 %v2872_v46  ;;  %1782 = vmatpush.bf16.msrb.mxu3 %v2932_v47  ;;  %v686_v46 = vpack.c.bf16 %v677_v55, %v677_v55 }
 0x149   :  { %1656 = vmatpush.bf16.msrb.mxu1 %v2860_v40 }
 0x14a   :  { %1669 = vmatpush.bf16.msrb.mxu2 %v2864_v44  ;;  %1783 = vmatpush.bf16.msrb.mxu3 %v2924_v57 }
 0x14d   :  { %1657 = vmatpush.bf16.msrb.mxu1 %v2852_v1  ;;  %v1833_v1 = vld [vmem:[%s4597_s5 + $0x78] sm:$0xff] }
 0x14e   :  { %1670 = vmatpush.bf16.msrb.mxu2 %v2856_v2  ;;  %1784 = vmatpush.bf16.msrb.mxu3 %v2916_v3  ;;  %v1832_v2 = vld [vmem:[%s4597_s5 + $0x70] sm:$0xff] }
 0x151   :  { %1658 = vmatpush.bf16.msrb.mxu1 %v2844_v13 }
 0x152   :  { %1671 = vmatpush.bf16.msrb.mxu2 %v2848_v14  ;;  %1785 = vmatpush.bf16.msrb.mxu3 %v2908_v16  ;;  %v1829_v16 = vld [vmem:[%s4597_s5 + $0x58] sm:$0xff] }
 0x155   :  { %1659 = vmatpush.bf16.msrb.mxu1 %v2836_v23  ;;  %v1826_v23 = vld [vmem:[%s4597_s5 + $0x40] sm:$0xff] }
 0x156   :  { %1672 = vmatpush.bf16.msrb.mxu2 %v2840_v24  ;;  %1786 = vmatpush.bf16.msrb.mxu3 %v2900_v25  ;;  %v1845_v24 = vld [vmem:[%s4597_s5 + $0xd8] sm:$0xff] }
 0x159   :  { %1660 = vmatpush.bf16.msrb.mxu1 %v2828_v30 }
 0x15a   :  { %1673 = vmatpush.bf16.msrb.mxu2 %v2832_v56  ;;  %1787 = vmatpush.bf16.msrb.mxu3 %v2892_v31  ;;  %v1822_v56 = vld [vmem:[%s4597_s5 + $0x20] sm:$0xff]  ;;  %v1841_v31 = vld [vmem:[%s4597_s5 + $0xb8] sm:$0xff] }
 0x15d   :  { %1788 = vmatmul.bf16.vlgmr.msrb.gmra.mxu3 %v4300_v36  ;;  %1661 = vmatpush.bf16.msrb.mxu1 %v2820_v60  ;;  %v1820_v60 = vld [vmem:[%s4597_s5 + $0x10] sm:$0xff] }
 0x15e   :  { %1674 = vmatpush.bf16.msrb.mxu2 %v2824_v35  ;;  %v1819_v35 = vld [vmem:[%s4597_s5 + $0x8] sm:$0xff] }
 0x161   :  { %1662 = vmatpush.bf16.msrb.mxu1 %v2812_v43 }
 0x162   :  { %1675 = vmatpush.bf16.msrb.mxu2 %v2816_v45  ;;  %v1836_v45 = vld [vmem:[%s4597_s5 + $0x90] sm:$0xff] }
 0x164   :  { %1663 = vmatmul.bf16.vlgmr.msrb.gmra.mxu1 %v686_v46 }
 0x165   :  { %1676 = vmatmul.bf16.vlgmr.msrb.gmra.mxu2 %v686_v46  ;;  %1854 = vmatpush.msra.mxu1 %v1833_v1 }
 0x166   :  { %1874 = vmatpush.msra.mxu2 %v1849_v5 }
 0x167   :  { %1855 = vmatpush.msra.mxu1 %v1832_v2 }
 0x168   :  { %1875 = vmatpush.msra.mxu2 %v1848_v17  ;;  %v1930_v17 = vld [vmem:[%s4601_s9 + $0x18] sm:$0xff] }
 0x169   :  { %1856 = vmatpush.msra.mxu1 %v1831_v4 }
 0x16a   :  { %1876 = vmatpush.msra.mxu2 %v1847_v19  ;;  %v1928_v19 = vld [vmem:[%s4601_s9 + $0x8] sm:$0xff] }
 0x16b   :  { %1857 = vmatpush.msra.mxu1 %v1830_v10  ;;  %v1898_v10 = vld [vmem:[%s4600_s7 + $0x18] sm:$0xff] }
 0x16c   :  { %1877 = vmatpush.msra.mxu2 %v1846_v22  ;;  %1919 = vmatpush.msra.mxu3 %v1898_v10 }
 0x16d   :  { %1858 = vmatpush.msra.mxu1 %v1829_v16  ;;  %v1895_v16 = vld [vmem:[%s4600_s7] sm:$0xff] }
 0x16e   :  { %1878 = vmatpush.msra.mxu2 %v1845_v24 }
 0x16f   :  { %1859 = vmatpush.msra.mxu1 %v1828_v18  ;;  %v1929_v18 = vld [vmem:[%s4601_s9 + $0x10] sm:$0xff] }
 0x170   :  { %1879 = vmatpush.msra.mxu2 %v1844_v27 }
 0x171   :  { %1860 = vmatpush.msra.mxu1 %v1827_v21  ;;  %v3157_v21 = vld [vmem:[%s4596_s6] ss:$0 sm:$0xff] }
 0x172   :  { %1880 = vmatpush.msra.mxu2 %v1843_v41  ;;  %v3159_v41 = vld [vmem:[%s4602_s10] ss:$0 sm:$0xff] }
 0x173   :  { %1861 = vmatpush.msra.mxu1 %v1826_v23 }
 0x174   :  { %1881 = vmatpush.msra.mxu2 %v1842_v11 }
 0x175   :  { %1862 = vmatpush.msra.mxu1 %v1825_v26 }
 0x176   :  { %1882 = vmatpush.msra.mxu2 %v1841_v31 }
 0x177   :  { %1863 = vmatpush.msra.mxu1 %v1824_v28  ;;  %v1959_v28 = vld [vmem:[%s4606_s11] sm:$0xff] }
 0x178   :  { %1883 = vmatpush.msra.mxu2 %v1840_v34 }
 0x179   :  { %1864 = vmatpush.msra.mxu1 %v1823_v29  ;;  %v1962_v29 = vmul.f32 -0.5, %v1959_v28 }
 0x17a   :  { %1884 = vmatpush.msra.mxu2 %v1839_v15  ;;  %v3158_v15 = vld [vmem:[%s4599_s8] ss:$0 sm:$0xff] }
 0x17b   :  { %1865 = vmatpush.msra.mxu1 %v1822_v56  ;;  %v1963_v31 = vmul.f32 %v1962_v29, %v1959_v28 }
 0x17c   :  { %1885 = vmatpush.msra.mxu2 %v1838_v12 }
 0x17d   :  { %1866 = vmatpush.msra.mxu1 %v1821_v33 }
 0x17e   :  { %1886 = vmatpush.msra.mxu2 %v1837_v39 }
 0x17f   :  { %v916_v47 = vpop.f32.mrf.mxu3  ;;  %1867 = vmatpush.msra.mxu1 %v1820_v60 }
 0x180   :  { %1887 = vmatpush.msra.mxu2 %v1836_v45 }
 0x181   :  { %v810_v49 = vpop.f32.mrf.mxu1  ;;  %1868 = vmatpush.msra.mxu1 %v1819_v35 }
 0x182   :  { %v4421_v50 = vadd.f32 %v916_v47, %v810_v49  ;;  %v1835_v47 = vld [vmem:[%s4597_s5 + $0x88] sm:$0xff]  ;;  %v1834_v49 = vld [vmem:[%s4597_s5 + $0x80] sm:$0xff] }
 0x183   :  { %1869 = vmatpush.msra.mxu1 %v1818_v38  ;;  %1888 = vmatpush.msra.mxu2 %v1835_v47 }
 0x185   :  { %1889 = vmatpush.msra.mxu2 %v1834_v49 }
 0x187   :  { %v823_v42 = vpop.f32.mrf.mxu2  ;;  %v918_v51 = vpop.f32.mrf.mxu3 }
 0x189   :  { %v812_v52 = vpop.f32.mrf.mxu1 }
 0x18f   :  { %v825_v53 = vpop.f32.mrf.mxu2  ;;  %v1052_v54 = vpop.f32.mrf.mxu3 }
 0x191   :  { %v929_v36 = vpop.f32.mrf.mxu1 }
 0x192   :  { %v930_v6 = vadd.f32 %v929_v36, %v823_v42  ;;  %v1808_v36 = vld [vmem:[%s4598_s4] sm:$0x3] }
 0x194   :  { %v1057_v40 = vadd.f32 %v1052_v54, %v930_v6 }
 0x197   :  { %v4423_v44 = vpop.f32.mrf.mxu2  ;;  %v1054_v57 = vpop.f32.mrf.mxu3 }
 0x198   :  { %v1056_v51 = vadd.f32 %v4423_v44, %v4421_v50 }
 0x199   :  { %v931_v58 = vpop.f32.mrf.mxu1  ;;  %v1302_v59 = vpop.f32.mrf.mxu0 }
 0x19f   :  { %v1041_v61 = vpop.f32.mrf.mxu2 }
 0x1a1   :  { %v4427_v63 = vpop.f32.mrf.mxu1  ;;  %v1304_v0 = vpop.f32.mrf.mxu0 }
 0x1a2   :  { %v4425_v62 = vpop.f32.mrf.mxu3  ;;  %v1181_v52 = vadd.f32 %v4427_v63, %v1056_v51 }
 0x1a4   :  { %v1306_v53 = vadd.f32 %v4425_v62, %v1181_v52 }
 0x1a7   :  { %v1177_v3 = vpop.f32.mrf.mxu2 }
 0x1a8   :  { %v1182_v7 = vadd.f32 %v1177_v3, %v1057_v40  ;;  %v1811_v3 = vperm.slane %v1808_v36, 1 }
 0x1a9   :  { %v1166_v9 = vpop.f32.mrf.mxu1  ;;  %v4444_v13 = vpop.f32.mrf.mxu0 }
 0x1aa   :  { %v1291_v8 = vpop.f32.mrf.mxu3  ;;  %v4446_v14 = vadd.f32 %v1302_v59, %v1182_v7  ;;  %v1810_v59 = vperm.slane %v1808_v36, 0 }
 0x1af   :  { %v1179_v20 = vpop.f32.mrf.mxu2 }
 0x1b0   :  { %v1927_v20 = vld [vmem:[%s4601_s9] sm:$0xff] }
 0x1b1   :  { %v1554_v25 = vpop.f32.mrf.mxu0 }
 0x1bc   :  { %v1802_v30 = vpop.f32.mrf.mxu0 }
 0x1c0   :  { %v1539_v32 = vpop.f32.mrf.mxu3 }
 0x1c1   :  { %v1414_v48 = vpop.f32.mrf.mxu1 }
 0x1c2   :  { %v1431_v54 = vadd.f32 %v1414_v48, %v1306_v53 }
 0x1c4   :  { %v1804_v37 = vpop.f32.mrf.mxu0  ;;  %v1556_v40 = vadd.f32 %v1539_v32, %v1431_v54 }
 0x1c8   :  { %v1427_v43 = vpop.f32.mrf.mxu2  ;;  %v1541_v55 = vpop.f32.mrf.mxu3 }
 0x1c9   :  { %v1416_v46 = vpop.f32.mrf.mxu1  ;;  %v1432_v61 = vadd.f32 %v1427_v43, %v4446_v14  ;;  %v1896_v14 = vld [vmem:[%s4600_s7 + $0x8] sm:$0xff]  ;;  %v3160_v55 = vld [vmem:[%s4603_s12] ss:$0 sm:$0xff] }
 0x1ca   :  { %v3161_v46 = vld [vmem:[%s4604_s13] ss:$0 sm:$0xff] }
 0x1cb   :  { %v1557_v50 = vadd.f32 %v4444_v13, %v1432_v61  ;;  %v1897_v13 = vld [vmem:[%s4600_s7 + $0x10] sm:$0xff] }
 0x1cc   :  { %1920 = vmatpush.msra.mxu3 %v1897_v13 }
 0x1ce   :  { %1921 = vmatpush.msra.mxu3 %v1896_v14 }
 0x1d0   :  { %v1429_v42 = vpop.f32.mrf.mxu2  ;;  %1922 = vmatpush.msra.mxu3 %v1895_v16 }
 0x1d1   :  { %v3162_v42 = vld [vmem:[%s4605_s14] ss:$0 sm:$0xff] }
 0x1d2   :  { %1947 = vmatpush.msrb.mxu3 %v1930_v17 }
 0x1d4   :  { %1948 = vmatpush.msrb.mxu3 %v1929_v18 }
 0x1d6   :  { %1949 = vmatpush.msrb.mxu3 %v1928_v19 }
 0x1d8   :  { %1950 = vmatpush.msrb.mxu3 %v1927_v20 }
 0x1e0   :  { %v1789_v6 = vpop.f32.mrf.mxu3 }
 0x1e1   :  { %v1664_v57 = vpop.f32.mrf.mxu1 }
 0x1e2   :  { %v1681_v58 = vadd.f32 %v1664_v57, %v1556_v40 }
 0x1e4   :  { %v1806_v0 = vadd.f32 %v1789_v6, %v1681_v58 }
 0x1e6   :  { %v1814_v1 = vadd.f32 %v1810_v59, %v1806_v0 }
 0x1e8   :  { %v1816_v44 = vmax.f32 %v1814_v1, 0.0  ;;  %v1677_v63 = vpop.f32.mrf.mxu2  ;;  %v1791_v2 = vpop.f32.mrf.mxu3 }
 0x1e9   :  { %v1682_v62 = vadd.f32 %v1677_v63, %v1557_v50  ;;  %v1666_v4 = vpop.f32.mrf.mxu1 }
 0x1ea   :  { %1870 = vmatmul.f32.vlgmr.msra.gmra.mxu1 %v1816_v44 }
 0x1eb   :  { %v1807_v5 = vadd.f32 %v1802_v30, %v1682_v62 }
 0x1ed   :  { %v1815_v7 = vadd.f32 %v1811_v3, %v1807_v5 }
 0x1ef   :  { %v1817_v8 = vmax.f32 %v1815_v7, 0.0 }
 0x1f0   :  { %v1679_v9 = vpop.f32.mrf.mxu2 }
 0x1f1   :  { %1890 = vmatmul.f32.vlgmr.msra.gmra.mxu2 %v1817_v8 }
 0x267   :  { %v1871_v22 = vpop.f32.mrf.mxu1 }
 0x268   :  { %v1872_v23 = vadd.f32 %v3157_v21, %v1871_v22 }
 0x274   :  { %v1891_v24 = vpop.f32.mrf.mxu2 }
 0x275   :  { %v1892_v25 = vadd.f32 %v1891_v24, %v1872_v23 }
 0x277   :  { %v1894_v26 = vmax.f32 %v1892_v25, 0.0 }
 0x279   :  { %2953 = vmatmul.msk.f32.vlgmr.msra.gmra.mxu3 %vm1903_vm1, %v1894_v26 }
 0x281   :  { %2954 = vmatmul.msk.f32.vlgmr.msrb.gmra.mxu3 %vm1903_vm1, %v1894_v26 }
 0x2fc   :  { %v1924_v27 = vpop.f32.mrf.mxu3 }
 0x2fd   :  { %v1925_v12 = vadd.f32 %v3158_v15, %v1924_v27 }
 0x304   :  { %v1952_v11 = vpop.f32.mrf.mxu3 }
 0x305   :  { %v1953_v30 = vadd.f32 %v3159_v41, %v1952_v11 }
 0x307   :  { %v1955_v56 = vmax.f32 %v1953_v30, -20.0 }
 0x309   :  { %v1956_v32 = vmin.f32 %v1955_v56, 2.0 }
 0x30b   :  { %v1957_v33 = vmul.f32 1.442695, %v1956_v32  ;;  %v1964_v34 = vsub.f32 %v1963_v31, %v1956_v32 }
 0x30d   :  { %3163 = vpow2.f32 %v1957_v33  ;;  %v2955_v48 = vadd.f32 -0.9189385, %v1964_v34 }
 0x30f   :  { %v1967_v60 = vsel %vm1966_vm2, %v2955_v48, 0.0 }
 0x310   :  { %1968 = vadd.xlane.f32.xlu0 %v1967_v60 }
 0x313   :  { %v3164_v35 = vpop.eup %3163 }
 0x314   :  { %v1960_v37 = vmul.f32 %v3164_v35, %v1959_v28 }
 0x316   :  { %v1961_v38 = vadd.f32 %v1960_v37, %v1925_v12 }
 0x318   :  { %3165 = vtanh.f32 %v1961_v38  ;;  %v1970_v39 = vmul.f32 -2.0, %v1961_v38  ;;  %v1986_v44 = vsub.f32 0.6931472, %v1961_v38 }
 0x31a   :  { %v1972_v43 = vand.u32 2147483647, %v1970_v39  ;;  %v1971_v0 = vmax.f32 %v1970_v39, 0.0 }
 0x31c   :  { %v1973_v45 = vsub.f32 0.0, %v1972_v43 }
 0x31e   :  { %v3166_v47 = vpop.eup %3165  ;;  %v1974_v49 = vmul.f32 1.442695, %v1973_v45 }
 0x31f   :  { %v1998_v51 = vmul.f32 %v3166_v47, %v3160_v55 }
 0x320   :  { %3167 = vpow2.f32 %v1974_v49 }
 0x321   :  { %v2003_v52 = vmul.f32 %v3161_v46, %v1998_v51 }
 0x323   :  { %v2008_v53 = vadd.f32 %v3162_v42, %v2003_v52 }
 0x325   :  { %2009 = vst.msk [vmem:[%s4607_s15] sm:$0xff] %vm1966_vm2, %v2008_v53 }
 0x326   :  { %v3168_v54 = vpop.eup %3167 }
 0x327   :  { %v1976_v36 = vadd.f32 1.0, %v3168_v54  ;;  %v1979_v6 = vmul.f32 -0.5, %v3168_v54  ;;  %v1982_v57 = vand.u32 2147483647, %v3168_v54 }
 0x329   :  { %3169 = vlog2.f32 %v1976_v36  ;;  %v1980_v40 = vadd.f32 1.0, %v1979_v6  ;;  %vm1983_vm3 = vcmp.lt.f32.partialorder %v1982_v57, 0.0004427343 }
 0x32b   :  { %v1981_v61 = vmul.f32 %v3168_v54, %v1980_v40 }
 0x32f   :  { %v3170_v58 = vpop.eup %3169 }
 0x330   :  { %v1978_v59 = vmul.f32 0.6931472, %v3170_v58 }
 0x332   :  { %v1984_v1 = vsel %vm1983_vm3, %v1981_v61, %v1978_v59 }
 0x333   :  { %v1985_v50 = vadd.f32 %v1984_v1, %v1971_v0 }
 0x335   :  { %v1987_v63 = vsub.f32 %v1986_v44, %v1985_v50 }
 0x337   :  { %v1988_v2 = vmul.f32 2.0, %v1987_v63 }
 0x339   :  { %v1989_v62 = vsel %vm1966_vm2, %v1988_v2, 0.0 }
 0x33a   :  { %1990 = vadd.xlane.f32.xlu0 %v1989_v62 }
 0x383   :  { %v1969_v3 = vpop.xlane.xlu0 %1968 }
 0x3ad   :  { %v1991_v4 = vpop.xlane.xlu0 %1990 }
 0x3ae   :  { %v1992_v5 = vsub.f32 %v1969_v3, %v1991_v4 }
 0x3b0   :  { %2011 = vst.msk [vmem:[%s4608_s16] sm:$0xff] %vm2010_vm4, %v1992_v5 }

</bundles_post_ra>
